<compile_context>
chip_gen: v5e
topology: v5e:2x2
jax: 0.10.0
libtpu: 0.0.40
codegen_flags: <defaults>
</compile_context>

<pallas_src>
import functools

import jax
import jax.numpy as jnp
import numpy as np
from jax.experimental import pallas as pl
from jax.experimental.pallas import tpu as pltpu

_LANE = 128
_N_ALIGN = 256   # fills 256-wide MXU output/contraction on v6e/v7x; harmless on v5e


def _round_up(v, m):
    return ((v + m - 1) // m) * m


# --------------------------------------------------------------------------
# Fused Pallas kernel: whole ChebyNet forward (all layers) in one program
# --------------------------------------------------------------------------
def _fused_chebynet_kernel(x_ref, gso_ref, w_ref, b_ref, o_ref, *,
                           K, n_layers, n_class):
    """Everything resident in VMEM, transposed (features x nodes) layout.

    x_ref   : (F_pad, N_pad)         f32   x^T, zero padded
    gso_ref : (N_pad, N_pad)         bf16  gso^T, zero padded
    w_ref   : (L, K, F_pad, F_pad)   bf16  W_k^T per layer (rows=F_out, cols=F_in)
    b_ref   : (L, F_pad, 1)          f32   bias^T per layer (zero padded)
    o_ref   : (F_pad, N_pad)         f32   final log-softmax^T (padded rows/cols junk)
    """
    gso_t = gso_ref[...]                    # bf16 (N_pad, N_pad)
    h = x_ref[...]                          # f32  (F_pad, N_pad)

    for layer in range(n_layers):
        b = b_ref[layer]                    # f32 (F_pad, 1)

        # Each T_k^T is cast to bf16 exactly once and reused for (a) its
        # projection dot against a static slice of the weight ref and (b) the
        # next gso dot of the recurrence.  No concat, no duplicate casts,
        # only t_prev/t_cur/acc live in f32.
        h_bf = h.astype(jnp.bfloat16)       # T_0^T
        acc = jnp.dot(w_ref[layer, 0], h_bf,
                      preferred_element_type=jnp.float32)

        if K >= 2:
            t_prev = h                      # f32
            t_cur = jnp.dot(h_bf, gso_t,    # T_1^T = T_0^T @ gso^T
                            preferred_element_type=jnp.float32)
            for k in range(1, K):
                t_bf = t_cur.astype(jnp.bfloat16)
                acc = acc + jnp.dot(w_ref[layer, k], t_bf,
                                    preferred_element_type=jnp.float32)
                if k + 1 < K:
                    t_next = 2.0 * jnp.dot(t_bf, gso_t,
                                           preferred_element_type=jnp.float32) - t_prev
                    t_prev, t_cur = t_cur, t_next

        acc = acc + b                       # (F_pad, N_pad) + (F_pad, 1) lane-bcast

        if layer < n_layers - 1:
            # ReLU; dropout is identity (inference / eval mode).
            # NOTE: padded node *columns* of acc pick up ReLU(bias); this is
            # harmless because gso^T's padded rows are zero (valid columns are
            # never contaminated) and the padding is sliced off in the wrapper.
            h = jnp.maximum(acc, 0.0)
        else:
            # log_softmax over the valid class rows only (classes live on the
            # sublane axis in the transposed layout); padded class rows are
            # masked so they cannot corrupt max / sum-exp.
            row = jax.lax.broadcasted_iota(jnp.int32, acc.shape, 0)
            logits = jnp.where(row < n_class, acc, -1e30)
            m = jnp.max(logits, axis=0, keepdims=True)
            shifted = logits - m
            lse = jnp.log(jnp.sum(jnp.exp(shifted), axis=0, keepdims=True))
            h = shifted - lse

    o_ref[...] = h.astype(o_ref.dtype)


# --------------------------------------------------------------------------
# Wrapper: transposed padding, weight packing, single pallas_call
# --------------------------------------------------------------------------
def chebynet_forward(x, gso, params):
    """params: list of (weight[K, F_in, F_out], bias[F_out]) per layer."""
    N, n_feat = x.shape
    n_layers = len(params)
    K = params[0][0].shape[0]
    n_class = params[-1][0].shape[2]

    F_pad = _round_up(max([n_feat] + [w.shape[2] for w, _ in params]), _LANE)
    N_pad = _round_up(N, _N_ALIGN)

    # Transposed, zero-padded operands (features on sublanes, nodes on lanes).
    x_t = jnp.zeros((F_pad, N_pad), jnp.float32)
    x_t = x_t.at[:n_feat, :N].set(x.T.astype(jnp.float32))

    gso_t = jnp.zeros((N_pad, N_pad), jnp.float32)
    gso_t = gso_t.at[:N, :N].set(gso.T.astype(jnp.float32))
    gso_t = gso_t.astype(jnp.bfloat16)      # halves HBM/VMEM footprint

    w_all = jnp.zeros((n_layers, K, F_pad, F_pad), jnp.float32)
    b_all = jnp.zeros((n_layers, F_pad, 1), jnp.float32)
    for l, (w, b) in enumerate(params):
        k_l, f_in, f_out = w.shape
        assert k_l == K
        for k in range(K):
            w_all = w_all.at[l, k, :f_out, :f_in].set(w[k].T.astype(jnp.float32))
        b_all = b_all.at[l, :f_out, 0].set(b.astype(jnp.float32))
    w_all = w_all.astype(jnp.bfloat16)

    # VMEM budget from the actual resident working set; cap at ~85% of the
    # per-generation physical VMEM (queried from hardware).
    bytes_gso = N_pad * N_pad * 2
    bytes_act = 6 * F_pad * N_pad * 4            # h, t_prev, t_cur, t_next, acc + slack
    bytes_bf = 2 * F_pad * N_pad * 2             # bf16 staging copies
    bytes_w = n_layers * K * F_pad * F_pad * 2
    bytes_b = n_layers * F_pad * _LANE * 4
    bytes_io = 2 * F_pad * N_pad * 4             # x^T input + output
    est = bytes_gso + bytes_act + bytes_bf + bytes_w + bytes_b + bytes_io
    try:
        vmem_cap = int(pltpu.get_tpu_info().vmem_capacity_bytes)
    except Exception:
        vmem_cap = 64 << 20
    vmem_limit = int(min(0.85 * vmem_cap, max(2 * est + (8 << 20), 32 << 20)))

    flops = 2 * n_layers * ((K - 1) * N_pad * N_pad * F_pad
                            + K * F_pad * F_pad * N_pad)
    cost = pl.CostEstimate(
        flops=int(flops),
        transcendentals=int(F_pad * N_pad + N_pad),
        bytes_accessed=int(bytes_gso + bytes_w + bytes_io))

    kernel = functools.partial(_fused_chebynet_kernel, K=K,
                               n_layers=n_layers, n_class=n_class)
    out_t = pl.pallas_call(
        kernel,
        out_shape=jax.ShapeDtypeStruct((F_pad, N_pad), jnp.float32),
        in_specs=[pl.BlockSpec(memory_space=pltpu.MemorySpace.VMEM)] * 4,
        out_specs=pl.BlockSpec(memory_space=pltpu.MemorySpace.VMEM),
        compiler_params=pltpu.CompilerParams(vmem_limit_bytes=vmem_limit),
        cost_estimate=cost,
    )(x_t, gso_t, w_all, b_all)
    # TODO(synk): for graphs where the (N_pad, N_pad) gso exceeds the VMEM
    # budget (esp. v7x, 64 MiB/TC) or to use both v7x TensorCores, switch to a
    # row-tiled gso pipeline: grid over gso row blocks marked "parallel",
    # full T_{k-1} kept resident, one pass per Chebyshev order k.
    return out_t[:n_class, :N].T


# --------------------------------------------------------------------------
# Pure-JAX f32 reference (spec semantics, for correctness checking only)
# --------------------------------------------------------------------------
def _cheb_conv_ref(x, gso, w, b):
    K = w.shape[0]
    polys = [x]
    if K >= 2:
        polys.append(gso @ x)
        for _ in range(2, K):
            polys.append(2.0 * (gso @ polys[-1]) - polys[-2])
    feat = jnp.stack(polys, axis=0)                 # (K, N, F_in)
    return jnp.einsum('bij,bjk->ik', feat, w) + b   # (N, F_out)


def _chebynet_ref(x, gso, params):
    n_layers = len(params)
    for layer_idx, (w, b) in enumerate(params):
        x = _cheb_conv_ref(x, gso, w, b)
        if layer_idx < n_layers - 1:
            x = jnp.maximum(x, 0.0)
        else:
            x = jax.nn.log_softmax(x, axis=1)
    return x


# --------------------------------------------------------------------------
# Deterministic parameter init (xavier-uniform-style)
# --------------------------------------------------------------------------
def _init_layer(key, K, f_in, f_out):
    kw, kb = jax.random.split(key)
    bound = float(np.sqrt(6.0 / (f_in + f_out)))
    w = jax.random.uniform(kw, (K, f_in, f_out), jnp.float32, -bound, bound)
    b = jax.random.uniform(kb, (f_out,), jnp.float32, -bound, bound)
    return w, b


if __name__ == "__main__":
    # Small shapes consistent with the module's forward.
    N_nodes, n_feat, n_hid, n_class = 16, 8, 32, 4
    K_order, K_layer = 3, 3

    key = jax.random.PRNGKey(0)
    kx, kg, *kl = jax.random.split(key, 2 + K_layer)

    x = jax.random.normal(kx, (N_nodes, n_feat), jnp.float32)
    # Symmetric "graph shift operator" (e.g. scaled normalized Laplacian).
    a = jax.random.normal(kg, (N_nodes, N_nodes), jnp.float32)
    gso = (a + a.T) / (2.0 * N_nodes)

    dims = [n_feat] + [n_hid] * (K_layer - 1) + [n_class]
    params = [
        _init_layer(kl[i], K_order, dims[i], dims[i + 1])
        for i in range(K_layer)
    ]

    out = chebynet_forward(x, gso, params)
    out = jax.block_until_ready(out)

    ref = _chebynet_ref(x, gso, params)
    # bf16 MXU operands (f32 accumulation) -> loosened tolerance vs f32 ref.
    np.testing.assert_allclose(np.asarray(out), np.asarray(ref),
                               rtol=3e-2, atol=3e-2)
    assert out.shape == (N_nodes, n_class)
    assert bool(jnp.all(jnp.isfinite(out)))

    print("KERNEL_OK")
</pallas_src>

<mosaic_0001>
module attributes {stable_mosaic.version = 11 : i64} {
  func.func @_fused_chebynet_kernel(%arg0: memref<128x256xf32, #tpu.memory_space<vmem>>, %arg1: memref<256x256xbf16, #tpu.memory_space<vmem>>, %arg2: memref<3x3x128x128xbf16, #tpu.memory_space<vmem>>, %arg3: memref<3x128x1xf32, #tpu.memory_space<vmem>>, %arg4: memref<128x256xf32, #tpu.memory_space<vmem>>) attributes {dimension_semantics = [], scalar_prefetch = 0 : i64, scratch_operands = 0 : i64, tpu.core_type = #tpu.core_type<tc>} {
    %c0 = arith.constant 0 : index
    %c0_0 = arith.constant 0 : index
    %0 = vector.load %arg1[%c0, %c0_0] : memref<256x256xbf16, #tpu.memory_space<vmem>>, vector<256x256xbf16>
    %c0_1 = arith.constant 0 : index
    %c0_2 = arith.constant 0 : index
    %1 = vector.load %arg0[%c0_1, %c0_2] : memref<128x256xf32, #tpu.memory_space<vmem>>, vector<128x256xf32>
    %c0_3 = arith.constant 0 : index
    %c0_4 = arith.constant 0 : index
    %c0_5 = arith.constant 0 : index
    %2 = vector.load %arg3[%c0_3, %c0_4, %c0_5] : memref<3x128x1xf32, #tpu.memory_space<vmem>>, vector<1x128x1xf32>
    %3 = vector.shape_cast %2 : vector<1x128x1xf32> to vector<128x1xf32>
    %4 = arith.truncf %1 : vector<128x256xf32> to vector<128x256xbf16>
    %c0_6 = arith.constant 0 : index
    %c0_7 = arith.constant 0 : index
    %c0_8 = arith.constant 0 : index
    %c0_9 = arith.constant 0 : index
    %5 = vector.load %arg2[%c0_6, %c0_7, %c0_8, %c0_9] : memref<3x3x128x128xbf16, #tpu.memory_space<vmem>>, vector<1x1x128x128xbf16>
    %6 = vector.shape_cast %5 : vector<1x1x128x128xbf16> to vector<128x128xbf16>
    %cst = arith.constant dense<0.000000e+00> : vector<128x256xf32>
    %7 = tpu.matmul %6, %4, %cst {dimension_numbers = #tpu.dot_dimension_numbers<[1], [0], [0], [1], [0, 0, 1, 1], [], []>} : vector<128x128xbf16>, vector<128x256xbf16>, vector<128x256xf32> -> vector<128x256xf32>
    %cst_10 = arith.constant dense<0.000000e+00> : vector<128x256xf32>
    %8 = tpu.matmul %4, %0, %cst_10 {dimension_numbers = #tpu.dot_dimension_numbers<[1], [0], [0], [1], [0, 0, 1, 1], [], []>} : vector<128x256xbf16>, vector<256x256xbf16>, vector<128x256xf32> -> vector<128x256xf32>
    %9 = arith.truncf %8 : vector<128x256xf32> to vector<128x256xbf16>
    %c0_11 = arith.constant 0 : index
    %c1 = arith.constant 1 : index
    %c0_12 = arith.constant 0 : index
    %c0_13 = arith.constant 0 : index
    %10 = vector.load %arg2[%c0_11, %c1, %c0_12, %c0_13] : memref<3x3x128x128xbf16, #tpu.memory_space<vmem>>, vector<1x1x128x128xbf16>
    %11 = vector.shape_cast %10 : vector<1x1x128x128xbf16> to vector<128x128xbf16>
    %cst_14 = arith.constant dense<0.000000e+00> : vector<128x256xf32>
    %12 = tpu.matmul %11, %9, %cst_14 {dimension_numbers = #tpu.dot_dimension_numbers<[1], [0], [0], [1], [0, 0, 1, 1], [], []>} : vector<128x128xbf16>, vector<128x256xbf16>, vector<128x256xf32> -> vector<128x256xf32>
    %13 = arith.addf %7, %12 : vector<128x256xf32>
    %cst_15 = arith.constant dense<0.000000e+00> : vector<128x256xf32>
    %14 = tpu.matmul %9, %0, %cst_15 {dimension_numbers = #tpu.dot_dimension_numbers<[1], [0], [0], [1], [0, 0, 1, 1], [], []>} : vector<128x256xbf16>, vector<256x256xbf16>, vector<128x256xf32> -> vector<128x256xf32>
    %cst_16 = arith.constant 2.000000e+00 : f32
    %15 = vector.broadcast %cst_16 : f32 to vector<128x256xf32>
    %16 = arith.mulf %15, %14 : vector<128x256xf32>
    %17 = arith.subf %16, %1 : vector<128x256xf32>
    %18 = arith.truncf %17 : vector<128x256xf32> to vector<128x256xbf16>
    %c0_17 = arith.constant 0 : index
    %c2 = arith.constant 2 : index
    %c0_18 = arith.constant 0 : index
    %c0_19 = arith.constant 0 : index
    %19 = vector.load %arg2[%c0_17, %c2, %c0_18, %c0_19] : memref<3x3x128x128xbf16, #tpu.memory_space<vmem>>, vector<1x1x128x128xbf16>
    %20 = vector.shape_cast %19 : vector<1x1x128x128xbf16> to vector<128x128xbf16>
    %cst_20 = arith.constant dense<0.000000e+00> : vector<128x256xf32>
    %21 = tpu.matmul %20, %18, %cst_20 {dimension_numbers = #tpu.dot_dimension_numbers<[1], [0], [0], [1], [0, 0, 1, 1], [], []>} : vector<128x128xbf16>, vector<128x256xbf16>, vector<128x256xf32> -> vector<128x256xf32>
    %22 = arith.addf %13, %21 : vector<128x256xf32>
    %23 = vector.broadcast %3 : vector<128x1xf32> to vector<128x256xf32>
    %24 = arith.addf %22, %23 : vector<128x256xf32>
    %cst_21 = arith.constant 0.000000e+00 : f32
    %25 = vector.broadcast %cst_21 : f32 to vector<128x256xf32>
    %26 = arith.maximumf %24, %25 : vector<128x256xf32>
    %c1_22 = arith.constant 1 : index
    %c0_23 = arith.constant 0 : index
    %c0_24 = arith.constant 0 : index
    %27 = vector.load %arg3[%c1_22, %c0_23, %c0_24] : memref<3x128x1xf32, #tpu.memory_space<vmem>>, vector<1x128x1xf32>
    %28 = vector.shape_cast %27 : vector<1x128x1xf32> to vector<128x1xf32>
    %29 = arith.truncf %26 : vector<128x256xf32> to vector<128x256xbf16>
    %c1_25 = arith.constant 1 : index
    %c0_26 = arith.constant 0 : index
    %c0_27 = arith.constant 0 : index
    %c0_28 = arith.constant 0 : index
    %30 = vector.load %arg2[%c1_25, %c0_26, %c0_27, %c0_28] : memref<3x3x128x128xbf16, #tpu.memory_space<vmem>>, vector<1x1x128x128xbf16>
    %31 = vector.shape_cast %30 : vector<1x1x128x128xbf16> to vector<128x128xbf16>
    %cst_29 = arith.constant dense<0.000000e+00> : vector<128x256xf32>
    %32 = tpu.matmul %31, %29, %cst_29 {dimension_numbers = #tpu.dot_dimension_numbers<[1], [0], [0], [1], [0, 0, 1, 1], [], []>} : vector<128x128xbf16>, vector<128x256xbf16>, vector<128x256xf32> -> vector<128x256xf32>
    %cst_30 = arith.constant dense<0.000000e+00> : vector<128x256xf32>
    %33 = tpu.matmul %29, %0, %cst_30 {dimension_numbers = #tpu.dot_dimension_numbers<[1], [0], [0], [1], [0, 0, 1, 1], [], []>} : vector<128x256xbf16>, vector<256x256xbf16>, vector<128x256xf32> -> vector<128x256xf32>
    %34 = arith.truncf %33 : vector<128x256xf32> to vector<128x256xbf16>
    %c1_31 = arith.constant 1 : index
    %c1_32 = arith.constant 1 : index
    %c0_33 = arith.constant 0 : index
    %c0_34 = arith.constant 0 : index
    %35 = vector.load %arg2[%c1_31, %c1_32, %c0_33, %c0_34] : memref<3x3x128x128xbf16, #tpu.memory_space<vmem>>, vector<1x1x128x128xbf16>
    %36 = vector.shape_cast %35 : vector<1x1x128x128xbf16> to vector<128x128xbf16>
    %cst_35 = arith.constant dense<0.000000e+00> : vector<128x256xf32>
    %37 = tpu.matmul %36, %34, %cst_35 {dimension_numbers = #tpu.dot_dimension_numbers<[1], [0], [0], [1], [0, 0, 1, 1], [], []>} : vector<128x128xbf16>, vector<128x256xbf16>, vector<128x256xf32> -> vector<128x256xf32>
    %38 = arith.addf %32, %37 : vector<128x256xf32>
    %cst_36 = arith.constant dense<0.000000e+00> : vector<128x256xf32>
    %39 = tpu.matmul %34, %0, %cst_36 {dimension_numbers = #tpu.dot_dimension_numbers<[1], [0], [0], [1], [0, 0, 1, 1], [], []>} : vector<128x256xbf16>, vector<256x256xbf16>, vector<128x256xf32> -> vector<128x256xf32>
    %cst_37 = arith.constant 2.000000e+00 : f32
    %40 = vector.broadcast %cst_37 : f32 to vector<128x256xf32>
    %41 = arith.mulf %40, %39 : vector<128x256xf32>
    %42 = arith.subf %41, %26 : vector<128x256xf32>
    %43 = arith.truncf %42 : vector<128x256xf32> to vector<128x256xbf16>
    %c1_38 = arith.constant 1 : index
    %c2_39 = arith.constant 2 : index
    %c0_40 = arith.constant 0 : index
    %c0_41 = arith.constant 0 : index
    %44 = vector.load %arg2[%c1_38, %c2_39, %c0_40, %c0_41] : memref<3x3x128x128xbf16, #tpu.memory_space<vmem>>, vector<1x1x128x128xbf16>
    %45 = vector.shape_cast %44 : vector<1x1x128x128xbf16> to vector<128x128xbf16>
    %cst_42 = arith.constant dense<0.000000e+00> : vector<128x256xf32>
    %46 = tpu.matmul %45, %43, %cst_42 {dimension_numbers = #tpu.dot_dimension_numbers<[1], [0], [0], [1], [0, 0, 1, 1], [], []>} : vector<128x128xbf16>, vector<128x256xbf16>, vector<128x256xf32> -> vector<128x256xf32>
    %47 = arith.addf %38, %46 : vector<128x256xf32>
    %48 = vector.broadcast %28 : vector<128x1xf32> to vector<128x256xf32>
    %49 = arith.addf %47, %48 : vector<128x256xf32>
    %cst_43 = arith.constant 0.000000e+00 : f32
    %50 = vector.broadcast %cst_43 : f32 to vector<128x256xf32>
    %51 = arith.maximumf %49, %50 : vector<128x256xf32>
    %c2_44 = arith.constant 2 : index
    %c0_45 = arith.constant 0 : index
    %c0_46 = arith.constant 0 : index
    %52 = vector.load %arg3[%c2_44, %c0_45, %c0_46] : memref<3x128x1xf32, #tpu.memory_space<vmem>>, vector<1x128x1xf32>
    %53 = vector.shape_cast %52 : vector<1x128x1xf32> to vector<128x1xf32>
    %54 = arith.truncf %51 : vector<128x256xf32> to vector<128x256xbf16>
    %c2_47 = arith.constant 2 : index
    %c0_48 = arith.constant 0 : index
    %c0_49 = arith.constant 0 : index
    %c0_50 = arith.constant 0 : index
    %55 = vector.load %arg2[%c2_47, %c0_48, %c0_49, %c0_50] : memref<3x3x128x128xbf16, #tpu.memory_space<vmem>>, vector<1x1x128x128xbf16>
    %56 = vector.shape_cast %55 : vector<1x1x128x128xbf16> to vector<128x128xbf16>
    %cst_51 = arith.constant dense<0.000000e+00> : vector<128x256xf32>
    %57 = tpu.matmul %56, %54, %cst_51 {dimension_numbers = #tpu.dot_dimension_numbers<[1], [0], [0], [1], [0, 0, 1, 1], [], []>} : vector<128x128xbf16>, vector<128x256xbf16>, vector<128x256xf32> -> vector<128x256xf32>
    %cst_52 = arith.constant dense<0.000000e+00> : vector<128x256xf32>
    %58 = tpu.matmul %54, %0, %cst_52 {dimension_numbers = #tpu.dot_dimension_numbers<[1], [0], [0], [1], [0, 0, 1, 1], [], []>} : vector<128x256xbf16>, vector<256x256xbf16>, vector<128x256xf32> -> vector<128x256xf32>
    %59 = arith.truncf %58 : vector<128x256xf32> to vector<128x256xbf16>
    %c2_53 = arith.constant 2 : index
    %c1_54 = arith.constant 1 : index
    %c0_55 = arith.constant 0 : index
    %c0_56 = arith.constant 0 : index
    %60 = vector.load %arg2[%c2_53, %c1_54, %c0_55, %c0_56] : memref<3x3x128x128xbf16, #tpu.memory_space<vmem>>, vector<1x1x128x128xbf16>
    %61 = vector.shape_cast %60 : vector<1x1x128x128xbf16> to vector<128x128xbf16>
    %cst_57 = arith.constant dense<0.000000e+00> : vector<128x256xf32>
    %62 = tpu.matmul %61, %59, %cst_57 {dimension_numbers = #tpu.dot_dimension_numbers<[1], [0], [0], [1], [0, 0, 1, 1], [], []>} : vector<128x128xbf16>, vector<128x256xbf16>, vector<128x256xf32> -> vector<128x256xf32>
    %63 = arith.addf %57, %62 : vector<128x256xf32>
    %cst_58 = arith.constant dense<0.000000e+00> : vector<128x256xf32>
    %64 = tpu.matmul %59, %0, %cst_58 {dimension_numbers = #tpu.dot_dimension_numbers<[1], [0], [0], [1], [0, 0, 1, 1], [], []>} : vector<128x256xbf16>, vector<256x256xbf16>, vector<128x256xf32> -> vector<128x256xf32>
    %cst_59 = arith.constant 2.000000e+00 : f32
    %65 = vector.broadcast %cst_59 : f32 to vector<128x256xf32>
    %66 = arith.mulf %65, %64 : vector<128x256xf32>
    %67 = arith.subf %66, %51 : vector<128x256xf32>
    %68 = arith.truncf %67 : vector<128x256xf32> to vector<128x256xbf16>
    %c2_60 = arith.constant 2 : index
    %c2_61 = arith.constant 2 : index
    %c0_62 = arith.constant 0 : index
    %c0_63 = arith.constant 0 : index
    %69 = vector.load %arg2[%c2_60, %c2_61, %c0_62, %c0_63] : memref<3x3x128x128xbf16, #tpu.memory_space<vmem>>, vector<1x1x128x128xbf16>
    %70 = vector.shape_cast %69 : vector<1x1x128x128xbf16> to vector<128x128xbf16>
    %cst_64 = arith.constant dense<0.000000e+00> : vector<128x256xf32>
    %71 = tpu.matmul %70, %68, %cst_64 {dimension_numbers = #tpu.dot_dimension_numbers<[1], [0], [0], [1], [0, 0, 1, 1], [], []>} : vector<128x128xbf16>, vector<128x256xbf16>, vector<128x256xf32> -> vector<128x256xf32>
    %72 = arith.addf %63, %71 : vector<128x256xf32>
    %73 = vector.broadcast %53 : vector<128x1xf32> to vector<128x256xf32>
    %74 = arith.addf %72, %73 : vector<128x256xf32>
    %75 = tpu.iota {dimensions = array<i32: 0>} : vector<128x256xi32>
    %c4_i32 = arith.constant 4 : i32
    %76 = vector.broadcast %c4_i32 : i32 to vector<128x256xi32>
    %77 = arith.cmpi slt, %75, %76 : vector<128x256xi32>
    %cst_65 = arith.constant -1.000000e+30 : f32
    %78 = vector.broadcast %cst_65 : f32 to vector<128x256xf32>
    %79 = arith.select %77, %74, %78 : vector<128x256xi1>, vector<128x256xf32>
    %cst_66 = arith.constant dense<0xFF800000> : vector<256xf32>
    %80 = vector.multi_reduction <maximumf>, %79, %cst_66 [0] : vector<128x256xf32> to vector<256xf32>
    %81 = vector.shape_cast %80 : vector<256xf32> to vector<1x256xf32>
    %82 = vector.broadcast %81 : vector<1x256xf32> to vector<128x256xf32>
    %83 = arith.subf %79, %82 : vector<128x256xf32>
    %84 = math.exp %83 : vector<128x256xf32>
    %cst_67 = arith.constant dense<0.000000e+00> : vector<256xf32>
    %85 = vector.multi_reduction <add>, %84, %cst_67 [0] : vector<128x256xf32> to vector<256xf32>
    %86 = vector.shape_cast %85 : vector<256xf32> to vector<1x256xf32>
    %87 = math.log %86 : vector<1x256xf32>
    %88 = vector.broadcast %87 : vector<1x256xf32> to vector<128x256xf32>
    %89 = arith.subf %83, %88 : vector<128x256xf32>
    %c0_68 = arith.constant 0 : index
    %c0_69 = arith.constant 0 : index
    %90 = vector.load %arg4[%c0_68, %c0_69] : memref<128x256xf32, #tpu.memory_space<vmem>>, vector<128x256xf32>
    tpu.vector_store %arg4[%c0_68, %c0_69], %89 {strides = array<i32>} : memref<128x256xf32, #tpu.memory_space<vmem>>, vector<128x256xf32>,
    return
  }
}

</mosaic_0001>

<bundles_post_ra>
// kernel: tpu_custom_call.1
= control target key start
LH: loop header
LB: loop body
LE: loop exit
PB: predicated region body
PF: predicated region fallthrough
CT: control target
= control target key end

     0   :  { %9 = vsyncpa [#allocation3], 0  ;;  %s7334_s0 = inlined_call_operand.vmem [shape: f32[128,256], index: 0, kind: input, shape index: {}]   ;;  %s7335_s1 = inlined_call_operand.hbm [shape: bf16[256,256], index: 1, kind: input, shape index: {}]   ;;  %s7336_s2 = inlined_call_operand.hbm [shape: bf16[3,3,128,128], index: 2, kind: input, shape index: {}]   ;;  %s7337_s3 = inlined_call_operand.vmem [shape: f32[3,128,1], index: 3, kind: input, shape index: {}]   ;;  %s7338_s4 = inlined_call_operand.hbm [shape: f32[128,256], index: 4, kind: output, shape index: {}]  }
   0x1   :  { %10 = vsyncpa [#allocation6], 0 }
   0x2   :  { %11 = vsyncpa [#allocation4], 0  ;;  %s18_s17 = sshll.u32 %s7335_s1, 4  ;;  %s4824_s18 = smov [#allocation2]   ;;  %s19_s17 = int_to_ptr.hbm [resolvable:$true] %s18_s17 }
   0x3   :  { %s20_s19 = sshll.u32 %s4824_s18, 4  ;;  %s31_s22 = sshll.u32 %s7336_s2, 4  ;;  %s21_s19 = int_to_ptr.vmem [resolvable:$true] %s20_s19  ;;  %s32_s22 = int_to_ptr.hbm [resolvable:$true] %s31_s22 }
   0x4   :  { %s4825_s23 = smov 128   ;;  %s4826_s24 = smov 8  }
   0x5   :  { %26 = dma.hbm_to_vmem [thread:$0]  %s19_s17, 4096, %s21_s19, [#allocation3], %s4825_s23, %s4825_s23, %s4826_s24  }
   0x6   :  { %s4827_s25 = smov [#allocation5]   ;;  %s4828_s27 = smov 64  }
   0x7   :  { %s33_s26 = sshll.u32 %s4827_s25, 4  ;;  %s4829_s28 = smov 4   ;;  %s34_s26 = int_to_ptr.vmem [resolvable:$true] %s33_s26 }
   0x8   :  { %39 = dma.hbm_to_vmem [thread:$0]  %s32_s22, 9216, %s34_s26, [#allocation6], %s4828_s27, %s4828_s27, %s4829_s28  }
   0x9   :  { %4818 = dma.done.wait [#allocation3], 4096  }
   0xa   :  { %4819 = vsyncadd [#allocation3], 4294963200 }
   0xb   :  { %4820 = dma.done.wait [#allocation6], 9216  }
   0xc   :  { %4821 = vsyncadd [#allocation6], 4294958080  ;;  %v4189_v0 = vld [vmem:[#allocation2 + $0x70] sm:$0xf]  ;;  %v4594_v1 = vld [vmem:[#allocation2 + $0x74] sm:$0xf0] }
   0xd   :  { %v4253_v2 = vld [vmem:[#allocation2 + $0xf0] sm:$0xf]  ;;  %v4865_v3 = vor.u32 %v4594_v1, %v4189_v0  ;;  %v4610_v4 = vld [vmem:[#allocation2 + $0xf4] sm:$0xf0]  ;;  %v4181_v5 = vld [vmem:[#allocation2 + $0x60] sm:$0xf] }
   0xe   :  { %v4592_v6 = vld [vmem:[#allocation2 + $0x64] sm:$0xf0]  ;;  %v4867_v7 = vor.u32 %v4610_v4, %v4253_v2  ;;  %v4245_v8 = vld [vmem:[#allocation2 + $0xe0] sm:$0xf]  ;;  %v4173_v12 = vld [vmem:[#allocation2 + $0x50] sm:$0xf] }
   0xf   :  { %7554 = vst [vmem:[#allocation11_spill] sm:$0xff] %v4865_v3  ;;  %v4608_v9 = vld [vmem:[#allocation2 + $0xe4] sm:$0xf0]  ;;  %4683 = vmatpush.bf16.msra.mxu2 %v4865_v3  ;;  %v4870_v10 = vor.u32 %v4592_v6, %v4181_v5  ;;  %322 = vmatpush.bf16.msra.mxu0 %v4865_v3  ;;  %v4590_v13 = vld [vmem:[#allocation2 + $0x54] sm:$0xf0]  ;;  %v98_v46 = vld [vmem:[%s7334_s0 + $0x80] sm:$0xff] }
  0x10   :  { %7555 = vst [vmem:[#allocation12_spill] sm:$0xff] %v4867_v7  ;;  %4691 = vmatpush.bf16.msra.mxu3 %v4867_v7  ;;  %v4874_v11 = vor.u32 %v4608_v9, %v4245_v8  ;;  %371 = vmatpush.bf16.msra.mxu1 %v4867_v7  ;;  %v4237_v14 = vld [vmem:[#allocation2 + $0xd0] sm:$0xf]  ;;  %v4606_v15 = vld [vmem:[#allocation2 + $0xd4] sm:$0xf0]  ;;  %v4878_v16 = vor.u32 %v4590_v13, %v4173_v12  ;;  %v99_v49 = vld [vmem:[%s7334_s0 + $0x88] sm:$0xff] }
  0x11   :  { %7556 = vst [vmem:[#allocation13_spill] sm:$0xff] %v4870_v10  ;;  %v4882_v17 = vor.u32 %v4606_v15, %v4237_v14  ;;  %v4165_v18 = vld [vmem:[#allocation2 + $0x40] sm:$0xf]  ;;  %v4588_v19 = vld [vmem:[#allocation2 + $0x44] sm:$0xf0]  ;;  %v100_v47 = vld [vmem:[%s7334_s0 + $0x90] sm:$0xff] }
  0x12   :  { %7557 = vst [vmem:[#allocation14_spill] sm:$0xff] %v4874_v11  ;;  %v4229_v20 = vld [vmem:[#allocation2 + $0xc0] sm:$0xf]  ;;  %v4604_v21 = vld [vmem:[#allocation2 + $0xc4] sm:$0xf0]  ;;  %v4886_v22 = vor.u32 %v4588_v19, %v4165_v18  ;;  %v84_v51 = vld [vmem:[%s7334_s0 + $0x10] sm:$0xff]  ;;  %v4949_v56 = vpack.c.bf16 %v100_v47, %v98_v46 }
  0x13   :  { %4684 = vmatpush.bf16.msra.mxu2 %v4870_v10  ;;  %7558 = vst [vmem:[#allocation15_spill] sm:$0xff] %v4878_v16  ;;  %323 = vmatpush.bf16.msra.mxu0 %v4870_v10  ;;  %v4890_v23 = vor.u32 %v4604_v21, %v4229_v20  ;;  %v4157_v24 = vld [vmem:[#allocation2 + $0x30] sm:$0xf]  ;;  %v4586_v25 = vld [vmem:[#allocation2 + $0x34] sm:$0xf0]  ;;  %v82_v50 = vld [vmem:[%s7334_s0] sm:$0xff] }
  0x14   :  { %4692 = vmatpush.bf16.msra.mxu3 %v4874_v11  ;;  %7559 = vst [vmem:[#allocation16_spill] sm:$0xff] %v4882_v17  ;;  %372 = vmatpush.bf16.msra.mxu1 %v4874_v11  ;;  %v4221_v26 = vld [vmem:[#allocation2 + $0xb0] sm:$0xf]  ;;  %v4602_v27 = vld [vmem:[#allocation2 + $0xb4] sm:$0xf0]  ;;  %v4894_v28 = vor.u32 %v4586_v25, %v4157_v24  ;;  %v83_v54 = vld [vmem:[%s7334_s0 + $0x8] sm:$0xff]  ;;  %v4951_v57 = vpack.c.bf16 %v84_v51, %v82_v50 }
  0x15   :  { %7560 = vst [vmem:[#allocation17_spill] sm:$0xff] %v4886_v22  ;;  %v4898_v29 = vor.u32 %v4602_v27, %v4221_v26  ;;  %v4149_v30 = vld [vmem:[#allocation2 + $0x20] sm:$0xf]  ;;  %v4584_v31 = vld [vmem:[#allocation2 + $0x24] sm:$0xf0]  ;;  %v101_v53 = vld [vmem:[%s7334_s0 + $0x98] sm:$0xff] }
  0x16   :  { %7561 = vst [vmem:[#allocation18_spill] sm:$0xff] %v4890_v23  ;;  %v4213_v32 = vld [vmem:[#allocation2 + $0xa0] sm:$0xf]  ;;  %v4600_v33 = vld [vmem:[#allocation2 + $0xa4] sm:$0xf0]  ;;  %v4902_v34 = vor.u32 %v4584_v31, %v4149_v30  ;;  %v85_v55 = vld [vmem:[%s7334_s0 + $0x18] sm:$0xff]  ;;  %v4954_v58 = vpack.c.bf16 %v101_v53, %v99_v49 }
  0x17   :  { %4685 = vmatpush.bf16.msra.mxu2 %v4878_v16  ;;  %324 = vmatpush.bf16.msra.mxu0 %v4878_v16  ;;  %7562 = vst [vmem:[#allocation19_spill] sm:$0xff] %v4894_v28  ;;  %v4906_v35 = vor.u32 %v4600_v33, %v4213_v32  ;;  %v4141_v36 = vld [vmem:[#allocation2 + $0x10] sm:$0xf]  ;;  %v4582_v37 = vld [vmem:[#allocation2 + $0x14] sm:$0xf0]  ;;  %v4957_v59 = vpack.c.bf16 %v85_v55, %v83_v54  ;;  %v102_v19 = vld [vmem:[%s7334_s0 + $0xa0] sm:$0xff] }
  0x18   :  { %4693 = vmatpush.bf16.msra.mxu3 %v4882_v17  ;;  %373 = vmatpush.bf16.msra.mxu1 %v4882_v17  ;;  %7563 = vst [vmem:[#allocation20_spill] sm:$0xff] %v4898_v29  ;;  %v4205_v38 = vld [vmem:[#allocation2 + $0x90] sm:$0xf]  ;;  %v4598_v39 = vld [vmem:[#allocation2 + $0x94] sm:$0xf0]  ;;  %v4910_v40 = vor.u32 %v4582_v37, %v4141_v36  ;;  %v4990_v30 = vld [vmem:[%s7334_s0 + $0xa8] sm:$0xff] }
  0x19   :  { %7564 = vst [vmem:[#allocation21_spill] sm:$0xff] %v4902_v34  ;;  %v4914_v41 = vor.u32 %v4598_v39, %v4205_v38  ;;  %v4133_v42 = vld [vmem:[#allocation2] sm:$0xf]  ;;  %v4580_v43 = vld [vmem:[#allocation2 + $0x4] sm:$0xf0]  ;;  %v104_v25 = vld [vmem:[%s7334_s0 + $0xb0] sm:$0xff] }
  0x1a   :  { %7565 = vst [vmem:[#allocation22_spill] sm:$0xff] %v4906_v35  ;;  %v4197_v44 = vld [vmem:[#allocation2 + $0x80] sm:$0xf]  ;;  %v4596_v45 = vld [vmem:[#allocation2 + $0x84] sm:$0xf0]  ;;  %v4924_v48 = vor.u32 %v4580_v43, %v4133_v42  ;;  %v88_v32 = vld [vmem:[%s7334_s0 + $0x30] sm:$0xff]  ;;  %v5015_v42 = vpack.c.bf16 %v104_v25, %v102_v19 }
  0x1b   :  { %4686 = vmatpush.bf16.msra.mxu2 %v4886_v22  ;;  %325 = vmatpush.bf16.msra.mxu0 %v4886_v22  ;;  %7566 = vst [vmem:[#allocation23_spill] sm:$0xff] %v4910_v40  ;;  %v4937_v52 = vor.u32 %v4596_v45, %v4197_v44  ;;  %v4593_v60 = vld [vmem:[#allocation2 + $0x74] sm:$0xf]  ;;  %v4191_v61 = vld [vmem:[#allocation2 + $0x78] sm:$0xf0]  ;;  %v86_v31 = vld [vmem:[%s7334_s0 + $0x20] sm:$0xff] }
  0x1c   :  { %4694 = vmatpush.bf16.msra.mxu3 %v4890_v23  ;;  %374 = vmatpush.bf16.msra.mxu1 %v4890_v23  ;;  %7567 = vst [vmem:[#allocation24_spill] sm:$0xff] %v4914_v41  ;;  %v4609_v62 = vld [vmem:[#allocation2 + $0xf4] sm:$0xf]  ;;  %v4963_v63 = vor.u32 %v4593_v60, %v4191_v61  ;;  %v4255_v0 = vld [vmem:[#allocation2 + $0xf8] sm:$0xf0]  ;;  %v87_v36 = vld [vmem:[%s7334_s0 + $0x28] sm:$0xff]  ;;  %v5017_v43 = vpack.c.bf16 %v88_v32, %v86_v31 }
  0x1d   :  { %7568 = vst [vmem:[#allocation25_spill] sm:$0xff] %v4924_v48  ;;  %v4967_v1 = vor.u32 %v4609_v62, %v4255_v0  ;;  %v4591_v2 = vld [vmem:[#allocation2 + $0x64] sm:$0xf]  ;;  %v4183_v4 = vld [vmem:[#allocation2 + $0x68] sm:$0xf0]  ;;  %v5001_v33 = vld [vmem:[%s7334_s0 + $0xb8] sm:$0xff] }
  0x1e   :  { %7569 = vst [vmem:[#allocation26_spill] sm:$0xff] %v4937_v52  ;;  %v4607_v5 = vld [vmem:[#allocation2 + $0xe4] sm:$0xf]  ;;  %v4970_v6 = vor.u32 %v4591_v2, %v4183_v4  ;;  %v4247_v8 = vld [vmem:[#allocation2 + $0xe8] sm:$0xf0]  ;;  %v89_v37 = vld [vmem:[%s7334_s0 + $0x38] sm:$0xff]  ;;  %v5021_v44 = vpack.c.bf16 %v5001_v33, %v4990_v30 }
  0x1f   :  { %4687 = vmatpush.bf16.msra.mxu2 %v4894_v28  ;;  %326 = vmatpush.bf16.msra.mxu0 %v4894_v28  ;;  %7570 = vst [vmem:[#allocation27_spill] sm:$0xff] %v4963_v63  ;;  %v4973_v9 = vor.u32 %v4607_v5, %v4247_v8  ;;  %v4589_v12 = vld [vmem:[#allocation2 + $0x54] sm:$0xf]  ;;  %v4175_v13 = vld [vmem:[#allocation2 + $0x58] sm:$0xf0]  ;;  %v5023_v45 = vpack.c.bf16 %v89_v37, %v87_v36  ;;  %v110_v31 = vld [vmem:[%s7334_s0 + $0xe0] sm:$0xff] }
  0x20   :  { %4695 = vmatpush.bf16.msra.mxu3 %v4898_v29  ;;  %375 = vmatpush.bf16.msra.mxu1 %v4898_v29  ;;  %7571 = vst [vmem:[#allocation28_spill] sm:$0xff] %v4967_v1  ;;  %v4605_v14 = vld [vmem:[#allocation2 + $0xd4] sm:$0xf]  ;;  %v4239_v15 = vld [vmem:[#allocation2 + $0xd8] sm:$0xf0]  ;;  %v4976_v18 = vor.u32 %v4589_v12, %v4175_v13  ;;  %v106_v13 = vld [vmem:[%s7334_s0 + $0xc0] sm:$0xff] }
  0x21   :  { %7572 = vst [vmem:[#allocation29_spill] sm:$0xff] %v4970_v6  ;;  %v4982_v20 = vor.u32 %v4605_v14, %v4239_v15  ;;  %v4587_v21 = vld [vmem:[#allocation2 + $0x44] sm:$0xf]  ;;  %v4167_v24 = vld [vmem:[#allocation2 + $0x48] sm:$0xf0]  ;;  %v108_v14 = vld [vmem:[%s7334_s0 + $0xd0] sm:$0xff] }
  0x22   :  { %7573 = vst [vmem:[#allocation30_spill] sm:$0xff] %v4973_v9  ;;  %v4603_v26 = vld [vmem:[#allocation2 + $0xc4] sm:$0xf]  ;;  %v4231_v27 = vld [vmem:[#allocation2 + $0xc8] sm:$0xf0]  ;;  %v5010_v38 = vor.u32 %v4587_v21, %v4167_v24  ;;  %v5061_v25 = vld [vmem:[%s7334_s0 + $0xd8] sm:$0xff] }
  0x23   :  { %4688 = vmatpush.bf16.msra.mxu2 %v4902_v34  ;;  %327 = vmatpush.bf16.msra.mxu0 %v4902_v34  ;;  %7574 = vst [vmem:[#allocation31_spill] sm:$0xff] %v4976_v18  ;;  %v5013_v39 = vor.u32 %v4603_v26, %v4231_v27  ;;  %v4585_v46 = vld [vmem:[#allocation2 + $0x34] sm:$0xf]  ;;  %v4159_v47 = vld [vmem:[#allocation2 + $0x38] sm:$0xf0]  ;;  %v5056_v24 = vld [vmem:[%s7334_s0 + $0xc8] sm:$0xff] }
  0x24   :  { %4696 = vmatpush.bf16.msra.mxu3 %v4906_v35  ;;  %376 = vmatpush.bf16.msra.mxu1 %v4906_v35  ;;  %7575 = vst [vmem:[#allocation32_spill] sm:$0xff] %v4982_v20  ;;  %v4601_v49 = vld [vmem:[#allocation2 + $0xb4] sm:$0xf]  ;;  %v5029_v50 = vor.u32 %v4585_v46, %v4159_v47  ;;  %v4223_v51 = vld [vmem:[#allocation2 + $0xb8] sm:$0xf0]  ;;  %v90_v32 = vld [vmem:[%s7334_s0 + $0x40] sm:$0xff] }
  0x25   :  { %7576 = vst [vmem:[#allocation33_spill] sm:$0xff] %v5010_v38  ;;  %v5033_v53 = vor.u32 %v4601_v49, %v4223_v51  ;;  %v4583_v54 = vld [vmem:[#allocation2 + $0x24] sm:$0xf]  ;;  %v4151_v55 = vld [vmem:[#allocation2 + $0x28] sm:$0xf0]  ;;  %v92_v36 = vld [vmem:[%s7334_s0 + $0x50] sm:$0xff] }
  0x26   :  { %7577 = vst [vmem:[#allocation34_spill] sm:$0xff] %v5013_v39  ;;  %v4599_v60 = vld [vmem:[#allocation2 + $0xa4] sm:$0xf]  ;;  %v5036_v61 = vor.u32 %v4583_v54, %v4151_v55  ;;  %v4215_v62 = vld [vmem:[#allocation2 + $0xa8] sm:$0xf0]  ;;  %v112_v37 = vld [vmem:[%s7334_s0 + $0xf0] sm:$0xff]  ;;  %v5091_v54 = vpack.c.bf16 %v108_v14, %v106_v13  ;;  %v134_v55 = vpack.c.bf16 %v92_v36, %v90_v32 }
  0x27   :  { %4689 = vmatpush.bf16.msra.mxu2 %v4910_v40  ;;  %328 = vmatpush.bf16.msra.mxu0 %v4910_v40  ;;  %7578 = vst [vmem:[#allocation35_spill] sm:$0xff] %v5029_v50  ;;  %v5039_v0 = vor.u32 %v4599_v60, %v4215_v62  ;;  %v4581_v2 = vld [vmem:[#allocation2 + $0x14] sm:$0xf]  ;;  %v4143_v4 = vld [vmem:[#allocation2 + $0x18] sm:$0xf0]  ;;  %v5078_v46 = vld [vmem:[%s7334_s0 + $0x48] sm:$0xff]  ;;  %v5095_v60 = vpack.c.bf16 %v5061_v25, %v5056_v24 }
  0x28   :  { %4697 = vmatpush.bf16.msra.mxu3 %v4914_v41  ;;  %377 = vmatpush.bf16.msra.mxu1 %v4914_v41  ;;  %7579 = vst [vmem:[#allocation36_spill] sm:$0xff] %v5033_v53  ;;  %v4597_v5 = vld [vmem:[#allocation2 + $0x94] sm:$0xf]  ;;  %v4207_v8 = vld [vmem:[#allocation2 + $0x98] sm:$0xf0]  ;;  %v5042_v12 = vor.u32 %v4581_v2, %v4143_v4  ;;  %v5097_v62 = vpack.c.bf16 %v112_v37, %v110_v31  ;;  %v5102_v2 = vld [vmem:[%s7334_s0 + $0xe8] sm:$0xff] }
  0x29   :  { %7580 = vst [vmem:[#allocation37_spill] sm:$0xff] %v5036_v61  ;;  %v5051_v15 = vor.u32 %v4597_v5, %v4207_v8  ;;  %v4579_v19 = vld [vmem:[#allocation2 + $0x4] sm:$0xf]  ;;  %v4135_v21 = vld [vmem:[#allocation2 + $0x8] sm:$0xf0]  ;;  %v5083_v47 = vld [vmem:[%s7334_s0 + $0x58] sm:$0xff] }
  0x2a   :  { %7581 = vst [vmem:[#allocation38_spill] sm:$0xff] %v5039_v0  ;;  %v4595_v26 = vld [vmem:[#allocation2 + $0x84] sm:$0xf]  ;;  %v4199_v27 = vld [vmem:[#allocation2 + $0x88] sm:$0xf0]  ;;  %v5086_v49 = vor.u32 %v4579_v19, %v4135_v21  ;;  %v5107_v4 = vld [vmem:[%s7334_s0 + $0xf8] sm:$0xff]  ;;  %v135_v5 = vpack.c.bf16 %v5083_v47, %v5078_v46 }
  0x2b   :  { %4690 = vmatpush.bf16.msra.mxu2 %v4924_v48  ;;  %329 = vmatpush.bf16.msra.mxu0 %v4924_v48  ;;  %7582 = vst [vmem:[#allocation39_spill] sm:$0xff] %v5042_v12  ;;  %v5089_v51 = vor.u32 %v4595_v26, %v4199_v27  ;;  %v5117_v8 = vpack.c.bf16 %v5107_v4, %v5102_v2  ;;  %v94_v13 = vld [vmem:[%s7334_s0 + $0x60] sm:$0xff]  ;;  %v96_v14 = vld [vmem:[%s7334_s0 + $0x70] sm:$0xff]  ;;  %v5133_v19 = vld [vmem:[%s7334_s0 + $0x68] sm:$0xff]  ;;  %s4117_s9 = sshll.u32 %s7338_s4, 4  ;;  %s4832_s10 = smov 256   ;;  %s4118_s9 = int_to_ptr.hbm [resolvable:$true] %s4117_s9 }
  0x2c   :  { %4698 = vmatpush.bf16.msra.mxu3 %v4937_v52  ;;  %378 = vmatpush.bf16.msra.mxu1 %v4937_v52  ;;  %7583 = vst [vmem:[#allocation40_spill] sm:$0xff] %v5051_v15  ;;  %v5138_v21 = vld [vmem:[%s7334_s0 + $0x78] sm:$0xff]  ;;  %v136_v26 = vpack.c.bf16 %v96_v14, %v94_v13  ;;  %s4833_s11 = smov 16  }
  0x2d   :  { %7584 = vst [vmem:[#allocation41_spill] sm:$0xff] %v5078_v46  ;;  %v137_v27 = vpack.c.bf16 %v5138_v21, %v5133_v19 }
  0x2e   :  { %350 = vmatmul.bf16.vlgmr.msra.gmra.mxu2 %v4949_v56  ;;  %330 = vmatmul.bf16.vlgmr.msra.gmra.mxu0 %v4951_v57  ;;  %7585 = vst [vmem:[#allocation42_spill] sm:$0xff] %v5086_v49 }
  0x2f   :  { %399 = vmatmul.bf16.vlgmr.msra.gmra.mxu3 %v4954_v58  ;;  %379 = vmatmul.bf16.vlgmr.msra.gmra.mxu1 %v4957_v59  ;;  %7586 = vst [vmem:[#allocation43_spill] sm:$0xff] %v5089_v51 }
  0x30   :  { %420 = vmatpush.bf16.msrb.mxu2 %v4963_v63  ;;  %469 = vmatpush.bf16.msrb.mxu3 %v4967_v1 }
  0x34   :  { %421 = vmatpush.bf16.msrb.mxu2 %v4970_v6  ;;  %470 = vmatpush.bf16.msrb.mxu3 %v4973_v9 }
  0x38   :  { %422 = vmatpush.bf16.msrb.mxu2 %v4976_v18  ;;  %471 = vmatpush.bf16.msrb.mxu3 %v4982_v20 }
  0x3c   :  { %423 = vmatpush.bf16.msrb.mxu2 %v5010_v38  ;;  %472 = vmatpush.bf16.msrb.mxu3 %v5013_v39 }
  0x3e   :  { %355 = vmatmul.bf16.gmra.mxu2 %v5015_v42  ;;  %335 = vmatmul.bf16.gmra.mxu0 %v5017_v43 }
  0x3f   :  { %404 = vmatmul.bf16.gmra.mxu3 %v5021_v44  ;;  %384 = vmatmul.bf16.gmra.mxu1 %v5023_v45 }
  0x40   :  { %424 = vmatpush.bf16.msrb.mxu2 %v5029_v50  ;;  %473 = vmatpush.bf16.msrb.mxu3 %v5033_v53 }
  0x44   :  { %425 = vmatpush.bf16.msrb.mxu2 %v5036_v61  ;;  %474 = vmatpush.bf16.msrb.mxu3 %v5039_v0 }
  0x48   :  { %426 = vmatpush.bf16.msrb.mxu2 %v5042_v12  ;;  %475 = vmatpush.bf16.msrb.mxu3 %v5051_v15 }
  0x4c   :  { %427 = vmatpush.bf16.msrb.mxu2 %v5086_v49  ;;  %476 = vmatpush.bf16.msrb.mxu3 %v5089_v51 }
  0x4e   :  { %360 = vmatmul.bf16.gmra.mxu2 %v5091_v54  ;;  %340 = vmatmul.bf16.gmra.mxu0 %v134_v55 }
  0x4f   :  { %409 = vmatmul.bf16.gmra.mxu3 %v5095_v60  ;;  %389 = vmatmul.bf16.gmra.mxu1 %v135_v5 }
  0x50   :  { %745 = vmatpush.bf16.msra.mxu2 %v5097_v62  ;;  %794 = vmatpush.bf16.msra.mxu3 %v5117_v8 }
  0x54   :  { %746 = vmatpush.bf16.msra.mxu2 %v5091_v54  ;;  %795 = vmatpush.bf16.msra.mxu3 %v5095_v60 }
  0x58   :  { %747 = vmatpush.bf16.msra.mxu2 %v5015_v42  ;;  %796 = vmatpush.bf16.msra.mxu3 %v5021_v44 }
  0x5c   :  { %748 = vmatpush.bf16.msra.mxu2 %v4949_v56  ;;  %797 = vmatpush.bf16.msra.mxu3 %v4954_v58 }
  0x5e   :  { %365 = vmatmul.bf16.gmra.mxu2 %v5097_v62  ;;  %345 = vmatmul.bf16.gmra.mxu0 %v136_v26 }
  0x5f   :  { %414 = vmatmul.bf16.gmra.mxu3 %v5117_v8  ;;  %394 = vmatmul.bf16.gmra.mxu1 %v137_v27 }
  0x60   :  { %749 = vmatpush.bf16.msra.mxu2 %v136_v26  ;;  %798 = vmatpush.bf16.msra.mxu3 %v137_v27 }
  0x64   :  { %750 = vmatpush.bf16.msra.mxu2 %v134_v55  ;;  %799 = vmatpush.bf16.msra.mxu3 %v135_v5 }
  0x68   :  { %751 = vmatpush.bf16.msra.mxu2 %v5017_v43  ;;  %800 = vmatpush.bf16.msra.mxu3 %v5023_v45 }
  0x6c   :  { %752 = vmatpush.bf16.msra.mxu2 %v4951_v57  ;;  %801 = vmatpush.bf16.msra.mxu3 %v4957_v59 }
  0x6e   :  { %428 = vmatmul.bf16.vlgmr.msrb.gmra.mxu2 %v4951_v57 }
  0x6f   :  { %477 = vmatmul.bf16.vlgmr.msrb.gmra.mxu3 %v4957_v59 }
  0x70   :  { %941 = vmatpush.bf16.msrb.mxu2 %v4963_v63  ;;  %990 = vmatpush.bf16.msrb.mxu3 %v4967_v1 }
  0x74   :  { %942 = vmatpush.bf16.msrb.mxu2 %v4970_v6  ;;  %991 = vmatpush.bf16.msrb.mxu3 %v4973_v9 }
  0x78   :  { %943 = vmatpush.bf16.msrb.mxu2 %v4976_v18  ;;  %992 = vmatpush.bf16.msrb.mxu3 %v4982_v20 }
  0x7c   :  { %944 = vmatpush.bf16.msrb.mxu2 %v5010_v38  ;;  %993 = vmatpush.bf16.msrb.mxu3 %v5013_v39 }
  0x7e   :  { %433 = vmatmul.bf16.gmra.mxu2 %v5017_v43 }
  0x7f   :  { %482 = vmatmul.bf16.gmra.mxu3 %v5023_v45 }
  0x80   :  { %945 = vmatpush.bf16.msrb.mxu2 %v5029_v50  ;;  %994 = vmatpush.bf16.msrb.mxu3 %v5033_v53 }
  0x84   :  { %946 = vmatpush.bf16.msrb.mxu2 %v5036_v61  ;;  %995 = vmatpush.bf16.msrb.mxu3 %v5039_v0 }
  0x88   :  { %947 = vmatpush.bf16.msrb.mxu2 %v5042_v12  ;;  %996 = vmatpush.bf16.msrb.mxu3 %v5051_v15 }
  0x8c   :  { %948 = vmatpush.bf16.msrb.mxu2 %v5086_v49  ;;  %997 = vmatpush.bf16.msrb.mxu3 %v5089_v51 }
  0x8e   :  { %438 = vmatmul.bf16.gmra.mxu2 %v134_v55 }
  0x8f   :  { %487 = vmatmul.bf16.gmra.mxu3 %v135_v5 }
  0x9e   :  { %443 = vmatmul.bf16.gmra.mxu2 %v136_v26 }
  0x9f   :  { %492 = vmatmul.bf16.gmra.mxu3 %v137_v27 }
  0xab   :  { %v331_v57 = vpop.f32.mrf.mxu0 }
  0xac   :  { %v380_v59 = vpop.f32.mrf.mxu1 }
  0xad   :  { %v5171_v43 = vadd.f32 %v380_v59, %v331_v57 }
  0xae   :  { %448 = vmatmul.bf16.gmra.mxu2 %v4949_v56 }
  0xaf   :  { %497 = vmatmul.bf16.gmra.mxu3 %v4954_v58 }
  0xb1   :  { %v351_v45 = vpop.f32.mrf.mxu2 }
  0xb2   :  { %v400_v31 = vpop.f32.mrf.mxu3 }
  0xb3   :  { %v401_v32 = vadd.f32 %v400_v31, %v351_v45  ;;  %v5175_v36 = vpop.f32.mrf.mxu0 }
  0xb4   :  { %v5177_v37 = vpop.f32.mrf.mxu1 }
  0xb9   :  { %v353_v13 = vpop.f32.mrf.mxu2 }
  0xba   :  { %v402_v55 = vpop.f32.mrf.mxu3 }
  0xbb   :  { %v5181_v14 = vpop.f32.mrf.mxu0 }
  0xbc   :  { %v5183_v56 = vpop.f32.mrf.mxu1 }
  0xbe   :  { %453 = vmatmul.bf16.gmra.mxu2 %v5015_v42 }
  0xbf   :  { %502 = vmatmul.bf16.gmra.mxu3 %v5021_v44 }
  0xc1   :  { %v356_v5 = vpop.f32.mrf.mxu2 }
  0xc2   :  { %v405_v26 = vpop.f32.mrf.mxu3 }
  0xc3   :  { %v5185_v57 = vpop.f32.mrf.mxu0  ;;  %v406_v46 = vadd.f32 %v405_v26, %v356_v5  ;;  %v4612_v5 = vld [vmem:[#allocation5 + $0x8] sm:$0xff] }
  0xc4   :  { %v387_v59 = vpop.f32.mrf.mxu1 }
  0xc9   :  { %v358_v58 = vpop.f32.mrf.mxu2 }
  0xca   :  { %v407_v27 = vpop.f32.mrf.mxu3 }
  0xcb   :  { %v341_v42 = vpop.f32.mrf.mxu0 }
  0xcc   :  { %v390_v49 = vpop.f32.mrf.mxu1 }
  0xcd   :  { %v391_v26 = vadd.f32 %v390_v49, %v341_v42  ;;  %v383_v49 = vadd.f32 %v5177_v37, %v5175_v36  ;;  %v5236_v37 = vld [vmem:[#allocation5 + $0x40] sm:$0xff] }
  0xce   :  { %458 = vmatmul.bf16.gmra.mxu2 %v5091_v54  ;;  %v4611_v54 = vld [vmem:[#allocation5] sm:$0xff] }
  0xcf   :  { %507 = vmatmul.bf16.gmra.mxu3 %v5095_v60 }
  0xd1   :  { %v361_v45 = vpop.f32.mrf.mxu2 }
  0xd2   :  { %v410_v31 = vpop.f32.mrf.mxu3 }
  0xd3   :  { %v343_v61 = vpop.f32.mrf.mxu0  ;;  %v411_v20 = vadd.f32 %v410_v31, %v361_v45 }
  0xd4   :  { %v392_v50 = vpop.f32.mrf.mxu1 }
  0xd9   :  { %v363_v44 = vpop.f32.mrf.mxu2 }
  0xda   :  { %v412_v12 = vpop.f32.mrf.mxu3 }
  0xdb   :  { %v346_v63 = vpop.f32.mrf.mxu0  ;;  %v413_v53 = vadd.f32 %v412_v12, %v363_v44 }
  0xdc   :  { %v395_v15 = vpop.f32.mrf.mxu1 }
  0xde   :  { %463 = vmatmul.bf16.gmra.mxu2 %v5097_v62  ;;  %v408_v62 = vadd.f32 %v407_v27, %v358_v58  ;;  %v393_v58 = vadd.f32 %v392_v50, %v343_v61 }
  0xdf   :  { %512 = vmatmul.bf16.gmra.mxu3 %v5117_v8  ;;  %v5196_v8 = vpack.c.bf16 %v413_v53, %v411_v20 }
  0xe0   :  { %v5201_v12 = vpack.c.bf16 %v408_v62, %v406_v46  ;;  %v388_v46 = vadd.f32 %v387_v59, %v5185_v57  ;;  %v4613_v57 = vld [vmem:[#allocation5 + $0x10] sm:$0xff]  ;;  %v5248_v62 = vld [vmem:[#allocation5 + $0x48] sm:$0xff] }
  0xe1   :  { %v366_v38 = vpop.f32.mrf.mxu2 }
  0xe2   :  { %v415_v18 = vpop.f32.mrf.mxu3 }
  0xe3   :  { %v416_v60 = vadd.f32 %v415_v18, %v366_v38 }
  0xe4   :  { %v397_v38 = vpop.f32.mrf.mxu1 }
  0xe9   :  { %v368_v6 = vpop.f32.mrf.mxu2 }
  0xea   :  { %v417_v51 = vpop.f32.mrf.mxu3 }
  0xeb   :  { %v418_v0 = vadd.f32 %v417_v51, %v368_v6  ;;  %v348_v6 = vpop.f32.mrf.mxu0  ;;  %v396_v51 = vadd.f32 %v395_v15, %v346_v63  ;;  %v386_v15 = vadd.f32 %v5183_v56, %v5181_v14  ;;  %v5231_v14 = vpack.c.bf16 %v383_v49, %v5171_v43 }
  0xec   :  { %v398_v20 = vadd.f32 %v397_v38, %v348_v6 }
  0xed   :  { %v5191_v39 = vpack.c.bf16 %v418_v0, %v416_v60  ;;  %v403_v0 = vadd.f32 %v402_v55, %v353_v13  ;;  %v5225_v55 = vpack.c.bf16 %v388_v46, %v386_v15 }
  0xee   :  { %753 = vmatmul.bf16.vlgmr.msra.gmra.mxu2 %v4611_v54  ;;  %v5208_v27 = vpack.c.bf16 %v398_v20, %v396_v51 }
  0xef   :  { %599 = vmatpush.bf16.msrb.mxu0 %v5191_v39  ;;  %802 = vmatmul.bf16.vlgmr.msra.gmra.mxu3 %v4611_v54 }
  0xf0   :  { %1557 = vmatpush.bf16.msra.mxu3 %v4867_v7  ;;  %1508 = vmatpush.bf16.msra.mxu2 %v4865_v3 }
  0xf1   :  { %v429_v9 = vpop.f32.mrf.mxu2 }
  0xf2   :  { %v478_v1 = vpop.f32.mrf.mxu3 }
  0xf3   :  { %v479_v18 = vadd.f32 %v478_v1, %v429_v9  ;;  %600 = vmatpush.bf16.msrb.mxu0 %v5196_v8  ;;  %v5206_v1 = vpack.c.bf16 %v403_v0, %v401_v32  ;;  %v5218_v32 = vpack.c.bf16 %v393_v58, %v391_v26  ;;  %v4615_v26 = vld [vmem:[#allocation5 + $0x20] sm:$0xff] }
  0xf4   :  { %1558 = vmatpush.bf16.msra.mxu3 %v4874_v11  ;;  %1509 = vmatpush.bf16.msra.mxu2 %v4870_v10 }
  0xf7   :  { %601 = vmatpush.bf16.msrb.mxu0 %v5201_v12 }
  0xf8   :  { %1559 = vmatpush.bf16.msra.mxu3 %v4882_v17  ;;  %1510 = vmatpush.bf16.msra.mxu2 %v4878_v16 }
  0xf9   :  { %v431_v9 = vpop.f32.mrf.mxu2 }
  0xfa   :  { %v480_v53 = vpop.f32.mrf.mxu3 }
  0xfb   :  { %v481_v13 = vadd.f32 %v480_v53, %v431_v9  ;;  %602 = vmatpush.bf16.msrb.mxu0 %v5206_v1 }
  0xfc   :  { %1560 = vmatpush.bf16.msra.mxu3 %v4890_v23  ;;  %1511 = vmatpush.bf16.msra.mxu2 %v4886_v22 }
  0xfd   :  { %v5213_v63 = vpack.c.bf16 %v481_v13, %v479_v18  ;;  %v4614_v18 = vld [vmem:[#allocation5 + $0x18] sm:$0xff] }
  0xfe   :  { %758 = vmatmul.bf16.gmra.mxu2 %v4612_v5 }
  0xff   :  { %603 = vmatpush.bf16.msrb.mxu0 %v5208_v27  ;;  %807 = vmatmul.bf16.gmra.mxu3 %v4612_v5  ;;  %v5257_v5 = vld [vmem:[#allocation5 + $0x50] sm:$0xff] }
 0x100   :  { %1561 = vmatpush.bf16.msra.mxu3 %v4898_v29  ;;  %1512 = vmatpush.bf16.msra.mxu2 %v4894_v28 }
 0x101   :  { %v434_v50 = vpop.f32.mrf.mxu2 }
 0x102   :  { %v483_v61 = vpop.f32.mrf.mxu3 }
 0x103   :  { %v484_v45 = vadd.f32 %v483_v61, %v434_v50  ;;  %604 = vmatpush.bf16.msrb.mxu0 %v5218_v32 }
 0x104   :  { %1562 = vmatpush.bf16.msra.mxu3 %v4906_v35  ;;  %1513 = vmatpush.bf16.msra.mxu2 %v4902_v34 }
 0x107   :  { %605 = vmatpush.bf16.msrb.mxu0 %v5225_v55 }
 0x108   :  { %1563 = vmatpush.bf16.msra.mxu3 %v4914_v41  ;;  %1514 = vmatpush.bf16.msra.mxu2 %v4910_v40 }
 0x109   :  { %v436_v56 = vpop.f32.mrf.mxu2 }
 0x10a   :  { %v485_v36 = vpop.f32.mrf.mxu3 }
 0x10b   :  { %v486_v59 = vadd.f32 %v485_v36, %v436_v56  ;;  %606 = vmatpush.bf16.msrb.mxu0 %v5231_v14  ;;  %v4616_v56 = vld [vmem:[#allocation5 + $0x28] sm:$0xff] }
 0x10c   :  { %1564 = vmatpush.bf16.msra.mxu3 %v4937_v52  ;;  %1515 = vmatpush.bf16.msra.mxu2 %v4924_v48 }
 0x10d   :  { %v5241_v43 = vpack.c.bf16 %v486_v59, %v484_v45  ;;  %v5262_v45 = vld [vmem:[#allocation5 + $0x58] sm:$0xff] }
 0x10e   :  { %607 = vmatmul.bf16.vlgmr.msrb.gmra.mxu0 %v5236_v37  ;;  %763 = vmatmul.bf16.gmra.mxu2 %v4613_v57 }
 0x10f   :  { %843 = vmatpush.bf16.msra.mxu0 %v4865_v3  ;;  %812 = vmatmul.bf16.gmra.mxu3 %v4613_v57 }
 0x111   :  { %v439_v31 = vpop.f32.mrf.mxu2 }
 0x112   :  { %v488_v42 = vpop.f32.mrf.mxu3 }
 0x113   :  { %844 = vmatpush.bf16.msra.mxu0 %v4870_v10  ;;  %v489_v44 = vadd.f32 %v488_v42, %v439_v31  ;;  %v5265_v42 = vld [vmem:[#allocation5 + $0x60] sm:$0xff] }
 0x117   :  { %845 = vmatpush.bf16.msra.mxu0 %v4878_v16 }
 0x119   :  { %v441_v54 = vpop.f32.mrf.mxu2 }
 0x11a   :  { %v490_v60 = vpop.f32.mrf.mxu3 }
 0x11b   :  { %846 = vmatpush.bf16.msra.mxu0 %v4886_v22  ;;  %v491_v6 = vadd.f32 %v490_v60, %v441_v54 }
 0x11d   :  { %v5251_v38 = vpack.c.bf16 %v491_v6, %v489_v44  ;;  %v4617_v44 = vld [vmem:[#allocation5 + $0x30] sm:$0xff] }
 0x11e   :  { %612 = vmatmul.bf16.gmra.mxu0 %v5248_v62  ;;  %768 = vmatmul.bf16.gmra.mxu2 %v4614_v18 }
 0x11f   :  { %847 = vmatpush.bf16.msra.mxu0 %v4894_v28  ;;  %817 = vmatmul.bf16.gmra.mxu3 %v4614_v18 }
 0x121   :  { %v444_v0 = vpop.f32.mrf.mxu2 }
 0x122   :  { %v493_v51 = vpop.f32.mrf.mxu3 }
 0x123   :  { %848 = vmatpush.bf16.msra.mxu0 %v4902_v34  ;;  %v494_v20 = vadd.f32 %v493_v51, %v444_v0  ;;  %v5268_v0 = vld [vmem:[#allocation5 + $0x68] sm:$0xff]  ;;  %v4618_v51 = vld [vmem:[#allocation5 + $0x38] sm:$0xff] }
 0x127   :  { %849 = vmatpush.bf16.msra.mxu0 %v4910_v40 }
 0x129   :  { %v446_v9 = vpop.f32.mrf.mxu2 }
 0x12a   :  { %v495_v53 = vpop.f32.mrf.mxu3 }
 0x12b   :  { %850 = vmatpush.bf16.msra.mxu0 %v4924_v48  ;;  %v496_v58 = vadd.f32 %v495_v53, %v446_v9 }
 0x12d   :  { %v5259_v13 = vpack.c.bf16 %v496_v58, %v494_v20  ;;  %v5271_v58 = vld [vmem:[#allocation5 + $0x70] sm:$0xff] }
 0x12e   :  { %617 = vmatmul.bf16.gmra.mxu0 %v5257_v5  ;;  %773 = vmatmul.bf16.gmra.mxu2 %v4615_v26 }
 0x12f   :  { %822 = vmatmul.bf16.gmra.mxu3 %v4615_v26 }
 0x131   :  { %v449_v15 = vpop.f32.mrf.mxu2 }
 0x132   :  { %v498_v46 = vpop.f32.mrf.mxu3 }
 0x133   :  { %v499_v50 = vadd.f32 %v498_v46, %v449_v15 }
 0x139   :  { %v451_v61 = vpop.f32.mrf.mxu2 }
 0x13a   :  { %v500_v49 = vpop.f32.mrf.mxu3 }
 0x13e   :  { %622 = vmatmul.bf16.gmra.mxu0 %v5262_v45  ;;  %778 = vmatmul.bf16.gmra.mxu2 %v4616_v56 }
 0x13f   :  { %827 = vmatmul.bf16.gmra.mxu3 %v4616_v56 }
 0x141   :  { %v454_v36 = vpop.f32.mrf.mxu2 }
 0x142   :  { %v503_v57 = vpop.f32.mrf.mxu3 }
 0x149   :  { %v456_v59 = vpop.f32.mrf.mxu2 }
 0x14a   :  { %v505_v31 = vpop.f32.mrf.mxu3 }
 0x14e   :  { %627 = vmatmul.bf16.gmra.mxu0 %v5265_v42  ;;  %783 = vmatmul.bf16.gmra.mxu2 %v4617_v44 }
 0x14f   :  { %832 = vmatmul.bf16.gmra.mxu3 %v4617_v44 }
 0x151   :  { %v459_v54 = vpop.f32.mrf.mxu2 }
 0x152   :  { %v508_v60 = vpop.f32.mrf.mxu3 }
 0x153   :  { %v509_v48 = vadd.f32 %v508_v60, %v459_v54 }
 0x159   :  { %v461_v18 = vpop.f32.mrf.mxu2 }
 0x15a   :  { %v510_v6 = vpop.f32.mrf.mxu3 }
 0x15b   :  { %v511_v56 = vadd.f32 %v510_v6, %v461_v18  ;;  %v501_v18 = vadd.f32 %v500_v49, %v451_v61 }
 0x15d   :  { %v5279_v40 = vpack.c.bf16 %v511_v56, %v509_v48 }
 0x15e   :  { %632 = vmatmul.bf16.gmra.mxu0 %v5268_v0  ;;  %788 = vmatmul.bf16.gmra.mxu2 %v4618_v51 }
 0x15f   :  { %837 = vmatmul.bf16.gmra.mxu3 %v4618_v51  ;;  %v506_v51 = vadd.f32 %v505_v31, %v456_v59 }
 0x161   :  { %v464_v20 = vpop.f32.mrf.mxu2 }
 0x162   :  { %v513_v9 = vpop.f32.mrf.mxu3 }
 0x163   :  { %v514_v15 = vadd.f32 %v513_v9, %v464_v20  ;;  %v504_v20 = vadd.f32 %v503_v57, %v454_v36  ;;  %v5287_v9 = vpack.c.bf16 %v501_v18, %v499_v50 }
 0x165   :  { %v5284_v6 = vpack.c.bf16 %v506_v51, %v504_v20 }
 0x169   :  { %v466_v53 = vpop.f32.mrf.mxu2 }
 0x16a   :  { %v515_v26 = vpop.f32.mrf.mxu3 }
 0x16b   :  { %v516_v46 = vadd.f32 %v515_v26, %v466_v53  ;;  %v5291_v53 = vld [vmem:[#allocation5 + $0x78] sm:$0xff] }
 0x16d   :  { %v5273_v44 = vpack.c.bf16 %v516_v46, %v514_v15 }
 0x16e   :  { %637 = vmatmul.bf16.gmra.mxu0 %v5271_v58  ;;  %949 = vmatmul.bf16.vlgmr.msrb.gmra.mxu2 %v5231_v14 }
 0x16f   :  { %648 = vmatpush.bf16.msrb.mxu1 %v5273_v44  ;;  %998 = vmatmul.bf16.vlgmr.msrb.gmra.mxu3 %v5213_v63 }
 0x171   :  { %v754_v34 = vpop.f32.mrf.mxu2 }
 0x172   :  { %v5281_v28 = vpop.f32.mrf.mxu3 }
 0x173   :  { %649 = vmatpush.bf16.msrb.mxu1 %v5279_v40 }
 0x177   :  { %650 = vmatpush.bf16.msrb.mxu1 %v5284_v6 }
 0x179   :  { %v756_v54 = vpop.f32.mrf.mxu2 }
 0x17a   :  { %v5289_v60 = vpop.f32.mrf.mxu3 }
 0x17b   :  { %651 = vmatpush.bf16.msrb.mxu1 %v5287_v9 }
 0x17e   :  { %642 = vmatmul.bf16.gmra.mxu0 %v5291_v53  ;;  %954 = vmatmul.bf16.gmra.mxu2 %v5225_v55 }
 0x17f   :  { %652 = vmatpush.bf16.msrb.mxu1 %v5259_v13  ;;  %1003 = vmatmul.bf16.gmra.mxu3 %v5241_v43 }
 0x181   :  { %v759_v48 = vpop.f32.mrf.mxu2 }
 0x182   :  { %v5298_v61 = vpop.f32.mrf.mxu3 }
 0x183   :  { %653 = vmatpush.bf16.msrb.mxu1 %v5251_v38 }
 0x187   :  { %654 = vmatpush.bf16.msrb.mxu1 %v5241_v43 }
 0x189   :  { %v761_v50 = vpop.f32.mrf.mxu2 }
 0x18a   :  { %v5302_v49 = vpop.f32.mrf.mxu3 }
 0x18b   :  { %v608_v36 = vpop.f32.mrf.mxu0  ;;  %655 = vmatpush.bf16.msrb.mxu1 %v5213_v63 }
 0x18c   :  { %v5305_v57 = vadd.f32 %v754_v34, %v608_v36 }
 0x18e   :  { %7587 = vst [vmem:[#allocation44_spill] sm:$0xff] %v5305_v57  ;;  %656 = vmatmul.bf16.vlgmr.msrb.gmra.mxu1 %v5236_v37  ;;  %851 = vmatmul.bf16.vlgmr.msra.gmra.mxu0 %v5231_v14 }
 0x18f   :  { %892 = vmatpush.bf16.msra.mxu1 %v4867_v7  ;;  %959 = vmatmul.bf16.gmra.mxu2 %v5218_v32 }
 0x190   :  { %1008 = vmatmul.bf16.gmra.mxu3 %v5251_v38 }
 0x191   :  { %v764_v59 = vpop.f32.mrf.mxu2 }
 0x192   :  { %v5313_v31 = vpop.f32.mrf.mxu3 }
 0x193   :  { %893 = vmatpush.bf16.msra.mxu1 %v4874_v11  ;;  %v610_v26 = vpop.f32.mrf.mxu0 }
 0x194   :  { %v5315_v15 = vadd.f32 %v756_v54, %v610_v26 }
 0x196   :  { %7588 = vst [vmem:[#allocation45_spill] sm:$0xff] %v5315_v15 }
 0x197   :  { %894 = vmatpush.bf16.msra.mxu1 %v4882_v17 }
 0x199   :  { %v766_v34 = vpop.f32.mrf.mxu2 }
 0x19a   :  { %v5319_v37 = vpop.f32.mrf.mxu3 }
 0x19b   :  { %895 = vmatpush.bf16.msra.mxu1 %v4890_v23  ;;  %v613_v14 = vpop.f32.mrf.mxu0 }
 0x19c   :  { %v5321_v46 = vadd.f32 %v759_v48, %v613_v14 }
 0x19e   :  { %7589 = vst [vmem:[#allocation46_spill] sm:$0xff] %v5321_v46  ;;  %661 = vmatmul.bf16.gmra.mxu1 %v5248_v62  ;;  %856 = vmatmul.bf16.gmra.mxu0 %v5225_v55 }
 0x19f   :  { %896 = vmatpush.bf16.msra.mxu1 %v4898_v29  ;;  %964 = vmatmul.bf16.gmra.mxu2 %v5208_v27 }
 0x1a0   :  { %1013 = vmatmul.bf16.gmra.mxu3 %v5259_v13 }
 0x1a1   :  { %v769_v56 = vpop.f32.mrf.mxu2 }
 0x1a2   :  { %v5329_v51 = vpop.f32.mrf.mxu3 }
 0x1a3   :  { %897 = vmatpush.bf16.msra.mxu1 %v4906_v35  ;;  %7590 = vst [vmem:[#allocation47_spill] sm:$0xff] %v5329_v51  ;;  %v615_v20 = vpop.f32.mrf.mxu0 }
 0x1a4   :  { %v5331_v18 = vadd.f32 %v761_v50, %v615_v20 }
 0x1a6   :  { %7591 = vst [vmem:[#allocation48_spill] sm:$0xff] %v5331_v18 }
 0x1a7   :  { %898 = vmatpush.bf16.msra.mxu1 %v4914_v41 }
 0x1a9   :  { %v771_v54 = vpop.f32.mrf.mxu2 }
 0x1aa   :  { %v5335_v62 = vpop.f32.mrf.mxu3 }
 0x1ab   :  { %899 = vmatpush.bf16.msra.mxu1 %v4937_v52  ;;  %7592 = vst [vmem:[#allocation49_spill] sm:$0xff] %v5335_v62  ;;  %v618_v55 = vpop.f32.mrf.mxu0 }
 0x1ac   :  { %v5337_v48 = vadd.f32 %v764_v59, %v618_v55 }
 0x1ae   :  { %7593 = vst [vmem:[#allocation50_spill] sm:$0xff] %v5337_v48  ;;  %666 = vmatmul.bf16.gmra.mxu1 %v5257_v5  ;;  %861 = vmatmul.bf16.gmra.mxu0 %v5218_v32 }
 0x1af   :  { %969 = vmatmul.bf16.gmra.mxu2 %v5206_v1 }
 0x1b0   :  { %1018 = vmatmul.bf16.gmra.mxu3 %v5287_v9 }
 0x1b1   :  { %v774_v50 = vpop.f32.mrf.mxu2 }
 0x1b2   :  { %v5343_v36 = vpop.f32.mrf.mxu3 }
 0x1b3   :  { %7594 = vst [vmem:[#allocation51_spill] sm:$0xff] %v5343_v36  ;;  %v620_v26 = vpop.f32.mrf.mxu0 }
 0x1b4   :  { %v5345_v14 = vadd.f32 %v766_v34, %v620_v26 }
 0x1b6   :  { %7595 = vst [vmem:[#allocation52_spill] sm:$0xff] %v5345_v14 }
 0x1b9   :  { %v5347_v20 = vpop.f32.mrf.mxu2 }
 0x1ba   :  { %7596 = vst [vmem:[#allocation53_spill] sm:$0xff] %v5347_v20  ;;  %v5349_v22 = vpop.f32.mrf.mxu3 }
 0x1bb   :  { %7597 = vst [vmem:[#allocation54_spill] sm:$0xff] %v5349_v22  ;;  %v623_v59 = vpop.f32.mrf.mxu0 }
 0x1bc   :  { %v5351_v55 = vadd.f32 %v769_v56, %v623_v59 }
 0x1be   :  { %7598 = vst [vmem:[#allocation55_spill] sm:$0xff] %v5351_v55  ;;  %671 = vmatmul.bf16.gmra.mxu1 %v5262_v45  ;;  %866 = vmatmul.bf16.gmra.mxu0 %v5208_v27 }
 0x1bf   :  { %974 = vmatmul.bf16.gmra.mxu2 %v5201_v12 }
 0x1c0   :  { %1023 = vmatmul.bf16.gmra.mxu3 %v5284_v6 }
 0x1c1   :  { %v779_v32 = vpop.f32.mrf.mxu2 }
 0x1c2   :  { %v5357_v5 = vpop.f32.mrf.mxu3 }
 0x1c3   :  { %7599 = vst [vmem:[#allocation56_spill] sm:$0xff] %v5357_v5  ;;  %v625_v34 = vpop.f32.mrf.mxu0 }
 0x1c4   :  { %v5359_v26 = vadd.f32 %v771_v54, %v625_v34 }
 0x1c6   :  { %7600 = vst [vmem:[#allocation57_spill] sm:$0xff] %v5359_v26 }
 0x1c9   :  { %v5361_v16 = vpop.f32.mrf.mxu2 }
 0x1ca   :  { %7601 = vst [vmem:[#allocation58_spill] sm:$0xff] %v5361_v16  ;;  %v5363_v10 = vpop.f32.mrf.mxu3 }
 0x1cb   :  { %7602 = vst [vmem:[#allocation59_spill] sm:$0xff] %v5363_v10  ;;  %v628_v56 = vpop.f32.mrf.mxu0 }
 0x1cc   :  { %v5365_v59 = vadd.f32 %v774_v50, %v628_v56 }
 0x1ce   :  { %7603 = vst [vmem:[#allocation60_spill] sm:$0xff] %v5365_v59  ;;  %676 = vmatmul.bf16.gmra.mxu1 %v5265_v42  ;;  %871 = vmatmul.bf16.gmra.mxu0 %v5206_v1 }
 0x1cf   :  { %979 = vmatmul.bf16.gmra.mxu2 %v5196_v8 }
 0x1d0   :  { %1028 = vmatmul.bf16.gmra.mxu3 %v5279_v40 }
 0x1d1   :  { %v784_v27 = vpop.f32.mrf.mxu2 }
 0x1d2   :  { %v5371_v45 = vpop.f32.mrf.mxu3 }
 0x1d3   :  { %7604 = vst [vmem:[#allocation61_spill] sm:$0xff] %v5371_v45  ;;  %v5373_v54 = vpop.f32.mrf.mxu0 }
 0x1d4   :  { %7605 = vst [vmem:[#allocation62_spill] sm:$0xff] %v5373_v54 }
 0x1d9   :  { %v5375_v34 = vpop.f32.mrf.mxu2 }
 0x1da   :  { %7606 = vst [vmem:[#allocation63_spill] sm:$0xff] %v5375_v34  ;;  %v5377_v3 = vpop.f32.mrf.mxu3 }
 0x1db   :  { %7607 = vst [vmem:[#allocation64_spill] sm:$0xff] %v5377_v3  ;;  %v633_v16 = vpop.f32.mrf.mxu0 }
 0x1dc   :  { %v5379_v50 = vadd.f32 %v779_v32, %v633_v16 }
 0x1de   :  { %7608 = vst [vmem:[#allocation65_spill] sm:$0xff] %v5379_v50  ;;  %681 = vmatmul.bf16.gmra.mxu1 %v5268_v0  ;;  %876 = vmatmul.bf16.gmra.mxu0 %v5201_v12 }
 0x1df   :  { %984 = vmatmul.bf16.gmra.mxu2 %v5191_v39 }
 0x1e0   :  { %1033 = vmatmul.bf16.gmra.mxu3 %v5273_v44 }
 0x1e1   :  { %v789_v1 = vpop.f32.mrf.mxu2 }
 0x1e2   :  { %v5385_v42 = vpop.f32.mrf.mxu3 }
 0x1e3   :  { %7609 = vst [vmem:[#allocation66_spill] sm:$0xff] %v5385_v42  ;;  %v5387_v56 = vpop.f32.mrf.mxu0 }
 0x1e4   :  { %7610 = vst [vmem:[#allocation67_spill] sm:$0xff] %v5387_v56 }
 0x1e9   :  { %v5389_v20 = vpop.f32.mrf.mxu2 }
 0x1ea   :  { %7611 = vst [vmem:[#allocation68_spill] sm:$0xff] %v5389_v20  ;;  %v5391_v34 = vpop.f32.mrf.mxu3 }
 0x1eb   :  { %7612 = vst [vmem:[#allocation69_spill] sm:$0xff] %v5391_v34  ;;  %v638_v54 = vpop.f32.mrf.mxu0 }
 0x1ec   :  { %v5393_v16 = vadd.f32 %v784_v27, %v638_v54 }
 0x1ee   :  { %7613 = vst [vmem:[#allocation70_spill] sm:$0xff] %v5393_v16  ;;  %686 = vmatmul.bf16.gmra.mxu1 %v5271_v58  ;;  %881 = vmatmul.bf16.gmra.mxu0 %v5196_v8 }
 0x1f1   :  { %v950_v12 = vpop.f32.mrf.mxu2 }
 0x1f2   :  { %v999_v0 = vpop.f32.mrf.mxu3 }
 0x1f3   :  { %v5397_v32 = vadd.f32 %v999_v0, %v950_v12  ;;  %v5399_v50 = vpop.f32.mrf.mxu0 }
 0x1f4   :  { %7614 = vst [vmem:[#allocation71_spill] sm:$0xff] %v5399_v50 }
 0x1f9   :  { %v5401_v59 = vpop.f32.mrf.mxu2 }
 0x1fa   :  { %v5403_v56 = vpop.f32.mrf.mxu3 }
 0x1fb   :  { %v643_v20 = vpop.f32.mrf.mxu0 }
 0x1fc   :  { %v5405_v52 = vadd.f32 %v789_v1, %v643_v20 }
 0x1fe   :  { %7615 = vst [vmem:[#allocation72_spill] sm:$0xff] %v5405_v52  ;;  %691 = vmatmul.bf16.gmra.mxu1 %v5291_v53  ;;  %886 = vmatmul.bf16.gmra.mxu0 %v5191_v39 }
 0x201   :  { %v955_v58 = vpop.f32.mrf.mxu2 }
 0x202   :  { %v1004_v27 = vpop.f32.mrf.mxu3 }
 0x203   :  { %v5409_v8 = vadd.f32 %v1004_v27, %v955_v58  ;;  %v5451_v42 = vpop.f32.mrf.mxu0 }
 0x204   :  { %7620 = vst [vmem:[#allocation77_spill] sm:$0xff] %v5451_v42 }
 0x209   :  { %v5411_v54 = vpop.f32.mrf.mxu2 }
 0x20a   :  { %v5413_v12 = vpop.f32.mrf.mxu3 }
 0x20b   :  { %v5415_v0 = vpop.f32.mrf.mxu1  ;;  %v5457_v62 = vpop.f32.mrf.mxu0 }
 0x20e   :  { %900 = vmatmul.bf16.vlgmr.msra.gmra.mxu1 %v5213_v63 }
 0x212   :  { %v960_v50 = vpop.f32.mrf.mxu2 }
 0x213   :  { %v1009_v16 = vpop.f32.mrf.mxu3  ;;  %v5420_v1 = vpop.f32.mrf.mxu1 }
 0x214   :  { %v5418_v20 = vadd.f32 %v1009_v16, %v960_v50 }
 0x21a   :  { %v5422_v53 = vpop.f32.mrf.mxu2 }
 0x21b   :  { %v5424_v39 = vpop.f32.mrf.mxu3  ;;  %v5426_v58 = vpop.f32.mrf.mxu1 }
 0x21e   :  { %905 = vmatmul.bf16.gmra.mxu1 %v5241_v43 }
 0x222   :  { %v965_v27 = vpop.f32.mrf.mxu2 }
 0x223   :  { %v1014_v52 = vpop.f32.mrf.mxu3  ;;  %v5431_v26 = vpop.f32.mrf.mxu1 }
 0x224   :  { %v5429_v41 = vadd.f32 %v1014_v52, %v965_v27 }
 0x22a   :  { %v967_v63 = vpop.f32.mrf.mxu2 }
 0x22b   :  { %v1016_v35 = vpop.f32.mrf.mxu3  ;;  %v5433_v50 = vpop.f32.mrf.mxu1 }
 0x22e   :  { %910 = vmatmul.bf16.gmra.mxu1 %v5251_v38 }
 0x232   :  { %v970_v16 = vpop.f32.mrf.mxu2 }
 0x233   :  { %v1019_v55 = vpop.f32.mrf.mxu3  ;;  %v5436_v23 = vpop.f32.mrf.mxu1 }
 0x234   :  { %v1020_v29 = vadd.f32 %v1019_v55, %v970_v16 }
 0x23a   :  { %v972_v17 = vpop.f32.mrf.mxu2 }
 0x23b   :  { %v1021_v14 = vpop.f32.mrf.mxu3  ;;  %v5438_v43 = vpop.f32.mrf.mxu1 }
 0x23e   :  { %915 = vmatmul.bf16.gmra.mxu1 %v5259_v13 }
 0x242   :  { %v975_v52 = vpop.f32.mrf.mxu2 }
 0x243   :  { %v1024_v27 = vpop.f32.mrf.mxu3  ;;  %v5441_v11 = vpop.f32.mrf.mxu1 }
 0x244   :  { %7616 = vst [vmem:[#allocation73_spill] sm:$0xff] %v5441_v11  ;;  %v1025_v51 = vadd.f32 %v1024_v27, %v975_v52  ;;  %v7622_v52 = vld [vmem:[#allocation41_spill] sm:$0xff] }
 0x24a   :  { %v977_v48 = vpop.f32.mrf.mxu2 }
 0x24b   :  { %v1026_v7 = vpop.f32.mrf.mxu3  ;;  %v5443_v18 = vpop.f32.mrf.mxu1 }
 0x24c   :  { %7617 = vst [vmem:[#allocation74_spill] sm:$0xff] %v5443_v18 }
 0x24e   :  { %920 = vmatmul.bf16.gmra.mxu1 %v5287_v9 }
 0x252   :  { %v980_v38 = vpop.f32.mrf.mxu2 }
 0x253   :  { %v1029_v55 = vpop.f32.mrf.mxu3  ;;  %v5446_v16 = vpop.f32.mrf.mxu1 }
 0x254   :  { %7618 = vst [vmem:[#allocation75_spill] sm:$0xff] %v5446_v16  ;;  %v1030_v22 = vadd.f32 %v1029_v55, %v980_v38  ;;  %v1060_v38 = vmul.f32 2.0, %v1025_v51 }
 0x256   :  { %v1064_v42 = vmul.f32 2.0, %v1030_v22 }
 0x258   :  { %v1096_v55 = vsub.f32 %v1064_v42, %v5056_v24  ;;  %v4724_v24 = vld [vmem:[%s7334_s0 + $0x98] sm:$0xff]  ;;  %v1048_v42 = vmul.f32 2.0, %v5418_v20 }
 0x259   :  { %v4726_v20 = vld [vmem:[%s7334_s0 + $0x38] sm:$0xff] }
 0x25a   :  { %v982_v46 = vpop.f32.mrf.mxu2  ;;  %v1080_v27 = vsub.f32 %v1048_v42, %v7622_v52  ;;  %v4732_v52 = vld [vmem:[%s7334_s0 + $0x20] sm:$0xff] }
 0x25b   :  { %v1031_v15 = vpop.f32.mrf.mxu3  ;;  %v5448_v57 = vpop.f32.mrf.mxu1 }
 0x25c   :  { %7619 = vst [vmem:[#allocation76_spill] sm:$0xff] %v5448_v57  ;;  %v1032_v10 = vadd.f32 %v1031_v15, %v982_v46  ;;  %v1027_v57 = vadd.f32 %v1026_v7, %v977_v48  ;;  %v1022_v46 = vadd.f32 %v1021_v14, %v972_v17  ;;  %v1017_v7 = vadd.f32 %v1016_v35, %v967_v63 }
 0x25d   :  { %v1092_v17 = vsub.f32 %v1060_v38, %v4990_v30  ;;  %v1007_v30 = vadd.f32 %v5413_v12, %v5411_v54  ;;  %v4830_v14 = vmov 0   ;;  %v1044_v63 = vmul.f32 2.0, %v5409_v8 }
 0x25e   :  { %925 = vmatmul.bf16.gmra.mxu1 %v5284_v6  ;;  %v1066_v11 = vmul.f32 2.0, %v1032_v10  ;;  %v1058_v10 = vmul.f32 2.0, %v1022_v46  ;;  %4709 = vset.pattern.permute.xlu0 %v4830_v14  ;;  %v4728_v46 = vld [vmem:[%s7334_s0 + $0x18] sm:$0xff] }
 0x25f   :  { %4710 = vset.pattern.permute.xlu1 %v4830_v14  ;;  %4711 = vset.pattern.permute.xlu2 %v4830_v14  ;;  %v1046_v54 = vmul.f32 2.0, %v1007_v30  ;;  %v5536_v14 = vld [vmem:[#allocation5 + $0x88] sm:$0xff] }
 0x262   :  { %v985_v13 = vpop.f32.mrf.mxu2 }
 0x263   :  { %v1034_v34 = vpop.f32.mrf.mxu3  ;;  %v5453_v3 = vpop.f32.mrf.mxu1 }
 0x264   :  { %7621 = vst [vmem:[#allocation78_spill] sm:$0xff] %v5453_v3  ;;  %v1035_v45 = vadd.f32 %v1034_v34, %v985_v13  ;;  %v1062_v34 = vmul.f32 2.0, %v1027_v57 }
 0x266   :  { %v1068_v36 = vmul.f32 2.0, %v1035_v45  ;;  %v1098_v45 = vsub.f32 %v1066_v11, %v5061_v25  ;;  %v1054_v11 = vmul.f32 2.0, %v1017_v7  ;;  %v1090_v25 = vsub.f32 %v1058_v10, %v4724_v24  ;;  %v5513_v10 = vld [vmem:[#allocation5 + $0x80] sm:$0xff]  ;;  %v7624_v24 = vld [vmem:[#allocation30_spill] sm:$0xff] }
 0x268   :  { %v1100_v3 = vsub.f32 %v1068_v36, %v5102_v2  ;;  %v1116_v22 = vpack.c.bf16 %v1098_v45, %v1096_v55  ;;  %v1056_v2 = vmul.f32 2.0, %v1020_v29  ;;  %v1086_v48 = vsub.f32 %v1054_v11, %v5138_v21 }
 0x269   :  { %v1002_v21 = vadd.f32 %v5403_v56, %v5401_v59  ;;  %v1040_v59 = vmul.f32 2.0, %v5397_v32  ;;  %v4727_v56 = vld [vmem:[%s7334_s0 + $0x28] sm:$0xff] }
 0x26a   :  { %v987_v5 = vpop.f32.mrf.mxu2  ;;  %v1076_v8 = vsub.f32 %v1044_v63, %v4727_v56  ;;  %v5551_v56 = vld [vmem:[#allocation5 + $0x90] sm:$0xff] }
 0x26b   :  { %v1036_v9 = vpop.f32.mrf.mxu3  ;;  %v5455_v16 = vpop.f32.mrf.mxu1 }
 0x26c   :  { %v1037_v18 = vadd.f32 %v1036_v9, %v987_v5 }
 0x26e   :  { %v1070_v6 = vmul.f32 2.0, %v1037_v18  ;;  %930 = vmatmul.bf16.gmra.mxu1 %v5279_v40  ;;  %v1094_v40 = vsub.f32 %v1062_v34, %v5001_v33  ;;  %v5467_v18 = vpop.f32.mrf.mxu0  ;;  %v4725_v33 = vld [vmem:[%s7334_s0 + $0x88] sm:$0xff] }
 0x26f   :  { %v1088_v29 = vsub.f32 %v1056_v2, %v4725_v33  ;;  %v7623_v2 = vld [vmem:[#allocation28_spill] sm:$0xff] }
 0x270   :  { %v1102_v15 = vsub.f32 %v1070_v6, %v5107_v4  ;;  %v1114_v35 = vpack.c.bf16 %v1094_v40, %v1092_v17  ;;  %v1052_v4 = vmul.f32 2.0, %v5429_v41  ;;  %v114_v41 = vld [vmem:[%s7337_s3] sm:$0xff]  ;;  %v1078_v6 = vsub.f32 %v1046_v54, %v4726_v20  ;;  %v116_v40 = vld [vmem:[%s7337_s3 + $0x10] sm:$0xff]  ;;  %v7629_v20 = vld [vmem:[#allocation40_spill] sm:$0xff] }
 0x271   :  { %v1112_v36 = vpack.c.bf16 %v1090_v25, %v1088_v29  ;;  %1316 = vperm.xlu0 %4709, %v114_v41   ;;  %1326 = vperm.xlu1 %4710, %v116_v40   ;;  %v4731_v29 = vld [vmem:[%s7334_s0 + $0x10] sm:$0xff]  ;;  %v4734_v40 = vld [vmem:[%s7334_s0 + $0x40] sm:$0xff] }
 0x272   :  { %v1118_v5 = vpack.c.bf16 %v1102_v15, %v1100_v3  ;;  %v1012_v3 = vadd.f32 %v5424_v39, %v5422_v53  ;;  %v1084_v53 = vsub.f32 %v1052_v4, %v5133_v19  ;;  %v1042_v19 = vmul.f32 2.0, %v1002_v21  ;;  %v117_v4 = vld [vmem:[%s7337_s3 + $0x18] sm:$0xff] }
 0x273   :  { %v5464_v13 = vpop.f32.mrf.mxu1  ;;  %v1106_v45 = vpack.c.bf16 %v1078_v6, %v1076_v8  ;;  %v120_v8 = vld [vmem:[%s7337_s3 + $0x30] sm:$0xff] }
 0x274   :  { %1233 = vmatpush.bf16.msrb.mxu1 %v1118_v5  ;;  %v1050_v51 = vmul.f32 2.0, %v1012_v3  ;;  %v1110_v39 = vpack.c.bf16 %v1086_v48, %v1084_v53  ;;  %v1074_v34 = vsub.f32 %v1042_v19, %v4728_v46  ;;  %v4729_v5 = vld [vmem:[%s7334_s0 + $0x8] sm:$0xff]  ;;  %v4733_v19 = vld [vmem:[%s7334_s0 + $0x30] sm:$0xff] }
 0x275   :  { %v1072_v38 = vsub.f32 %v1040_v59, %v4729_v5  ;;  %v7627_v53 = vld [vmem:[#allocation36_spill] sm:$0xff]  ;;  %v7630_v59 = vld [vmem:[#allocation43_spill] sm:$0xff] }
 0x276   :  { %v857_v12 = vpop.f32.mrf.mxu0 }
 0x277   :  { %v1104_v7 = vpack.c.bf16 %v1074_v34, %v1072_v38 }
 0x278   :  { %1234 = vmatpush.bf16.msrb.mxu1 %v1116_v22 }
 0x279   :  { %1331 = vperm.xlu1 %4710, %v117_v4   ;;  %v5571_v4 = vld [vmem:[#allocation5 + $0x98] sm:$0xff] }
 0x27b   :  { %v5479_v57 = vpop.f32.mrf.mxu1 }
 0x27c   :  { %1235 = vmatpush.bf16.msrb.mxu1 %v1114_v35 }
 0x27e   :  { %935 = vmatmul.bf16.gmra.mxu1 %v5273_v44  ;;  %v1082_v44 = vsub.f32 %v1050_v51, %v5083_v47  ;;  %v115_v47 = vld [vmem:[%s7337_s3 + $0x8] sm:$0xff]  ;;  %v859_v55 = vpop.f32.mrf.mxu0 }
 0x27f   :  { %1321 = vperm.xlu0 %4709, %v115_v47  }
 0x280   :  { %1236 = vmatpush.bf16.msrb.mxu1 %v1112_v36  ;;  %v1108_v15 = vpack.c.bf16 %v1082_v44, %v1080_v27  ;;  %v7626_v36 = vld [vmem:[#allocation34_spill] sm:$0xff] }
 0x283   :  { %v5495_v9 = vpop.f32.mrf.mxu1 }
 0x284   :  { %1237 = vmatpush.bf16.msrb.mxu1 %v1110_v39  ;;  %v7628_v39 = vld [vmem:[#allocation38_spill] sm:$0xff] }
 0x286   :  { %v862_v25 = vpop.f32.mrf.mxu0 }
 0x287   :  { %1346 = vperm.xlu0 %4709, %v120_v8  }
 0x288   :  { %1238 = vmatpush.bf16.msrb.mxu1 %v1108_v15 }
 0x28b   :  { %v901_v32 = vpop.f32.mrf.mxu1 }
 0x28c   :  { %1239 = vmatpush.bf16.msrb.mxu1 %v1106_v45  ;;  %v902_v22 = vadd.f32 %v901_v32, %v5457_v62  ;;  %v4730_v62 = vld [vmem:[%s7334_s0] sm:$0xff] }
 0x28d   :  { %v118_v32 = vld [vmem:[%s7337_s3 + $0x20] sm:$0xff] }
 0x28e   :  { %v1039_v3 = vmul.f32 2.0, %v902_v22  ;;  %v864_v41 = vpop.f32.mrf.mxu0  ;;  %1336 = vperm.xlu2 %4711, %v118_v32  }
 0x290   :  { %1240 = vmatpush.bf16.msrb.mxu1 %v1104_v7  ;;  %v1071_v33 = vsub.f32 %v1039_v3, %v4730_v62  ;;  %v121_v7 = vld [vmem:[%s7337_s3 + $0x38] sm:$0xff]  ;;  %v119_v62 = vld [vmem:[%s7337_s3 + $0x28] sm:$0xff] }
 0x291   :  { %1351 = vperm.xlu1 %4710, %v121_v7  }
 0x293   :  { %1241 = vmatmul.bf16.vlgmr.msrb.gmra.mxu1 %v5513_v10  ;;  %v903_v17 = vpop.f32.mrf.mxu1 }
 0x294   :  { %1655 = vmatpush.bf16.msra.mxu1 %v7623_v2  ;;  %v904_v11 = vadd.f32 %v903_v17, %v5467_v18  ;;  %v7625_v18 = vld [vmem:[#allocation32_spill] sm:$0xff]  ;;  %v4735_v17 = vld [vmem:[%s7334_s0 + $0x50] sm:$0xff] }
 0x296   :  { %v1041_v35 = vmul.f32 2.0, %v904_v11  ;;  %v867_v6 = vpop.f32.mrf.mxu0  ;;  %1341 = vperm.xlu2 %4711, %v119_v62  }
 0x298   :  { %1656 = vmatpush.bf16.msra.mxu1 %v7624_v24  ;;  %v1073_v30 = vsub.f32 %v1041_v35, %v4731_v29 }
 0x29a   :  { %v5533_v51 = vpack.c.bf16 %v1073_v30, %v1071_v33 }
 0x29b   :  { %v906_v48 = vpop.f32.mrf.mxu1 }
 0x29c   :  { %1657 = vmatpush.bf16.msra.mxu1 %v7625_v18  ;;  %v907_v42 = vadd.f32 %v906_v48, %v857_v12 }
 0x29e   :  { %v1043_v54 = vmul.f32 2.0, %v907_v42  ;;  %v869_v34 = vpop.f32.mrf.mxu0  ;;  %v123_v42 = vld [vmem:[%s7337_s3 + $0x48] sm:$0xff] }
 0x29f   :  { %1361 = vperm.xlu0 %4709, %v123_v42   ;;  %v4360_v42 = vld [vmem:[%s7337_s3 + $0xa8] sm:$0xff] }
 0x2a0   :  { %1658 = vmatpush.bf16.msra.mxu1 %v7626_v36  ;;  %v1075_v27 = vsub.f32 %v1043_v54, %v4732_v52  ;;  %v4736_v54 = vld [vmem:[%s7334_s0 + $0x60] sm:$0xff] }
 0x2a3   :  { %1246 = vmatmul.bf16.gmra.mxu1 %v5536_v14  ;;  %v908_v21 = vpop.f32.mrf.mxu1 }
 0x2a4   :  { %1659 = vmatpush.bf16.msra.mxu1 %v7627_v53  ;;  %v909_v44 = vadd.f32 %v908_v21, %v859_v55 }
 0x2a6   :  { %v1045_v63 = vmul.f32 2.0, %v909_v44  ;;  %v872_v35 = vpop.f32.mrf.mxu0 }
 0x2a8   :  { %1660 = vmatpush.bf16.msra.mxu1 %v7628_v39  ;;  %v1077_v12 = vsub.f32 %v1045_v63, %v4733_v19  ;;  %v4737_v63 = vld [vmem:[%s7334_s0 + $0x70] sm:$0xff] }
 0x2aa   :  { %v5548_v15 = vpack.c.bf16 %v1077_v12, %v1075_v27 }
 0x2ab   :  { %v911_v47 = vpop.f32.mrf.mxu1 }
 0x2ac   :  { %1661 = vmatpush.bf16.msra.mxu1 %v7629_v20  ;;  %v912_v46 = vadd.f32 %v911_v47, %v862_v25  ;;  %v124_v47 = vld [vmem:[%s7337_s3 + $0x50] sm:$0xff] }
 0x2ad   :  { %1366 = vperm.xlu1 %4710, %v124_v47  }
 0x2ae   :  { %v1047_v5 = vmul.f32 2.0, %v912_v46  ;;  %v5580_v21 = vpop.f32.mrf.mxu0 }
 0x2b0   :  { %1662 = vmatpush.bf16.msra.mxu1 %v7630_v59  ;;  %v1079_v22 = vsub.f32 %v1047_v5, %v4734_v40  ;;  %v127_v40 = vld [vmem:[%s7337_s3 + $0x68] sm:$0xff] }
 0x2b3   :  { %1251 = vmatmul.bf16.gmra.mxu1 %v5551_v56  ;;  %v913_v45 = vpop.f32.mrf.mxu1 }
 0x2b4   :  { %v914_v38 = vadd.f32 %v913_v45, %v864_v41 }
 0x2b5   :  { %1381 = vperm.xlu1 %4710, %v127_v40  }
 0x2b6   :  { %v1049_v55 = vmul.f32 2.0, %v914_v38  ;;  %v877_v8 = vpop.f32.mrf.mxu0  ;;  %v5601_v38 = vld [vmem:[#allocation5 + $0xa8] sm:$0xff] }
 0x2b8   :  { %v1081_v3 = vsub.f32 %v1049_v55, %v4735_v17  ;;  %v126_v55 = vld [vmem:[%s7337_s3 + $0x60] sm:$0xff]  ;;  %v125_v17 = vld [vmem:[%s7337_s3 + $0x58] sm:$0xff] }
 0x2b9   :  { %1376 = vperm.xlu0 %4709, %v126_v55   ;;  %v128_v55 = vld [vmem:[%s7337_s3 + $0x70] sm:$0xff] }
 0x2ba   :  { %v5569_v11 = vpack.c.bf16 %v1081_v3, %v1079_v22  ;;  %v5613_v3 = vld [vmem:[#allocation5 + $0xb0] sm:$0xff] }
 0x2bb   :  { %v916_v25 = vpop.f32.mrf.mxu1 }
 0x2bc   :  { %v917_v33 = vadd.f32 %v916_v25, %v867_v6  ;;  %v5592_v6 = vld [vmem:[#allocation5 + $0xa0] sm:$0xff] }
 0x2be   :  { %v1051_v30 = vmul.f32 2.0, %v917_v33  ;;  %v879_v45 = vpop.f32.mrf.mxu0  ;;  %v4357_v33 = vld [vmem:[%s7337_s3 + $0x90] sm:$0xff] }
 0x2c0   :  { %v1083_v44 = vsub.f32 %v1051_v30, %v4736_v54 }
 0x2c3   :  { %1256 = vmatmul.bf16.gmra.mxu1 %v5571_v4  ;;  %v918_v29 = vpop.f32.mrf.mxu1 }
 0x2c4   :  { %v919_v48 = vadd.f32 %v918_v29, %v869_v34  ;;  %v122_v34 = vld [vmem:[%s7337_s3 + $0x40] sm:$0xff] }
 0x2c5   :  { %1356 = vperm.xlu2 %4711, %v122_v34  }
 0x2c6   :  { %v1053_v41 = vmul.f32 2.0, %v919_v48  ;;  %v882_v7 = vpop.f32.mrf.mxu0  ;;  %v5622_v48 = vld [vmem:[#allocation5 + $0xb8] sm:$0xff] }
 0x2c8   :  { %v1085_v52 = vsub.f32 %v1053_v41, %v4737_v63  ;;  %v4355_v41 = vld [vmem:[%s7337_s3 + $0x80] sm:$0xff] }
 0x2c9   :  { %2502 = vperm.xlu1 %4710, %v4355_v41  }
 0x2ca   :  { %v5588_v27 = vpack.c.bf16 %v1085_v52, %v1083_v44 }
 0x2cb   :  { %v921_v19 = vpop.f32.mrf.mxu1 }
 0x2cc   :  { %v5590_v12 = vadd.f32 %v921_v19, %v872_v35  ;;  %v129_v35 = vld [vmem:[%s7337_s3 + $0x78] sm:$0xff] }
 0x2cd   :  { %1371 = vperm.xlu2 %4711, %v125_v17   ;;  %1391 = vperm.xlu0 %4709, %v129_v35  }
 0x2ce   :  { %v884_v25 = vpop.f32.mrf.mxu0 }
 0x2d3   :  { %1261 = vmatmul.bf16.gmra.mxu1 %v5592_v6  ;;  %v923_v46 = vpop.f32.mrf.mxu1 }
 0x2d5   :  { %2512 = vperm.xlu0 %4709, %v4357_v33   ;;  %1386 = vperm.xlu2 %4711, %v128_v55   ;;  %v1055_v55 = vmul.f32 2.0, %v5590_v12  ;;  %v4744_v12 = vld [vmem:[%s7334_s0 + $0x90] sm:$0xff] }
 0x2d6   :  { %v887_v29 = vpop.f32.mrf.mxu0 }
 0x2db   :  { %v926_v5 = vpop.f32.mrf.mxu1 }
 0x2dc   :  { %v927_v33 = vadd.f32 %v926_v5, %v877_v8  ;;  %v924_v8 = vadd.f32 %v923_v46, %v5580_v21  ;;  %v4742_v21 = vld [vmem:[%s7334_s0 + $0xb0] sm:$0xff] }
 0x2dd   :  { %2527 = vperm.xlu0 %4709, %v4360_v42  }
 0x2de   :  { %v889_v63 = vpop.f32.mrf.mxu0 }
 0x2e3   :  { %1266 = vmatmul.bf16.gmra.mxu1 %v5601_v38  ;;  %v928_v32 = vpop.f32.mrf.mxu1 }
 0x2e4   :  { %v929_v40 = vadd.f32 %v928_v32, %v879_v45  ;;  %v4363_v45 = vld [vmem:[%s7337_s3 + $0xc0] sm:$0xff]  ;;  %v4740_v32 = vld [vmem:[%s7334_s0 + $0xd0] sm:$0xff] }
 0x2e5   :  { %2542 = vperm.xlu0 %4709, %v4363_v45   ;;  %v806_v45 = vadd.f32 %v5289_v60, %v5420_v1 }
 0x2e6   :  { %v1061_v5 = vmul.f32 2.0, %v929_v40  ;;  %v4743_v40 = vld [vmem:[%s7334_s0 + $0xa0] sm:$0xff] }
 0x2e8   :  { %v1093_v46 = vsub.f32 %v1061_v5, %v4742_v21  ;;  %v4367_v21 = vld [vmem:[%s7337_s3 + $0xe0] sm:$0xff] }
 0x2eb   :  { %v931_v22 = vpop.f32.mrf.mxu1 }
 0x2ec   :  { %v932_v19 = vadd.f32 %v931_v22, %v882_v7  ;;  %v4739_v7 = vld [vmem:[%s7334_s0 + $0xf0] sm:$0xff] }
 0x2f3   :  { %1271 = vmatmul.bf16.gmra.mxu1 %v5613_v3  ;;  %v933_v62 = vpop.f32.mrf.mxu1 }
 0x2f4   :  { %v934_v44 = vadd.f32 %v933_v62, %v884_v25  ;;  %v4738_v25 = vld [vmem:[%s7334_s0 + $0xe0] sm:$0xff] }
 0x2f6   :  { %v1065_v17 = vmul.f32 2.0, %v934_v44  ;;  %v4741_v44 = vld [vmem:[%s7334_s0 + $0xc0] sm:$0xff] }
 0x2f8   :  { %v1097_v41 = vsub.f32 %v1065_v17, %v4740_v32 }
 0x2fb   :  { %v936_v30 = vpop.f32.mrf.mxu1 }
 0x2fc   :  { %v937_v54 = vadd.f32 %v936_v30, %v887_v29  ;;  %v1063_v29 = vmul.f32 2.0, %v932_v19  ;;  %v4358_v30 = vld [vmem:[%s7337_s3 + $0x98] sm:$0xff]  ;;  %v1057_v19 = vmul.f32 2.0, %v924_v8 }
 0x2fd   :  { %2517 = vperm.xlu1 %4710, %v4358_v30  }
 0x2fe   :  { %v1067_v47 = vmul.f32 2.0, %v937_v54  ;;  %v1059_v54 = vmul.f32 2.0, %v927_v33  ;;  %v4366_v33 = vld [vmem:[%s7337_s3 + $0xd8] sm:$0xff] }
 0x2ff   :  { %2557 = vperm.xlu0 %4709, %v4366_v33   ;;  %v7636_v33 = vld [vmem:[#allocation29_spill] sm:$0xff] }
 0x300   :  { %v1099_v62 = vsub.f32 %v1067_v47, %v4738_v25  ;;  %v1091_v17 = vsub.f32 %v1059_v54, %v4743_v40  ;;  %v1089_v25 = vsub.f32 %v1057_v19, %v4744_v12  ;;  %v814_v12 = vadd.f32 %v5313_v31, %v5433_v50  ;;  %v7641_v50 = vld [vmem:[#allocation35_spill] sm:$0xff] }
 0x303   :  { %1276 = vmatmul.bf16.gmra.mxu1 %v5622_v48  ;;  %v938_v52 = vpop.f32.mrf.mxu1 }
 0x304   :  { %v939_v34 = vadd.f32 %v938_v52, %v889_v63  ;;  %v1095_v63 = vsub.f32 %v1063_v29, %v4741_v44  ;;  %v5653_v52 = vpop.permute.xlu0 %1316  ;;  %v804_v29 = vadd.f32 %v5281_v28, %v5415_v0  ;;  %v5695_v44 = vpop.permute.xlu1 %1326 }
 0x306   :  { %v1069_v35 = vmul.f32 2.0, %v939_v34  ;;  %v1115_v47 = vpack.c.bf16 %v1097_v41, %v1095_v63  ;;  %v4364_v41 = vld [vmem:[%s7337_s3 + $0xc8] sm:$0xff] }
 0x308   :  { %v1101_v22 = vsub.f32 %v1069_v35, %v4739_v7  ;;  %v4361_v35 = vld [vmem:[%s7337_s3 + $0xb0] sm:$0xff]  ;;  %v4745_v7 = vld [vmem:[%s7334_s0 + $0x80] sm:$0xff] }
 0x309   :  { %2532 = vperm.xlu1 %4710, %v4361_v35  }
 0x30a   :  { %v1117_v42 = vpack.c.bf16 %v1101_v22, %v1099_v62  ;;  %v1113_v62 = vpack.c.bf16 %v1093_v46, %v1091_v17  ;;  %v1087_v22 = vsub.f32 %v1055_v55, %v4745_v7  ;;  %v4356_v17 = vld [vmem:[%s7337_s3 + $0x88] sm:$0xff]  ;;  %v816_v7 = vadd.f32 %v5319_v37, %v5436_v23 }
 0x30b   :  { %2507 = vperm.xlu2 %4711, %v4356_v17   ;;  %v7646_v17 = vld [vmem:[#allocation49_spill] sm:$0xff] }
 0x30c   :  { %1184 = vmatpush.bf16.msrb.mxu0 %v1117_v42  ;;  %v1111_v8 = vpack.c.bf16 %v1089_v25, %v1087_v22  ;;  %v5678_v32 = vpop.permute.xlu0 %1321  ;;  %v4369_v42 = vld [vmem:[%s7337_s3 + $0xf0] sm:$0xff]  ;;  %v7637_v25 = vld [vmem:[#allocation31_spill] sm:$0xff] }
 0x30d   :  { %2572 = vperm.xlu0 %4709, %v4369_v42   ;;  %v7638_v22 = vld [vmem:[#allocation33_spill] sm:$0xff] }
 0x30e   :  { %v7642_v42 = vld [vmem:[#allocation37_spill] sm:$0xff] }
 0x310   :  { %v1242_v34 = vpop.f32.mrf.mxu1  ;;  %1185 = vmatpush.bf16.msrb.mxu0 %v1115_v47  ;;  %v811_v47 = vadd.f32 %v5302_v49, %v5431_v26  ;;  %v7635_v26 = vld [vmem:[#allocation27_spill] sm:$0xff] }
 0x311   :  { %v1283_v30 = vadd.f32 %v1242_v34, %v804_v29  ;;  %2547 = vperm.xlu1 %4710, %v4364_v41  }
 0x313   :  { %v5681_v28 = vadd.f32 %v5653_v52, %v1283_v30 }
 0x314   :  { %1186 = vmatpush.bf16.msrb.mxu0 %v1113_v62 }
 0x315   :  { %7631 = vst [vmem:[#allocation41_spill] sm:$0xff] %v5681_v28  ;;  %v7404_v1 = vmax.f32 %v5681_v28, 0.0 }
 0x318   :  { %v1244_v5 = vpop.f32.mrf.mxu1  ;;  %1187 = vmatpush.bf16.msrb.mxu0 %v1111_v8 }
 0x319   :  { %v1285_v0 = vadd.f32 %v1244_v5, %v806_v45  ;;  %2562 = vperm.xlu1 %4710, %v4367_v21   ;;  %v4365_v21 = vld [vmem:[%s7337_s3 + $0xd0] sm:$0xff] }
 0x31b   :  { %v5690_v60 = vadd.f32 %v5678_v32, %v1285_v0  ;;  %v4362_v0 = vld [vmem:[%s7337_s3 + $0xb8] sm:$0xff] }
 0x31c   :  { %1188 = vmatpush.bf16.msrb.mxu0 %v5588_v27  ;;  %v809_v27 = vadd.f32 %v5298_v61, %v5426_v58  ;;  %v4370_v61 = vld [vmem:[%s7337_s3 + $0xf8] sm:$0xff] }
 0x31d   :  { %7632 = vst [vmem:[#allocation79_spill] sm:$0xff] %v5690_v60  ;;  %v7405_v54 = vmax.f32 %v5690_v60, 0.0 }
 0x31f   :  { %v5701_v63 = vpack.c.bf16 %v7405_v54, %v7404_v1 }
 0x320   :  { %v1247_v19 = vpop.f32.mrf.mxu1  ;;  %1189 = vmatpush.bf16.msrb.mxu0 %v5569_v11  ;;  %v5714_v11 = vpop.permute.xlu1 %1331 }
 0x321   :  { %1565 = vmatmul.bf16.vlgmr.msra.gmra.mxu3 %v5701_v63  ;;  %1663 = vmatmul.bf16.vlgmr.msra.gmra.mxu1 %v5701_v63  ;;  %v1287_v46 = vadd.f32 %v1247_v19, %v809_v27 }
 0x322   :  { %2577 = vperm.xlu1 %4710, %v4370_v61  }
 0x323   :  { %v5717_v55 = vadd.f32 %v5695_v44, %v1287_v46  ;;  %v7644_v46 = vld [vmem:[#allocation39_spill] sm:$0xff] }
 0x324   :  { %1190 = vmatpush.bf16.msrb.mxu0 %v5548_v15  ;;  %v5733_v15 = vpop.permute.xlu2 %1336 }
 0x325   :  { %7633 = vst [vmem:[#allocation80_spill] sm:$0xff] %v5717_v55  ;;  %v7406_v58 = vmax.f32 %v5717_v55, 0.0 }
 0x328   :  { %v1249_v34 = vpop.f32.mrf.mxu1  ;;  %1191 = vmatpush.bf16.msrb.mxu0 %v5533_v51 }
 0x329   :  { %v1289_v40 = vadd.f32 %v1249_v34, %v811_v47  ;;  %v5783_v34 = vpop.permute.xlu0 %1346 }
 0x32b   :  { %v5727_v49 = vadd.f32 %v5714_v11, %v1289_v40  ;;  %1192 = vmatmul.bf16.vlgmr.msrb.gmra.mxu0 %v5513_v10  ;;  %v4359_v10 = vld [vmem:[%s7337_s3 + $0xa0] sm:$0xff]  ;;  %v7645_v40 = vld [vmem:[#allocation73_spill] sm:$0xff] }
 0x32c   :  { %1606 = vmatpush.bf16.msra.mxu0 %v7635_v26  ;;  %2522 = vperm.xlu2 %4711, %v4359_v10   ;;  %v5753_v45 = vpop.permute.xlu2 %1341  ;;  %v821_v61 = vadd.f32 %v7646_v17, %v7645_v40 }
 0x32d   :  { %7634 = vst [vmem:[#allocation81_spill] sm:$0xff] %v5727_v49  ;;  %v7407_v51 = vmax.f32 %v5727_v49, 0.0 }
 0x32f   :  { %v5739_v35 = vpack.c.bf16 %v7407_v51, %v7406_v58 }
 0x330   :  { %1607 = vmatpush.bf16.msra.mxu0 %v7636_v33  ;;  %v1252_v29 = vpop.f32.mrf.mxu1 }
 0x331   :  { %1570 = vmatmul.bf16.gmra.mxu3 %v5739_v35  ;;  %1668 = vmatmul.bf16.gmra.mxu1 %v5739_v35  ;;  %v1291_v62 = vadd.f32 %v1252_v29, %v814_v12  ;;  %v7647_v29 = vld [vmem:[#allocation42_spill] sm:$0xff]  ;;  %v5788_v12 = vpop.permute.xlu1 %1351  ;;  %v5819_v1 = vpop.permute.xlu0 %1361 }
 0x333   :  { %v5756_v8 = vadd.f32 %v5733_v15, %v1291_v62 }
 0x334   :  { %1608 = vmatpush.bf16.msra.mxu0 %v7637_v25  ;;  %2537 = vperm.xlu2 %4711, %v4362_v0   ;;  %v5815_v17 = vpop.permute.xlu2 %1356 }
 0x335   :  { %7639 = vst [vmem:[#allocation82_spill] sm:$0xff] %v5756_v8  ;;  %v7408_v23 = vmax.f32 %v5756_v8, 0.0 }
 0x338   :  { %1609 = vmatpush.bf16.msra.mxu0 %v7638_v22  ;;  %v1254_v30 = vpop.f32.mrf.mxu1 }
 0x339   :  { %v1293_v5 = vadd.f32 %v1254_v30, %v816_v7 }
 0x33b   :  { %v5762_v31 = vadd.f32 %v5753_v45, %v1293_v5  ;;  %1197 = vmatmul.bf16.gmra.mxu0 %v5536_v14  ;;  %v7643_v14 = vld [vmem:[#allocation47_spill] sm:$0xff] }
 0x33c   :  { %1610 = vmatpush.bf16.msra.mxu0 %v7641_v50  ;;  %2552 = vperm.xlu2 %4711, %v4365_v21   ;;  %v819_v27 = vadd.f32 %v7643_v14, %v5438_v43  ;;  %v4368_v43 = vld [vmem:[%s7337_s3 + $0xe8] sm:$0xff]  ;;  %v4467_v14 = vld [vmem:[%s7337_s3 + $0x100] sm:$0xff]  ;;  %s4831_s3 = smov [#allocation7]  }
 0x33d   :  { %7640 = vst [vmem:[#allocation83_spill] sm:$0xff] %v5762_v31  ;;  %v7409_v37 = vmax.f32 %v5762_v31, 0.0  ;;  %s4115_s6 = sshll.u32 %s4831_s3, 4  ;;  %s4116_s6 = int_to_ptr.vmem [resolvable:$true] %s4115_s6 }
 0x33f   :  { %v5772_v41 = vpack.c.bf16 %v7409_v37, %v7408_v23  ;;  %v5840_v37 = vpop.permute.xlu2 %1371 }
 0x340   :  { %1611 = vmatpush.bf16.msra.mxu0 %v7642_v42  ;;  %v1257_v19 = vpop.f32.mrf.mxu1 }
 0x341   :  { %1575 = vmatmul.bf16.gmra.mxu3 %v5772_v41  ;;  %1673 = vmatmul.bf16.gmra.mxu1 %v5772_v41  ;;  %v1295_v47 = vadd.f32 %v1257_v19, %v819_v27  ;;  %v7651_v27 = vld [vmem:[#allocation51_spill] sm:$0xff] }
 0x343   :  { %v5791_v62 = vadd.f32 %v5783_v34, %v1295_v47 }
 0x344   :  { %1612 = vmatpush.bf16.msra.mxu0 %v7644_v46  ;;  %2567 = vperm.xlu2 %4711, %v4368_v43  }
 0x345   :  { %7648 = vst [vmem:[#allocation47_spill] sm:$0xff] %v5791_v62  ;;  %v7410_v5 = vmax.f32 %v5791_v62, 0.0 }
 0x348   :  { %1613 = vmatpush.bf16.msra.mxu0 %v7647_v29  ;;  %v1259_v10 = vpop.f32.mrf.mxu1 }
 0x349   :  { %v1297_v7 = vadd.f32 %v1259_v10, %v821_v61  ;;  %v7652_v61 = vld [vmem:[#allocation75_spill] sm:$0xff]  ;;  %v7653_v10 = vld [vmem:[#allocation54_spill] sm:$0xff] }
 0x34b   :  { %v5797_v30 = vadd.f32 %v5788_v12, %v1297_v7  ;;  %1202 = vmatmul.bf16.gmra.mxu0 %v5551_v56  ;;  %v7650_v56 = vld [vmem:[#allocation74_spill] sm:$0xff]  ;;  %v826_v7 = vadd.f32 %v7653_v10, %v7652_v61 }
 0x34c   :  { %3688 = vperm.xlu2 %4711, %v4467_v14   ;;  %v824_v47 = vadd.f32 %v7651_v27, %v7650_v56 }
 0x34d   :  { %7649 = vst [vmem:[#allocation73_spill] sm:$0xff] %v5797_v30  ;;  %v7411_v0 = vmax.f32 %v5797_v30, 0.0 }
 0x34f   :  { %v5806_v19 = vpack.c.bf16 %v7411_v0, %v7410_v5 }
 0x350   :  { %v1262_v21 = vpop.f32.mrf.mxu1 }
 0x351   :  { %1580 = vmatmul.bf16.gmra.mxu3 %v5806_v19  ;;  %1678 = vmatmul.bf16.gmra.mxu1 %v5806_v19  ;;  %v1299_v40 = vadd.f32 %v1262_v21, %v824_v47  ;;  %v7656_v47 = vld [vmem:[#allocation76_spill] sm:$0xff] }
 0x353   :  { %v5822_v54 = vadd.f32 %v5815_v17, %v1299_v40  ;;  %v7657_v40 = vld [vmem:[#allocation56_spill] sm:$0xff] }
 0x354   :  { %v829_v61 = vadd.f32 %v7657_v40, %v7656_v47 }
 0x355   :  { %7654 = vst [vmem:[#allocation49_spill] sm:$0xff] %v5822_v54  ;;  %v7412_v14 = vmax.f32 %v5822_v54, 0.0  ;;  %v7721_v54 = vld [vmem:[#allocation21_spill] sm:$0xff] }
 0x358   :  { %v1264_v43 = vpop.f32.mrf.mxu1 }
 0x359   :  { %v1301_v58 = vadd.f32 %v1264_v43, %v826_v7  ;;  %v7658_v7 = vld [vmem:[#allocation78_spill] sm:$0xff] }
 0x35b   :  { %v5825_v51 = vadd.f32 %v5819_v1, %v1301_v58  ;;  %1207 = vmatmul.bf16.gmra.mxu0 %v5571_v4  ;;  %v5836_v58 = vpop.permute.xlu1 %1366  ;;  %v7659_v4 = vld [vmem:[#allocation59_spill] sm:$0xff] }
 0x35c   :  { %v831_v43 = vadd.f32 %v7659_v4, %v7658_v7 }
 0x35d   :  { %7655 = vst [vmem:[#allocation74_spill] sm:$0xff] %v5825_v51  ;;  %v7413_v21 = vmax.f32 %v5825_v51, 0.0  ;;  %v7723_v51 = vld [vmem:[#allocation25_spill] sm:$0xff] }
 0x35f   :  { %v1484_v56 = vpack.c.bf16 %v7413_v21, %v7412_v14 }
 0x360   :  { %v1267_v27 = vpop.f32.mrf.mxu1 }
 0x361   :  { %1585 = vmatmul.bf16.gmra.mxu3 %v1484_v56  ;;  %1683 = vmatmul.bf16.gmra.mxu1 %v1484_v56  ;;  %v1303_v10 = vadd.f32 %v1267_v27, %v829_v61 }
 0x363   :  { %v5843_v5 = vadd.f32 %v5836_v58, %v1303_v10  ;;  %v7662_v10 = vld [vmem:[#allocation61_spill] sm:$0xff]  ;;  %v5861_v21 = vpop.permute.xlu1 %1381 }
 0x365   :  { %7660 = vst [vmem:[#allocation51_spill] sm:$0xff] %v5843_v5  ;;  %v7416_v47 = vmax.f32 %v5843_v5, 0.0 }
 0x368   :  { %v1269_v23 = vpop.f32.mrf.mxu1 }
 0x369   :  { %v1305_v0 = vadd.f32 %v1269_v23, %v831_v43  ;;  %v834_v23 = vadd.f32 %v7662_v10, %v5455_v16 }
 0x36b   :  { %v5846_v14 = vadd.f32 %v5840_v37, %v1305_v0  ;;  %1212 = vmatmul.bf16.gmra.mxu0 %v5592_v6  ;;  %v5857_v0 = vpop.permute.xlu0 %1376  ;;  %v7663_v6 = vld [vmem:[#allocation64_spill] sm:$0xff] }
 0x36c   :  { %v836_v4 = vadd.f32 %v7663_v6, %v5464_v13 }
 0x36d   :  { %7661 = vst [vmem:[#allocation75_spill] sm:$0xff] %v5846_v14  ;;  %v7417_v27 = vmax.f32 %v5846_v14, 0.0 }
 0x36f   :  { %v1486_v40 = vpack.c.bf16 %v7417_v27, %v7416_v47 }
 0x370   :  { %v1272_v61 = vpop.f32.mrf.mxu1 }
 0x371   :  { %1590 = vmatmul.bf16.gmra.mxu3 %v1486_v40  ;;  %1688 = vmatmul.bf16.gmra.mxu1 %v1486_v40  ;;  %v1307_v7 = vadd.f32 %v1272_v61, %v834_v23  ;;  %v7666_v23 = vld [vmem:[#allocation66_spill] sm:$0xff] }
 0x373   :  { %v5864_v28 = vadd.f32 %v5857_v0, %v1307_v7  ;;  %v839_v7 = vadd.f32 %v7666_v23, %v5479_v57  ;;  %v5885_v49 = vpop.permute.xlu0 %1391  ;;  %v7670_v23 = vld [vmem:[#allocation44_spill] sm:$0xff] }
 0x375   :  { %7664 = vst [vmem:[#allocation54_spill] sm:$0xff] %v5864_v28  ;;  %v7420_v16 = vmax.f32 %v5864_v28, 0.0 }
 0x378   :  { %v1274_v43 = vpop.f32.mrf.mxu1 }
 0x379   :  { %v1309_v60 = vadd.f32 %v1274_v43, %v836_v4 }
 0x37b   :  { %v5867_v47 = vadd.f32 %v5861_v21, %v1309_v60  ;;  %1217 = vmatmul.bf16.gmra.mxu0 %v5601_v38  ;;  %v5878_v60 = vpop.permute.xlu2 %1386  ;;  %v7667_v38 = vld [vmem:[#allocation69_spill] sm:$0xff] }
 0x37c   :  { %v841_v4 = vadd.f32 %v7667_v38, %v5495_v9 }
 0x37d   :  { %7665 = vst [vmem:[#allocation76_spill] sm:$0xff] %v5867_v47  ;;  %v7425_v61 = vmax.f32 %v5867_v47, 0.0 }
 0x37f   :  { %v1488_v13 = vpack.c.bf16 %v7425_v61, %v7420_v16 }
 0x380   :  { %v1277_v10 = vpop.f32.mrf.mxu1 }
 0x381   :  { %1595 = vmatmul.bf16.gmra.mxu3 %v1488_v13  ;;  %1693 = vmatmul.bf16.gmra.mxu1 %v1488_v13  ;;  %v1311_v6 = vadd.f32 %v1277_v10, %v839_v7 }
 0x383   :  { %v5883_v27 = vadd.f32 %v5878_v60, %v1311_v6  ;;  %v7674_v6 = vld [vmem:[#allocation46_spill] sm:$0xff] }
 0x385   :  { %7668 = vst [vmem:[#allocation56_spill] sm:$0xff] %v5883_v27  ;;  %v7427_v57 = vmax.f32 %v5883_v27, 0.0 }
 0x388   :  { %v1279_v43 = vpop.f32.mrf.mxu1 }
 0x389   :  { %v1313_v55 = vadd.f32 %v1279_v43, %v841_v4 }
 0x38b   :  { %v5888_v16 = vadd.f32 %v5885_v49, %v1313_v55  ;;  %1222 = vmatmul.bf16.gmra.mxu0 %v5613_v3  ;;  %v5901_v55 = vld [vmem:[#allocation5 + $0xc0] sm:$0xff] }
 0x38d   :  { %7669 = vst [vmem:[#allocation78_spill] sm:$0xff] %v5888_v16  ;;  %v7426_v10 = vmax.f32 %v5888_v16, 0.0 }
 0x38f   :  { %v1490_v9 = vpack.c.bf16 %v7426_v10, %v7427_v57 }
 0x391   :  { %1600 = vmatmul.bf16.gmra.mxu3 %v1490_v9  ;;  %1980 = vmatpush.bf16.msrb.mxu1 %v1490_v9 }
 0x392   :  { %1698 = vmatmul.bf16.gmra.mxu1 %v1490_v9  ;;  %v7676_v9 = vld [vmem:[#allocation48_spill] sm:$0xff] }
 0x395   :  { %1981 = vmatpush.bf16.msrb.mxu1 %v1488_v13 }
 0x399   :  { %1982 = vmatpush.bf16.msrb.mxu1 %v1486_v40 }
 0x39b   :  { %1227 = vmatmul.bf16.gmra.mxu0 %v5622_v48 }
 0x39d   :  { %1983 = vmatpush.bf16.msrb.mxu1 %v1484_v56 }
 0x3a1   :  { %1984 = vmatpush.bf16.msrb.mxu1 %v5806_v19  ;;  %v7672_v19 = vld [vmem:[#allocation45_spill] sm:$0xff] }
 0x3a5   :  { %1985 = vmatpush.bf16.msrb.mxu1 %v5772_v41 }
 0x3a8   :  { %v1193_v3 = vpop.f32.mrf.mxu0 }
 0x3a9   :  { %1986 = vmatpush.bf16.msrb.mxu1 %v5739_v35  ;;  %v1282_v7 = vadd.f32 %v1193_v3, %v7670_v23 }
 0x3ab   :  { %v5908_v48 = vadd.f32 %v5653_v52, %v1282_v7 }
 0x3ad   :  { %1987 = vmatpush.bf16.msrb.mxu1 %v5701_v63  ;;  %7671 = vst [vmem:[#allocation59_spill] sm:$0xff] %v5908_v48  ;;  %v7421_v41 = vmax.f32 %v5908_v48, 0.0  ;;  %v7690_v48 = vld [vmem:[#allocation57_spill] sm:$0xff] }
 0x3b0   :  { %1988 = vmatmul.bf16.vlgmr.msrb.gmra.mxu1 %v5901_v55  ;;  %v1195_v40 = vpop.f32.mrf.mxu0 }
 0x3b1   :  { %2176 = vmatpush.bf16.msra.mxu1 %v7623_v2  ;;  %v1284_v56 = vadd.f32 %v1195_v40, %v7672_v19 }
 0x3b3   :  { %v5913_v35 = vadd.f32 %v5678_v32, %v1284_v56  ;;  %v5927_v32 = vld [vmem:[#allocation5 + $0xc8] sm:$0xff] }
 0x3b4   :  { %v7678_v56 = vld [vmem:[#allocation12_spill] sm:$0xff] }
 0x3b5   :  { %2177 = vmatpush.bf16.msra.mxu1 %v7624_v24  ;;  %7673 = vst [vmem:[#allocation61_spill] sm:$0xff] %v5913_v35  ;;  %v7422_v63 = vmax.f32 %v5913_v35, 0.0 }
 0x3b7   :  { %v5922_v13 = vpack.c.bf16 %v7422_v63, %v7421_v41  ;;  %v7682_v41 = vld [vmem:[#allocation52_spill] sm:$0xff] }
 0x3b8   :  { %v1198_v52 = vpop.f32.mrf.mxu0 }
 0x3b9   :  { %2178 = vmatpush.bf16.msra.mxu1 %v7625_v18  ;;  %1516 = vmatmul.bf16.vlgmr.msra.gmra.mxu2 %v5922_v13  ;;  %v1286_v38 = vadd.f32 %v1198_v52, %v7674_v6  ;;  %v7679_v52 = vld [vmem:[#allocation50_spill] sm:$0xff] }
 0x3ba   :  { %1614 = vmatmul.bf16.vlgmr.msra.gmra.mxu0 %v5922_v13 }
 0x3bb   :  { %v5933_v43 = vadd.f32 %v5695_v44, %v1286_v38  ;;  %v5956_v38 = vpop.f32.mrf.mxu1 }
 0x3bd   :  { %2179 = vmatpush.bf16.msra.mxu1 %v7626_v36  ;;  %7675 = vst [vmem:[#allocation64_spill] sm:$0xff] %v5933_v43  ;;  %v7423_v7 = vmax.f32 %v5933_v43, 0.0 }
 0x3c0   :  { %1993 = vmatmul.bf16.gmra.mxu1 %v5927_v32  ;;  %v1200_v4 = vpop.f32.mrf.mxu0 }
 0x3c1   :  { %2180 = vmatpush.bf16.msra.mxu1 %v7627_v53  ;;  %v1288_v3 = vadd.f32 %v1200_v4, %v7676_v9  ;;  %v7680_v9 = vld [vmem:[#allocation14_spill] sm:$0xff] }
 0x3c3   :  { %v5938_v23 = vadd.f32 %v5714_v11, %v1288_v3  ;;  %v5952_v11 = vld [vmem:[#allocation5 + $0xd0] sm:$0xff] }
 0x3c5   :  { %2181 = vmatpush.bf16.msra.mxu1 %v7628_v39  ;;  %7677 = vst [vmem:[#allocation66_spill] sm:$0xff] %v5938_v23  ;;  %v7424_v40 = vmax.f32 %v5938_v23, 0.0 }
 0x3c7   :  { %v5947_v19 = vpack.c.bf16 %v7424_v40, %v7423_v7  ;;  %v7684_v40 = vld [vmem:[#allocation16_spill] sm:$0xff] }
 0x3c8   :  { %v1203_v44 = vpop.f32.mrf.mxu0 }
 0x3c9   :  { %2182 = vmatpush.bf16.msra.mxu1 %v7629_v20  ;;  %1521 = vmatmul.bf16.gmra.mxu2 %v5947_v19  ;;  %v1290_v6 = vadd.f32 %v1203_v44, %v7679_v52  ;;  %v7696_v20 = vld [vmem:[#allocation53_spill] sm:$0xff] }
 0x3ca   :  { %1619 = vmatmul.bf16.gmra.mxu0 %v5947_v19 }
 0x3cb   :  { %v5961_v3 = vadd.f32 %v5733_v15, %v1290_v6  ;;  %v7685_v15 = vld [vmem:[#allocation18_spill] sm:$0xff]  ;;  %v5977_v6 = vpop.f32.mrf.mxu1 }
 0x3cd   :  { %2183 = vmatpush.bf16.msra.mxu1 %v7630_v59  ;;  %7681 = vst [vmem:[#allocation69_spill] sm:$0xff] %v5961_v3  ;;  %v7428_v61 = vmax.f32 %v5961_v3, 0.0  ;;  %v7692_v3 = vld [vmem:[#allocation24_spill] sm:$0xff]  ;;  %v7695_v59 = vld [vmem:[#allocation62_spill] sm:$0xff] }
 0x3d0   :  { %1998 = vmatmul.bf16.gmra.mxu1 %v5952_v11  ;;  %v1205_v4 = vpop.f32.mrf.mxu0 }
 0x3d1   :  { %2743 = vmatpush.bf16.msrb.mxu1 %v7678_v56  ;;  %v1292_v63 = vadd.f32 %v1205_v4, %v7682_v41  ;;  %v7686_v41 = vld [vmem:[#allocation20_spill] sm:$0xff] }
 0x3d3   :  { %v5965_v7 = vadd.f32 %v5753_v45, %v1292_v63  ;;  %v5981_v45 = vld [vmem:[#allocation5 + $0xd8] sm:$0xff]  ;;  %v7687_v63 = vld [vmem:[#allocation55_spill] sm:$0xff]  ;;  %v5991_v43 = vpop.f32.mrf.mxu1 }
 0x3d5   :  { %2744 = vmatpush.bf16.msrb.mxu1 %v7680_v9  ;;  %7683 = vst [vmem:[#allocation44_spill] sm:$0xff] %v5965_v7  ;;  %v7429_v44 = vmax.f32 %v5965_v7, 0.0 }
 0x3d7   :  { %v5974_v52 = vpack.c.bf16 %v7429_v44, %v7428_v61  ;;  %v7688_v61 = vld [vmem:[#allocation22_spill] sm:$0xff] }
 0x3d8   :  { %v1208_v10 = vpop.f32.mrf.mxu0 }
 0x3d9   :  { %2745 = vmatpush.bf16.msrb.mxu1 %v7684_v40  ;;  %1526 = vmatmul.bf16.gmra.mxu2 %v5974_v52  ;;  %v1294_v4 = vadd.f32 %v1208_v10, %v7687_v63 }
 0x3da   :  { %1624 = vmatmul.bf16.gmra.mxu0 %v5974_v52 }
 0x3db   :  { %v5988_v44 = vadd.f32 %v5783_v34, %v1294_v4  ;;  %v7693_v4 = vld [vmem:[#allocation26_spill] sm:$0xff] }
 0x3dd   :  { %2746 = vmatpush.bf16.msrb.mxu1 %v7685_v15  ;;  %7689 = vst [vmem:[#allocation45_spill] sm:$0xff] %v5988_v44  ;;  %v7439_v7 = vmax.f32 %v5988_v44, 0.0  ;;  %v777_v44 = vadd.f32 %v7696_v20, %v7695_v59 }
 0x3e0   :  { %2003 = vmatmul.bf16.gmra.mxu1 %v5981_v45  ;;  %v1210_v57 = vpop.f32.mrf.mxu0 }
 0x3e1   :  { %2747 = vmatpush.bf16.msrb.mxu1 %v7686_v41  ;;  %v1296_v35 = vadd.f32 %v1210_v57, %v7690_v48  ;;  %v6010_v57 = vpop.f32.mrf.mxu1  ;;  %v7694_v48 = vld [vmem:[#allocation60_spill] sm:$0xff] }
 0x3e3   :  { %v5994_v23 = vadd.f32 %v5788_v12, %v1296_v35  ;;  %v6008_v12 = vld [vmem:[#allocation5 + $0xe0] sm:$0xff] }
 0x3e5   :  { %2748 = vmatpush.bf16.msrb.mxu1 %v7688_v61  ;;  %7691 = vst [vmem:[#allocation46_spill] sm:$0xff] %v5994_v23  ;;  %v7440_v10 = vmax.f32 %v5994_v23, 0.0 }
 0x3e7   :  { %v6003_v63 = vpack.c.bf16 %v7440_v10, %v7439_v7 }
 0x3e8   :  { %v1213_v34 = vpop.f32.mrf.mxu0 }
 0x3e9   :  { %2749 = vmatpush.bf16.msrb.mxu1 %v7692_v3  ;;  %1531 = vmatmul.bf16.gmra.mxu2 %v6003_v63  ;;  %v1298_v35 = vadd.f32 %v1213_v34, %v7694_v48  ;;  %v6024_v18 = vpop.f32.mrf.mxu1 }
 0x3ea   :  { %1629 = vmatmul.bf16.gmra.mxu0 %v6003_v63 }
 0x3eb   :  { %v6017_v10 = vadd.f32 %v5815_v17, %v1298_v35  ;;  %v6030_v17 = vld [vmem:[#allocation5 + $0xe8] sm:$0xff] }
 0x3ed   :  { %2750 = vmatpush.bf16.msrb.mxu1 %v7693_v4  ;;  %7697 = vst [vmem:[#allocation48_spill] sm:$0xff] %v6017_v10  ;;  %v7448_v53 = vmax.f32 %v6017_v10, 0.0 }
 0x3f0   :  { %2008 = vmatmul.bf16.gmra.mxu1 %v6008_v12  ;;  %v1215_v7 = vpop.f32.mrf.mxu0 }
 0x3f1   :  { %v1300_v23 = vadd.f32 %v1215_v7, %v777_v44  ;;  %v7699_v7 = vld [vmem:[#allocation65_spill] sm:$0xff]  ;;  %v6036_v35 = vpop.f32.mrf.mxu1 }
 0x3f3   :  { %v6020_v39 = vadd.f32 %v5819_v1, %v1300_v23  ;;  %v7700_v1 = vld [vmem:[#allocation67_spill] sm:$0xff]  ;;  %v7701_v23 = vld [vmem:[#allocation58_spill] sm:$0xff] }
 0x3f4   :  { %v782_v34 = vadd.f32 %v7701_v23, %v7700_v1 }
 0x3f5   :  { %7698 = vst [vmem:[#allocation50_spill] sm:$0xff] %v6020_v39  ;;  %v7449_v36 = vmax.f32 %v6020_v39, 0.0 }
 0x3f7   :  { %v1483_v20 = vpack.c.bf16 %v7449_v36, %v7448_v53 }
 0x3f8   :  { %v1218_v59 = vpop.f32.mrf.mxu0 }
 0x3f9   :  { %1536 = vmatmul.bf16.gmra.mxu2 %v1483_v20  ;;  %v1302_v44 = vadd.f32 %v1218_v59, %v7699_v7  ;;  %v6050_v1 = vpop.f32.mrf.mxu1 }
 0x3fa   :  { %1634 = vmatmul.bf16.gmra.mxu0 %v1483_v20 }
 0x3fb   :  { %v6039_v10 = vadd.f32 %v5836_v58, %v1302_v44  ;;  %v6052_v58 = vld [vmem:[#allocation5 + $0xf0] sm:$0xff]  ;;  %v7704_v44 = vld [vmem:[#allocation70_spill] sm:$0xff] }
 0x3fd   :  { %7702 = vst [vmem:[#allocation52_spill] sm:$0xff] %v6039_v10  ;;  %v7453_v36 = vmax.f32 %v6039_v10, 0.0 }
 0x400   :  { %2013 = vmatmul.bf16.gmra.mxu1 %v6030_v17  ;;  %v1220_v48 = vpop.f32.mrf.mxu0 }
 0x401   :  { %v1304_v39 = vadd.f32 %v1220_v48, %v782_v34 }
 0x403   :  { %v6042_v53 = vadd.f32 %v5840_v37, %v1304_v39  ;;  %v7705_v39 = vld [vmem:[#allocation71_spill] sm:$0xff] }
 0x404   :  { %v7706_v37 = vld [vmem:[#allocation63_spill] sm:$0xff] }
 0x405   :  { %7703 = vst [vmem:[#allocation55_spill] sm:$0xff] %v6042_v53  ;;  %v7454_v24 = vmax.f32 %v6042_v53, 0.0  ;;  %v787_v34 = vadd.f32 %v7706_v37, %v7705_v39  ;;  %v7711_v37 = vld [vmem:[#allocation68_spill] sm:$0xff] }
 0x407   :  { %v1485_v59 = vpack.c.bf16 %v7454_v24, %v7453_v36  ;;  %v6064_v24 = vpop.f32.mrf.mxu1 }
 0x408   :  { %v1223_v7 = vpop.f32.mrf.mxu0 }
 0x409   :  { %1541 = vmatmul.bf16.gmra.mxu2 %v1485_v59  ;;  %v1306_v23 = vadd.f32 %v1223_v7, %v7704_v44 }
 0x40a   :  { %1639 = vmatmul.bf16.gmra.mxu0 %v1485_v59 }
 0x40b   :  { %v6059_v10 = vadd.f32 %v5857_v0, %v1306_v23  ;;  %v6072_v0 = vld [vmem:[#allocation5 + $0xf8] sm:$0xff]  ;;  %v7709_v23 = vld [vmem:[#allocation72_spill] sm:$0xff] }
 0x40d   :  { %7707 = vst [vmem:[#allocation57_spill] sm:$0xff] %v6059_v10  ;;  %v7459_v2 = vmax.f32 %v6059_v10, 0.0 }
 0x410   :  { %2018 = vmatmul.bf16.gmra.mxu1 %v6052_v58  ;;  %v1225_v48 = vpop.f32.mrf.mxu0 }
 0x411   :  { %v1308_v53 = vadd.f32 %v1225_v48, %v787_v34  ;;  %v6079_v48 = vpop.f32.mrf.mxu1 }
 0x413   :  { %v6062_v36 = vadd.f32 %v5861_v21, %v1308_v53  ;;  %v6075_v53 = vpop.f32.mrf.mxu3  ;;  %v7710_v21 = vld [vmem:[#allocation77_spill] sm:$0xff] }
 0x414   :  { %v792_v34 = vadd.f32 %v7711_v37, %v7710_v21 }
 0x415   :  { %7708 = vst [vmem:[#allocation60_spill] sm:$0xff] %v6062_v36  ;;  %v7460_v8 = vmax.f32 %v6062_v36, 0.0 }
 0x417   :  { %v1487_v7 = vpack.c.bf16 %v7460_v8, %v7459_v2 }
 0x418   :  { %v1228_v44 = vpop.f32.mrf.mxu0 }
 0x419   :  { %1546 = vmatmul.bf16.gmra.mxu2 %v1487_v7  ;;  %v1310_v39 = vadd.f32 %v1228_v44, %v7709_v23  ;;  %v6096_v37 = vpop.f32.mrf.mxu1 }
 0x41a   :  { %1644 = vmatmul.bf16.gmra.mxu0 %v1487_v7 }
 0x41b   :  { %v6083_v36 = vadd.f32 %v5878_v60, %v1310_v39  ;;  %v6094_v21 = vpop.f32.mrf.mxu3 }
 0x41d   :  { %7712 = vst [vmem:[#allocation62_spill] sm:$0xff] %v6083_v36  ;;  %v7463_v31 = vmax.f32 %v6083_v36, 0.0 }
 0x420   :  { %2023 = vmatmul.bf16.gmra.mxu1 %v6072_v0  ;;  %v1230_v10 = vpop.f32.mrf.mxu0 }
 0x421   :  { %v1312_v2 = vadd.f32 %v1230_v10, %v792_v34 }
 0x423   :  { %v6086_v8 = vadd.f32 %v5885_v49, %v1312_v2  ;;  %v6098_v60 = vpop.f32.mrf.mxu3  ;;  %v6100_v2 = vpop.f32.mrf.mxu1 }
 0x425   :  { %7713 = vst [vmem:[#allocation53_spill] sm:$0xff] %v6086_v8  ;;  %v7462_v44 = vmax.f32 %v6086_v8, 0.0 }
 0x427   :  { %v1489_v23 = vpack.c.bf16 %v7462_v44, %v7463_v31 }
 0x429   :  { %1551 = vmatmul.bf16.gmra.mxu2 %v1489_v23  ;;  %1931 = vmatpush.bf16.msrb.mxu0 %v1489_v23 }
 0x42a   :  { %1649 = vmatmul.bf16.gmra.mxu0 %v1489_v23 }
 0x42b   :  { %v6103_v10 = vpop.f32.mrf.mxu3  ;;  %v6107_v34 = vpop.f32.mrf.mxu1 }
 0x42d   :  { %1932 = vmatpush.bf16.msrb.mxu0 %v1487_v7 }
 0x431   :  { %1933 = vmatpush.bf16.msrb.mxu0 %v1485_v59 }
 0x433   :  { %v6121_v8 = vpop.f32.mrf.mxu1 }
 0x435   :  { %1934 = vmatpush.bf16.msrb.mxu0 %v1483_v20  ;;  %v6118_v20 = vpop.f32.mrf.mxu3 }
 0x437   :  { %v1615_v49 = vpop.f32.mrf.mxu0 }
 0x438   :  { %v1665_v7 = vadd.f32 %v5956_v38, %v1615_v49 }
 0x439   :  { %1935 = vmatpush.bf16.msrb.mxu0 %v6003_v63 }
 0x43c   :  { %v6105_v39 = vpop.f32.mrf.mxu2 }
 0x43d   :  { %1936 = vmatpush.bf16.msrb.mxu0 %v5974_v52 }
 0x43f   :  { %v1617_v44 = vpop.f32.mrf.mxu0 }
 0x440   :  { %v1667_v23 = vadd.f32 %v5977_v6, %v1617_v44  ;;  %v6131_v44 = vpop.f32.mrf.mxu3 }
 0x441   :  { %1937 = vmatpush.bf16.msrb.mxu0 %v5947_v19 }
 0x442   :  { %v6112_v59 = vpack.c.bf16 %v1667_v23, %v1665_v7 }
 0x444   :  { %2184 = vmatmul.bf16.vlgmr.msra.gmra.mxu1 %v6112_v59  ;;  %v6116_v63 = vpop.f32.mrf.mxu2 }
 0x445   :  { %1938 = vmatpush.bf16.msrb.mxu0 %v5922_v13  ;;  %v6133_v13 = vpop.f32.mrf.mxu1 }
 0x447   :  { %v1620_v31 = vpop.f32.mrf.mxu0 }
 0x448   :  { %1939 = vmatmul.bf16.vlgmr.msrb.gmra.mxu0 %v5901_v55  ;;  %v1670_v52 = vadd.f32 %v5991_v43, %v1620_v31  ;;  %v6143_v31 = vpop.f32.mrf.mxu3 }
 0x449   :  { %2127 = vmatpush.bf16.msra.mxu0 %v7635_v26 }
 0x44c   :  { %v6126_v38 = vpop.f32.mrf.mxu2 }
 0x44d   :  { %2128 = vmatpush.bf16.msra.mxu0 %v7636_v33  ;;  %v6145_v43 = vpop.f32.mrf.mxu1  ;;  %v7718_v33 = vld [vmem:[#allocation17_spill] sm:$0xff] }
 0x44f   :  { %v1622_v19 = vpop.f32.mrf.mxu0 }
 0x450   :  { %v1672_v6 = vadd.f32 %v6010_v57, %v1622_v19 }
 0x451   :  { %2129 = vmatpush.bf16.msra.mxu0 %v7637_v25 }
 0x452   :  { %v6135_v49 = vpack.c.bf16 %v1672_v6, %v1670_v52 }
 0x454   :  { %2189 = vmatmul.bf16.gmra.mxu1 %v6135_v49  ;;  %v6139_v55 = vpop.f32.mrf.mxu2 }
 0x455   :  { %2130 = vmatpush.bf16.msra.mxu0 %v7638_v22  ;;  %v6162_v22 = vpop.f32.mrf.mxu1 }
 0x457   :  { %v1625_v7 = vpop.f32.mrf.mxu0 }
 0x458   :  { %1944 = vmatmul.bf16.gmra.mxu0 %v5927_v32  ;;  %v1675_v19 = vadd.f32 %v6024_v18, %v1625_v7  ;;  %v6157_v32 = vpop.f32.mrf.mxu3  ;;  %v7715_v18 = vld [vmem:[#allocation13_spill] sm:$0xff]  ;;  %v7716_v7 = vld [vmem:[#allocation15_spill] sm:$0xff] }
 0x459   :  { %2131 = vmatpush.bf16.msra.mxu0 %v7641_v50 }
 0x45c   :  { %v6148_v57 = vpop.f32.mrf.mxu2 }
 0x45d   :  { %2132 = vmatpush.bf16.msra.mxu0 %v7642_v42  ;;  %v7714_v42 = vld [vmem:[#allocation11_spill] sm:$0xff] }
 0x45f   :  { %v1627_v23 = vpop.f32.mrf.mxu0 }
 0x460   :  { %v1677_v52 = vadd.f32 %v6036_v35, %v1627_v23  ;;  %v6169_v23 = vpop.f32.mrf.mxu1 }
 0x461   :  { %2133 = vmatpush.bf16.msra.mxu0 %v7644_v46  ;;  %7717 = vst [vmem:[#allocation65_spill] sm:$0xff] %v6169_v23 }
 0x462   :  { %v6153_v6 = vpack.c.bf16 %v1677_v52, %v1675_v19  ;;  %v1586_v19 = vpop.f32.mrf.mxu3 }
 0x464   :  { %2194 = vmatmul.bf16.gmra.mxu1 %v6153_v6  ;;  %v6159_v50 = vpop.f32.mrf.mxu2 }
 0x465   :  { %2134 = vmatpush.bf16.msra.mxu0 %v7647_v29 }
 0x467   :  { %v1630_v25 = vpop.f32.mrf.mxu0 }
 0x468   :  { %1949 = vmatmul.bf16.gmra.mxu0 %v5952_v11  ;;  %v1680_v29 = vadd.f32 %v6050_v1, %v1630_v25  ;;  %v7719_v11 = vld [vmem:[#allocation19_spill] sm:$0xff]  ;;  %v6180_v30 = vpop.f32.mrf.mxu1 }
 0x469   :  { %2694 = vmatpush.bf16.msrb.mxu0 %v7714_v42  ;;  %7720 = vst [vmem:[#allocation67_spill] sm:$0xff] %v6180_v30  ;;  %v7722_v25 = vld [vmem:[#allocation23_spill] sm:$0xff] }
 0x46a   :  { %v6182_v23 = vpop.f32.mrf.mxu3 }
 0x46c   :  { %v6166_v35 = vpop.f32.mrf.mxu2 }
 0x46d   :  { %2695 = vmatpush.bf16.msrb.mxu0 %v7715_v18 }
 0x46f   :  { %v1632_v52 = vpop.f32.mrf.mxu0 }
 0x470   :  { %v1682_v46 = vadd.f32 %v6064_v24, %v1632_v52  ;;  %v6192_v5 = vpop.f32.mrf.mxu1 }
 0x471   :  { %2696 = vmatpush.bf16.msrb.mxu0 %v7716_v7  ;;  %7724 = vst [vmem:[#allocation58_spill] sm:$0xff] %v6192_v5 }
 0x472   :  { %v6174_v26 = vpack.c.bf16 %v1682_v46, %v1680_v29  ;;  %v1591_v14 = vpop.f32.mrf.mxu3 }
 0x474   :  { %2199 = vmatmul.bf16.gmra.mxu1 %v6174_v26  ;;  %v6177_v36 = vpop.f32.mrf.mxu2 }
 0x475   :  { %2697 = vmatpush.bf16.msrb.mxu0 %v7718_v33 }
 0x477   :  { %v1635_v62 = vpop.f32.mrf.mxu0 }
 0x478   :  { %1954 = vmatmul.bf16.gmra.mxu0 %v5981_v45  ;;  %v1685_v1 = vadd.f32 %v6079_v48, %v1635_v62 }
 0x479   :  { %2698 = vmatpush.bf16.msrb.mxu0 %v7719_v11 }
 0x47c   :  { %v1537_v24 = vpop.f32.mrf.mxu2 }
 0x47d   :  { %2699 = vmatpush.bf16.msrb.mxu0 %v7721_v54  ;;  %v6187_v46 = vadd.f32 %v1586_v19, %v1537_v24  ;;  %v6198_v19 = vpop.f32.mrf.mxu1  ;;  %v1593_v24 = vpop.f32.mrf.mxu3 }
 0x47e   :  { %7725 = vst [vmem:[#allocation70_spill] sm:$0xff] %v6198_v19 }
 0x47f   :  { %v1637_v29 = vpop.f32.mrf.mxu0 }
 0x480   :  { %v1687_v52 = vadd.f32 %v6096_v37, %v1637_v29 }
 0x481   :  { %2700 = vmatpush.bf16.msrb.mxu0 %v7722_v25 }
 0x482   :  { %v6194_v30 = vpack.c.bf16 %v1687_v52, %v1685_v1 }
 0x484   :  { %2204 = vmatmul.bf16.gmra.mxu1 %v6194_v30  ;;  %v1539_v45 = vpop.f32.mrf.mxu2 }
 0x485   :  { %2701 = vmatpush.bf16.msrb.mxu0 %v7723_v51  ;;  %v6205_v52 = vpop.f32.mrf.mxu1  ;;  %v1596_v5 = vpop.f32.mrf.mxu3 }
 0x486   :  { %7726 = vst [vmem:[#allocation71_spill] sm:$0xff] %v6205_v52 }
 0x487   :  { %v1640_v28 = vpop.f32.mrf.mxu0 }
 0x488   :  { %1959 = vmatmul.bf16.gmra.mxu0 %v6008_v12  ;;  %v1690_v48 = vadd.f32 %v6100_v2, %v1640_v28 }
 0x48c   :  { %v1542_v47 = vpop.f32.mrf.mxu2 }
 0x48d   :  { %v6208_v27 = vpop.f32.mrf.mxu1  ;;  %v1598_v2 = vpop.f32.mrf.mxu3 }
 0x48e   :  { %7727 = vst [vmem:[#allocation63_spill] sm:$0xff] %v6208_v27 }
 0x48f   :  { %v1642_v62 = vpop.f32.mrf.mxu0 }
 0x490   :  { %v1692_v37 = vadd.f32 %v6107_v34, %v1642_v62 }
 0x492   :  { %v6202_v29 = vpack.c.bf16 %v1692_v37, %v1690_v48 }
 0x494   :  { %2209 = vmatmul.bf16.gmra.mxu1 %v6202_v29  ;;  %v1544_v1 = vpop.f32.mrf.mxu2 }
 0x495   :  { %v6215_v37 = vpop.f32.mrf.mxu1 }
 0x496   :  { %7728 = vst [vmem:[#allocation72_spill] sm:$0xff] %v6215_v37 }
 0x497   :  { %v1645_v16 = vpop.f32.mrf.mxu0 }
 0x498   :  { %1964 = vmatmul.bf16.gmra.mxu0 %v6030_v17  ;;  %v1695_v51 = vadd.f32 %v6121_v8, %v1645_v16  ;;  %v1601_v17 = vpop.f32.mrf.mxu3 }
 0x49c   :  { %v1547_v12 = vpop.f32.mrf.mxu2 }
 0x49f   :  { %v1647_v19 = vpop.f32.mrf.mxu0 }
 0x4a0   :  { %v1697_v28 = vadd.f32 %v6133_v13, %v1647_v19  ;;  %v6222_v13 = vpop.f32.mrf.mxu1 }
 0x4a2   :  { %v6212_v34 = vpack.c.bf16 %v1697_v28, %v1695_v51  ;;  %v1603_v51 = vpop.f32.mrf.mxu3 }
 0x4a4   :  { %2214 = vmatmul.bf16.gmra.mxu1 %v6212_v34  ;;  %v1549_v62 = vpop.f32.mrf.mxu2 }
 0x4a7   :  { %v1650_v48 = vpop.f32.mrf.mxu0 }
 0x4a8   :  { %1969 = vmatmul.bf16.gmra.mxu0 %v6052_v58  ;;  %v1700_v27 = vadd.f32 %v6145_v43, %v1650_v48  ;;  %v1599_v58 = vadd.f32 %v1598_v2, %v1549_v62  ;;  %v1597_v43 = vadd.f32 %v1596_v5, %v1547_v12  ;;  %v1569_v5 = vadd.f32 %v6094_v21, %v6116_v63  ;;  %v4645_v12 = vld [vmem:[#allocation5 + $0x110] sm:$0xff]  ;;  %v7736_v62 = vld [vmem:[#allocation23_spill] sm:$0xff] }
 0x4a9   :  { %v1577_v63 = vadd.f32 %v6118_v20, %v6148_v57  ;;  %v7737_v48 = vld [vmem:[#allocation25_spill] sm:$0xff] }
 0x4ac   :  { %v1552_v52 = vpop.f32.mrf.mxu2 }
 0x4ad   :  { %v1602_v28 = vadd.f32 %v1601_v17, %v1552_v52  ;;  %v1589_v52 = vadd.f32 %v6182_v23, %v1539_v45 }
 0x4af   :  { %v1652_v25 = vpop.f32.mrf.mxu0 }
 0x4b0   :  { %v1702_v8 = vadd.f32 %v6162_v22, %v1652_v25  ;;  %v1594_v22 = vadd.f32 %v1593_v24, %v1544_v1  ;;  %v1592_v25 = vadd.f32 %v1591_v14, %v1542_v47  ;;  %v6245_v24 = vpack.c.bf16 %v1589_v52, %v6187_v46  ;;  %v7734_v46 = vld [vmem:[#allocation26_spill] sm:$0xff] }
 0x4b1   :  { %v1567_v14 = vadd.f32 %v6075_v53, %v6105_v39  ;;  %v1582_v47 = vadd.f32 %v6143_v31, %v6166_v35  ;;  %v1574_v53 = vadd.f32 %v6103_v10, %v6139_v55  ;;  %v4643_v31 = vld [vmem:[#allocation5 + $0x100] sm:$0xff]  ;;  %v4644_v55 = vld [vmem:[#allocation5 + $0x108] sm:$0xff] }
 0x4b2   :  { %v6220_v16 = vpack.c.bf16 %v1702_v8, %v1700_v27  ;;  %v6231_v27 = vpack.c.bf16 %v1599_v58, %v1597_v43  ;;  %v6236_v2 = vpack.c.bf16 %v1594_v22, %v1592_v25  ;;  %v4647_v22 = vld [vmem:[#allocation5 + $0x120] sm:$0xff] }
 0x4b3   :  { %v6255_v45 = vpack.c.bf16 %v1569_v5, %v1567_v14  ;;  %v4648_v14 = vld [vmem:[#allocation5 + $0x128] sm:$0xff] }
 0x4b4   :  { %1834 = vmatpush.bf16.msrb.mxu3 %v6220_v16  ;;  %2219 = vmatmul.bf16.gmra.mxu1 %v6220_v16  ;;  %v1554_v19 = vpop.f32.mrf.mxu2 }
 0x4b5   :  { %v1604_v37 = vadd.f32 %v1603_v51, %v1554_v19  ;;  %v4646_v51 = vld [vmem:[#allocation5 + $0x118] sm:$0xff] }
 0x4b7   :  { %v6226_v4 = vpack.c.bf16 %v1604_v37, %v1602_v28 }
 0x4b8   :  { %1835 = vmatpush.bf16.msrb.mxu3 %v6212_v34  ;;  %1974 = vmatmul.bf16.gmra.mxu0 %v6072_v0  ;;  %v1584_v0 = vadd.f32 %v6157_v32, %v6177_v36  ;;  %v1579_v36 = vadd.f32 %v6131_v44, %v6159_v50  ;;  %v1572_v50 = vadd.f32 %v6098_v60, %v6126_v38  ;;  %v6286_v60 = vpop.f32.mrf.mxu1 }
 0x4b9   :  { %1785 = vmatpush.bf16.msrb.mxu2 %v6226_v4 }
 0x4ba   :  { %v6259_v21 = vpack.c.bf16 %v1584_v0, %v1582_v47  ;;  %v6268_v39 = vpack.c.bf16 %v1579_v36, %v1577_v63  ;;  %v6276_v20 = vpack.c.bf16 %v1574_v53, %v1572_v50  ;;  %v4649_v53 = vld [vmem:[#allocation5 + $0x130] sm:$0xff] }
 0x4bc   :  { %1836 = vmatpush.bf16.msrb.mxu3 %v6202_v29 }
 0x4bd   :  { %1786 = vmatpush.bf16.msrb.mxu2 %v6231_v27 }
 0x4c0   :  { %1837 = vmatpush.bf16.msrb.mxu3 %v6194_v30  ;;  %v6296_v57 = vpop.f32.mrf.mxu1 }
 0x4c1   :  { %1787 = vmatpush.bf16.msrb.mxu2 %v6236_v2 }
 0x4c4   :  { %1838 = vmatpush.bf16.msrb.mxu3 %v6174_v26 }
 0x4c5   :  { %1788 = vmatpush.bf16.msrb.mxu2 %v6245_v24  ;;  %v6253_v23 = vpop.f32.mrf.mxu0 }
 0x4c6   :  { %7729 = vst [vmem:[#allocation77_spill] sm:$0xff] %v6253_v23 }
 0x4c8   :  { %1839 = vmatpush.bf16.msrb.mxu3 %v6153_v6  ;;  %2135 = vmatmul.bf16.vlgmr.msra.gmra.mxu0 %v6255_v45  ;;  %v6306_v35 = vpop.f32.mrf.mxu1 }
 0x4c9   :  { %1789 = vmatpush.bf16.msrb.mxu2 %v6259_v21 }
 0x4cc   :  { %1840 = vmatpush.bf16.msrb.mxu3 %v6135_v49 }
 0x4cd   :  { %1790 = vmatpush.bf16.msrb.mxu2 %v6268_v39  ;;  %v6274_v44 = vpop.f32.mrf.mxu0 }
 0x4ce   :  { %7730 = vst [vmem:[#allocation68_spill] sm:$0xff] %v6274_v44 }
 0x4d0   :  { %1841 = vmatpush.bf16.msrb.mxu3 %v6112_v59  ;;  %v6313_v37 = vpop.f32.mrf.mxu1 }
 0x4d1   :  { %1791 = vmatpush.bf16.msrb.mxu2 %v6276_v20  ;;  %7738 = vst [vmem:[#allocation88_spill] sm:$0xff] %v6313_v37 }
 0x4d3   :  { %1842 = vmatmul.bf16.vlgmr.msrb.gmra.mxu3 %v4643_v31 }
 0x4d4   :  { %2078 = vmatpush.bf16.msra.mxu3 %v7678_v56 }
 0x4d5   :  { %1792 = vmatpush.bf16.msrb.mxu2 %v6255_v45  ;;  %v6283_v10 = vpop.f32.mrf.mxu0 }
 0x4d6   :  { %7731 = vst [vmem:[#allocation84_spill] sm:$0xff] %v6283_v10 }
 0x4d8   :  { %2079 = vmatpush.bf16.msra.mxu3 %v7680_v9  ;;  %1793 = vmatmul.bf16.vlgmr.msrb.gmra.mxu2 %v4643_v31  ;;  %v6320_v19 = vpop.f32.mrf.mxu1 }
 0x4d9   :  { %2029 = vmatpush.bf16.msra.mxu2 %v7714_v42  ;;  %2140 = vmatmul.bf16.gmra.mxu0 %v6276_v20  ;;  %7741 = vst [vmem:[#allocation91_spill] sm:$0xff] %v6320_v19 }
 0x4dc   :  { %2080 = vmatpush.bf16.msra.mxu3 %v7684_v40 }
 0x4dd   :  { %2030 = vmatpush.bf16.msra.mxu2 %v7715_v18  ;;  %v6292_v38 = vpop.f32.mrf.mxu0 }
 0x4de   :  { %7732 = vst [vmem:[#allocation85_spill] sm:$0xff] %v6292_v38 }
 0x4e0   :  { %2081 = vmatpush.bf16.msra.mxu3 %v7685_v15  ;;  %v6325_v58 = vpop.f32.mrf.mxu1 }
 0x4e1   :  { %2031 = vmatpush.bf16.msra.mxu2 %v7716_v7  ;;  %7743 = vst [vmem:[#allocation93_spill] sm:$0xff] %v6325_v58 }
 0x4e3   :  { %1847 = vmatmul.bf16.gmra.mxu3 %v4644_v55 }
 0x4e4   :  { %2082 = vmatpush.bf16.msra.mxu3 %v7686_v41 }
 0x4e5   :  { %2032 = vmatpush.bf16.msra.mxu2 %v7718_v33  ;;  %v6300_v32 = vpop.f32.mrf.mxu0 }
 0x4e6   :  { %7733 = vst [vmem:[#allocation86_spill] sm:$0xff] %v6300_v32 }
 0x4e8   :  { %2083 = vmatpush.bf16.msra.mxu3 %v7688_v61  ;;  %1798 = vmatmul.bf16.gmra.mxu2 %v4644_v55  ;;  %v6329_v25 = vpop.f32.mrf.mxu1 }
 0x4e9   :  { %2033 = vmatpush.bf16.msra.mxu2 %v7719_v11  ;;  %2145 = vmatmul.bf16.gmra.mxu0 %v6268_v39  ;;  %7745 = vst [vmem:[#allocation95_spill] sm:$0xff] %v6329_v25 }
 0x4ec   :  { %2084 = vmatpush.bf16.msra.mxu3 %v7692_v3 }
 0x4ed   :  { %2034 = vmatpush.bf16.msra.mxu2 %v7721_v54  ;;  %v6309_v1 = vpop.f32.mrf.mxu0 }
 0x4ee   :  { %7735 = vst [vmem:[#allocation87_spill] sm:$0xff] %v6309_v1 }
 0x4f0   :  { %2085 = vmatpush.bf16.msra.mxu3 %v7734_v46  ;;  %v6334_v5 = vpop.f32.mrf.mxu1 }
 0x4f1   :  { %2035 = vmatpush.bf16.msra.mxu2 %v7736_v62  ;;  %7747 = vst [vmem:[#allocation97_spill] sm:$0xff] %v6334_v5 }
 0x4f3   :  { %1852 = vmatmul.bf16.gmra.mxu3 %v4645_v12 }
 0x4f5   :  { %2036 = vmatpush.bf16.msra.mxu2 %v7737_v48  ;;  %v6315_v17 = vpop.f32.mrf.mxu0 }
 0x4f6   :  { %7739 = vst [vmem:[#allocation89_spill] sm:$0xff] %v6315_v17 }
 0x4f8   :  { %1803 = vmatmul.bf16.gmra.mxu2 %v4645_v12  ;;  %v6340_v36 = vpop.f32.mrf.mxu1 }
 0x4f9   :  { %2150 = vmatmul.bf16.gmra.mxu0 %v6259_v21 }
 0x4fd   :  { %v6318_v8 = vpop.f32.mrf.mxu0 }
 0x4fe   :  { %7740 = vst [vmem:[#allocation90_spill] sm:$0xff] %v6318_v8 }
 0x500   :  { %v6345_v50 = vpop.f32.mrf.mxu1 }
 0x503   :  { %1857 = vmatmul.bf16.gmra.mxu3 %v4646_v51 }
 0x505   :  { %v6322_v28 = vpop.f32.mrf.mxu0 }
 0x506   :  { %7742 = vst [vmem:[#allocation92_spill] sm:$0xff] %v6322_v28 }
 0x508   :  { %1808 = vmatmul.bf16.gmra.mxu2 %v4646_v51  ;;  %v6350_v55 = vpop.f32.mrf.mxu1  ;;  %v4650_v51 = vld [vmem:[#allocation5 + $0x138] sm:$0xff] }
 0x509   :  { %2155 = vmatmul.bf16.gmra.mxu0 %v6245_v24 }
 0x50d   :  { %v6327_v43 = vpop.f32.mrf.mxu0 }
 0x50e   :  { %7744 = vst [vmem:[#allocation94_spill] sm:$0xff] %v6327_v43 }
 0x513   :  { %1862 = vmatmul.bf16.gmra.mxu3 %v4647_v22 }
 0x515   :  { %v6331_v52 = vpop.f32.mrf.mxu0 }
 0x516   :  { %7746 = vst [vmem:[#allocation96_spill] sm:$0xff] %v6331_v52 }
 0x518   :  { %1813 = vmatmul.bf16.gmra.mxu2 %v4647_v22  ;;  %v6354_v22 = vpop.f32.mrf.mxu1 }
 0x519   :  { %2160 = vmatmul.bf16.gmra.mxu0 %v6236_v2 }
 0x51d   :  { %v6336_v0 = vpop.f32.mrf.mxu0 }
 0x51e   :  { %7748 = vst [vmem:[#allocation98_spill] sm:$0xff] %v6336_v0 }
 0x520   :  { %v6360_v3 = vpop.f32.mrf.mxu1 }
 0x523   :  { %1867 = vmatmul.bf16.gmra.mxu3 %v4648_v14 }
 0x525   :  { %v6338_v47 = vpop.f32.mrf.mxu0 }
 0x526   :  { %7749 = vst [vmem:[#allocation99_spill] sm:$0xff] %v6338_v47 }
 0x528   :  { %1818 = vmatmul.bf16.gmra.mxu2 %v4648_v14  ;;  %v6368_v61 = vpop.f32.mrf.mxu1 }
 0x529   :  { %2165 = vmatmul.bf16.gmra.mxu0 %v6231_v27 }
 0x52d   :  { %v6343_v63 = vpop.f32.mrf.mxu0 }
 0x52e   :  { %7750 = vst [vmem:[#allocation100_spill] sm:$0xff] %v6343_v63 }
 0x530   :  { %v6379_v15 = vpop.f32.mrf.mxu1 }
 0x533   :  { %1872 = vmatmul.bf16.gmra.mxu3 %v4649_v53 }
 0x535   :  { %v6347_v31 = vpop.f32.mrf.mxu0 }
 0x536   :  { %7751 = vst [vmem:[#allocation101_spill] sm:$0xff] %v6347_v31 }
 0x538   :  { %1823 = vmatmul.bf16.gmra.mxu2 %v4649_v53  ;;  %v6390_v33 = vpop.f32.mrf.mxu1 }
 0x539   :  { %2170 = vmatmul.bf16.gmra.mxu0 %v6226_v4 }
 0x53d   :  { %v6352_v12 = vpop.f32.mrf.mxu0 }
 0x53e   :  { %7752 = vst [vmem:[#allocation102_spill] sm:$0xff] %v6352_v12 }
 0x540   :  { %v2205_v18 = vpop.f32.mrf.mxu1 }
 0x543   :  { %1877 = vmatmul.bf16.gmra.mxu3 %v4650_v51 }
 0x545   :  { %v6356_v14 = vpop.f32.mrf.mxu0 }
 0x548   :  { %1828 = vmatmul.bf16.gmra.mxu2 %v4650_v51  ;;  %v2207_v31 = vpop.f32.mrf.mxu1 }
 0x54d   :  { %v6358_v46 = vpop.f32.mrf.mxu0 }
 0x553   :  { %2086 = vmatmul.bf16.vlgmr.msra.gmra.mxu3 %v6112_v59 }
 0x556   :  { %v6363_v53 = vpop.f32.mrf.mxu3  ;;  %v6365_v48 = vpop.f32.mrf.mxu0 }
 0x558   :  { %2037 = vmatmul.bf16.vlgmr.msra.gmra.mxu2 %v6255_v45 }
 0x55b   :  { %v6370_v62 = vpop.f32.mrf.mxu2 }
 0x55c   :  { %7753 = vst [vmem:[#allocation103_spill] sm:$0xff] %v6370_v62 }
 0x55e   :  { %v6372_v41 = vpop.f32.mrf.mxu3  ;;  %v6374_v54 = vpop.f32.mrf.mxu0 }
 0x563   :  { %2091 = vmatmul.bf16.gmra.mxu3 %v6135_v49  ;;  %v6377_v51 = vpop.f32.mrf.mxu2 }
 0x564   :  { %7754 = vst [vmem:[#allocation104_spill] sm:$0xff] %v6377_v51 }
 0x566   :  { %v6381_v59 = vpop.f32.mrf.mxu3  ;;  %v6383_v11 = vpop.f32.mrf.mxu0 }
 0x568   :  { %2042 = vmatmul.bf16.gmra.mxu2 %v6276_v20 }
 0x56b   :  { %v6386_v45 = vpop.f32.mrf.mxu2 }
 0x56c   :  { %7755 = vst [vmem:[#allocation105_spill] sm:$0xff] %v6386_v45 }
 0x56e   :  { %v6388_v40 = vpop.f32.mrf.mxu3  ;;  %v6392_v9 = vpop.f32.mrf.mxu0 }
 0x573   :  { %2096 = vmatmul.bf16.gmra.mxu3 %v6153_v6  ;;  %v6395_v49 = vpop.f32.mrf.mxu2 }
 0x574   :  { %7756 = vst [vmem:[#allocation106_spill] sm:$0xff] %v6395_v49 }
 0x576   :  { %v6397_v7 = vpop.f32.mrf.mxu3  ;;  %v6399_v56 = vpop.f32.mrf.mxu0 }
 0x578   :  { %2047 = vmatmul.bf16.gmra.mxu2 %v6268_v39  ;;  %v2210_v39 = vpop.f32.mrf.mxu1 }
 0x57b   :  { %v6402_v20 = vpop.f32.mrf.mxu2 }
 0x57c   :  { %7757 = vst [vmem:[#allocation107_spill] sm:$0xff] %v6402_v20 }
 0x57e   :  { %v6404_v42 = vpop.f32.mrf.mxu3  ;;  %v6406_v12 = vpop.f32.mrf.mxu0 }
 0x580   :  { %v2212_v17 = vpop.f32.mrf.mxu1 }
 0x583   :  { %2101 = vmatmul.bf16.gmra.mxu3 %v6174_v26  ;;  %v6409_v63 = vpop.f32.mrf.mxu2 }
 0x584   :  { %7758 = vst [vmem:[#allocation108_spill] sm:$0xff] %v6409_v63 }
 0x586   :  { %v6411_v6 = vpop.f32.mrf.mxu3  ;;  %v2156_v47 = vpop.f32.mrf.mxu0 }
 0x587   :  { %v6413_v0 = vadd.f32 %v2205_v18, %v2156_v47 }
 0x588   :  { %2052 = vmatmul.bf16.gmra.mxu2 %v6259_v21 }
 0x58b   :  { %v6416_v52 = vpop.f32.mrf.mxu2 }
 0x58c   :  { %7759 = vst [vmem:[#allocation109_spill] sm:$0xff] %v6416_v52  ;;  %v2215_v52 = vpop.f32.mrf.mxu1 }
 0x58e   :  { %v6418_v43 = vpop.f32.mrf.mxu3  ;;  %v2158_v28 = vpop.f32.mrf.mxu0 }
 0x593   :  { %2106 = vmatmul.bf16.gmra.mxu3 %v6194_v30  ;;  %v6421_v8 = vpop.f32.mrf.mxu2 }
 0x594   :  { %7760 = vst [vmem:[#allocation110_spill] sm:$0xff] %v6421_v8  ;;  %v2217_v8 = vpop.f32.mrf.mxu1 }
 0x596   :  { %v6423_v26 = vpop.f32.mrf.mxu3  ;;  %v2161_v1 = vpop.f32.mrf.mxu0 }
 0x597   :  { %v2211_v58 = vadd.f32 %v2210_v39, %v2161_v1 }
 0x598   :  { %2057 = vmatmul.bf16.gmra.mxu2 %v6245_v24 }
 0x59b   :  { %v6426_v18 = vpop.f32.mrf.mxu2 }
 0x59c   :  { %7761 = vst [vmem:[#allocation111_spill] sm:$0xff] %v6426_v18  ;;  %v2220_v49 = vpop.f32.mrf.mxu1 }
 0x59e   :  { %v6428_v47 = vpop.f32.mrf.mxu3  ;;  %v2163_v21 = vpop.f32.mrf.mxu0 }
 0x5a3   :  { %2111 = vmatmul.bf16.gmra.mxu3 %v6202_v29  ;;  %v6431_v63 = vpop.f32.mrf.mxu2 }
 0x5a4   :  { %7762 = vst [vmem:[#allocation112_spill] sm:$0xff] %v6431_v63 }
 0x5a6   :  { %v6433_v32 = vpop.f32.mrf.mxu3  ;;  %v2166_v30 = vpop.f32.mrf.mxu0 }
 0x5a7   :  { %v2216_v23 = vadd.f32 %v2215_v52, %v2166_v30  ;;  %v7774_v52 = vld [vmem:[#allocation76_spill] sm:$0xff] }
 0x5a8   :  { %2062 = vmatmul.bf16.gmra.mxu2 %v6236_v2 }
 0x5a9   :  { %v2250_v19 = vmul.f32 2.0, %v2216_v23 }
 0x5ab   :  { %v6436_v20 = vpop.f32.mrf.mxu2 }
 0x5ac   :  { %7763 = vst [vmem:[#allocation113_spill] sm:$0xff] %v6436_v20  ;;  %v2222_v20 = vpop.f32.mrf.mxu1 }
 0x5ae   :  { %v6438_v38 = vpop.f32.mrf.mxu3  ;;  %v2168_v24 = vpop.f32.mrf.mxu0 }
 0x5af   :  { %7764 = vst [vmem:[#allocation114_spill] sm:$0xff] %v6438_v38  ;;  %v2218_v2 = vadd.f32 %v2217_v8, %v2168_v24 }
 0x5b1   :  { %v2252_v25 = vmul.f32 2.0, %v2218_v2 }
 0x5b3   :  { %2116 = vmatmul.bf16.gmra.mxu3 %v6212_v34  ;;  %v6441_v18 = vpop.f32.mrf.mxu2  ;;  %v2213_v34 = vadd.f32 %v2212_v17, %v2163_v21 }
 0x5b4   :  { %7765 = vst [vmem:[#allocation115_spill] sm:$0xff] %v6441_v18 }
 0x5b5   :  { %v2248_v37 = vmul.f32 2.0, %v2213_v34 }
 0x5b6   :  { %v6443_v10 = vpop.f32.mrf.mxu3  ;;  %v2171_v29 = vpop.f32.mrf.mxu0 }
 0x5b7   :  { %7766 = vst [vmem:[#allocation116_spill] sm:$0xff] %v6443_v10  ;;  %v2221_v63 = vadd.f32 %v2220_v49, %v2171_v29  ;;  %v7769_v10 = vld [vmem:[#allocation56_spill] sm:$0xff]  ;;  %v7771_v29 = vld [vmem:[#allocation78_spill] sm:$0xff] }
 0x5b8   :  { %2067 = vmatmul.bf16.gmra.mxu2 %v6231_v27  ;;  %v7770_v27 = vmax.f32 %v7769_v10, 0.0  ;;  %v2203_v10 = vadd.f32 %v6390_v33, %v6406_v12 }
 0x5b9   :  { %v2254_v62 = vmul.f32 2.0, %v2221_v63  ;;  %v7775_v63 = vmax.f32 %v7774_v52, 0.0 }
 0x5ba   :  { %v2240_v33 = vmul.f32 2.0, %v2203_v10 }
 0x5bb   :  { %v6446_v45 = vpop.f32.mrf.mxu2  ;;  %v2286_v49 = vsub.f32 %v2254_v62, %v7770_v27 }
 0x5bc   :  { %7767 = vst [vmem:[#allocation117_spill] sm:$0xff] %v6446_v45  ;;  %v7772_v45 = vmax.f32 %v7771_v29, 0.0  ;;  %v2193_v29 = vadd.f32 %v6354_v22, %v6374_v54  ;;  %v7794_v54 = vld [vmem:[#allocation83_spill] sm:$0xff] }
 0x5bd   :  { %v7795_v22 = vmax.f32 %v7794_v54, 0.0 }
 0x5be   :  { %v6448_v44 = vpop.f32.mrf.mxu3  ;;  %v2173_v51 = vpop.f32.mrf.mxu0 }
 0x5bf   :  { %7768 = vst [vmem:[#allocation118_spill] sm:$0xff] %v6448_v44  ;;  %v2223_v5 = vadd.f32 %v2222_v20, %v2173_v51  ;;  %v2208_v44 = vadd.f32 %v2207_v31, %v2158_v28  ;;  %v2284_v51 = vsub.f32 %v2252_v25, %v7775_v63  ;;  %v2201_v25 = vadd.f32 %v6379_v15, %v6399_v56 }
 0x5c0   :  { %v2196_v56 = vadd.f32 %v6360_v3, %v6383_v11 }
 0x5c1   :  { %v2256_v18 = vmul.f32 2.0, %v2223_v5  ;;  %v2246_v5 = vmul.f32 2.0, %v2211_v58  ;;  %v2244_v62 = vmul.f32 2.0, %v2208_v44  ;;  %v7781_v58 = vld [vmem:[#allocation51_spill] sm:$0xff]  ;;  %v7784_v44 = vld [vmem:[#allocation74_spill] sm:$0xff]  ;;  %v2238_v15 = vmul.f32 2.0, %v2201_v25 }
 0x5c2   :  { %v7782_v21 = vmax.f32 %v7781_v58, 0.0  ;;  %v7785_v12 = vmax.f32 %v7784_v44, 0.0 }
 0x5c3   :  { %2121 = vmatmul.bf16.gmra.mxu3 %v6220_v16  ;;  %v2288_v8 = vsub.f32 %v2256_v18, %v7772_v45  ;;  %v6455_v24 = vpop.f32.mrf.mxu2  ;;  %v7777_v16 = vld [vmem:[#allocation54_spill] sm:$0xff]  ;;  %v7779_v45 = vld [vmem:[#allocation75_spill] sm:$0xff]  ;;  %v2242_v18 = vmul.f32 2.0, %v6413_v0  ;;  %v7787_v0 = vld [vmem:[#allocation49_spill] sm:$0xff] }
 0x5c4   :  { %7773 = vst [vmem:[#allocation56_spill] sm:$0xff] %v6455_v24  ;;  %v7778_v1 = vmax.f32 %v7777_v16, 0.0  ;;  %v7780_v28 = vmax.f32 %v7779_v45, 0.0  ;;  %v2278_v30 = vsub.f32 %v2246_v5, %v7782_v21  ;;  %v2276_v2 = vsub.f32 %v2244_v62, %v7785_v12  ;;  %v7791_v5 = vld [vmem:[#allocation47_spill] sm:$0xff] }
 0x5c5   :  { %v2304_v17 = vpack.c.bf16 %v2288_v8, %v2286_v49  ;;  %v7788_v27 = vmax.f32 %v7787_v0, 0.0  ;;  %v7792_v16 = vmax.f32 %v7791_v5, 0.0 }
 0x5c6   :  { %v6459_v20 = vpop.f32.mrf.mxu3  ;;  %v2282_v23 = vsub.f32 %v2250_v19, %v7778_v1  ;;  %v2280_v31 = vsub.f32 %v2248_v37, %v7780_v28  ;;  %v2188_v1 = vadd.f32 %v6345_v50, %v6358_v46  ;;  %v2186_v28 = vadd.f32 %v6340_v36, %v6356_v14  ;;  %v7800_v50 = vld [vmem:[#allocation80_spill] sm:$0xff] }
 0x5c7   :  { %7776 = vst [vmem:[#allocation78_spill] sm:$0xff] %v6459_v20  ;;  %2419 = vmatpush.bf16.msrb.mxu3 %v2304_v17  ;;  %v2274_v49 = vsub.f32 %v2242_v18, %v7788_v27  ;;  %v2234_v17 = vmul.f32 2.0, %v2196_v56  ;;  %v2270_v3 = vsub.f32 %v2238_v15, %v7792_v16  ;;  %v7798_v18 = vld [vmem:[#allocation81_spill] sm:$0xff]  ;;  %v7809_v16 = vld [vmem:[#allocation34_spill] sm:$0xff] }
 0x5c8   :  { %2072 = vmatmul.bf16.gmra.mxu2 %v6226_v4  ;;  %v2302_v39 = vpack.c.bf16 %v2284_v51, %v2282_v23  ;;  %v2198_v4 = vadd.f32 %v6368_v61, %v6392_v9  ;;  %v2300_v34 = vpack.c.bf16 %v2280_v31, %v2278_v30  ;;  %v7789_v61 = vld [vmem:[#allocation73_spill] sm:$0xff]  ;;  %v2191_v51 = vadd.f32 %v6350_v55, %v6365_v48  ;;  %v7796_v55 = vld [vmem:[#allocation82_spill] sm:$0xff] }
 0x5c9   :  { %v7790_v9 = vmax.f32 %v7789_v61, 0.0  ;;  %v2298_v63 = vpack.c.bf16 %v2276_v2, %v2274_v49  ;;  %v2232_v23 = vmul.f32 2.0, %v2193_v29  ;;  %v7797_v31 = vmax.f32 %v7796_v55, 0.0  ;;  %v7802_v2 = vld [vmem:[#allocation79_spill] sm:$0xff]  ;;  %v7804_v15 = vld [vmem:[#allocation41_spill] sm:$0xff]  ;;  %v7806_v61 = vld [vmem:[#allocation28_spill] sm:$0xff] }
 0x5ca   :  { %v2236_v8 = vmul.f32 2.0, %v2198_v4  ;;  %v2230_v48 = vmul.f32 2.0, %v2191_v51  ;;  %v2228_v25 = vmul.f32 2.0, %v2188_v1  ;;  %v7799_v58 = vmax.f32 %v7798_v18, 0.0  ;;  %v6515_v29 = vld [vmem:[#allocation5 + $0x140] sm:$0xff]  ;;  %v6541_v55 = vld [vmem:[#allocation5 + $0x150] sm:$0xff] }
 0x5cb   :  { %2420 = vmatpush.bf16.msrb.mxu3 %v2302_v39  ;;  %v6473_v19 = vpop.f32.mrf.mxu2  ;;  %v2272_v52 = vsub.f32 %v2240_v33, %v7790_v9  ;;  %v2266_v39 = vsub.f32 %v2234_v17, %v7797_v31  ;;  %v2226_v46 = vmul.f32 2.0, %v2186_v28  ;;  %v7801_v4 = vmax.f32 %v7800_v50, 0.0  ;;  %v7808_v17 = vld [vmem:[#allocation32_spill] sm:$0xff] }
 0x5cc   :  { %7783 = vst [vmem:[#allocation76_spill] sm:$0xff] %v6473_v19  ;;  %v2268_v10 = vsub.f32 %v2236_v8, %v7795_v22  ;;  %v2264_v21 = vsub.f32 %v2232_v23, %v7799_v58  ;;  %v7803_v36 = vmax.f32 %v7802_v2, 0.0  ;;  %v7805_v0 = vmax.f32 %v7804_v15, 0.0  ;;  %v7810_v23 = vld [vmem:[#allocation36_spill] sm:$0xff]  ;;  %v7811_v22 = vld [vmem:[#allocation38_spill] sm:$0xff] }
 0x5cd   :  { %v2296_v45 = vpack.c.bf16 %v2272_v52, %v2270_v3  ;;  %v2262_v33 = vsub.f32 %v2230_v48, %v7801_v4  ;;  %v7807_v52 = vld [vmem:[#allocation30_spill] sm:$0xff]  ;;  %v6528_v3 = vld [vmem:[#allocation5 + $0x148] sm:$0xff]  ;;  %v7813_v48 = vld [vmem:[#allocation43_spill] sm:$0xff] }
 0x5ce   :  { %v6479_v37 = vpop.f32.mrf.mxu3  ;;  %v2294_v30 = vpack.c.bf16 %v2268_v10, %v2266_v39  ;;  %v2260_v14 = vsub.f32 %v2228_v25, %v7803_v36  ;;  %v2258_v27 = vsub.f32 %v2226_v46, %v7805_v0  ;;  %v6550_v15 = vld [vmem:[#allocation5 + $0x168] sm:$0xff] }
 0x5cf   :  { %7786 = vst [vmem:[#allocation54_spill] sm:$0xff] %v6479_v37  ;;  %2421 = vmatpush.bf16.msrb.mxu3 %v2300_v34  ;;  %v2292_v56 = vpack.c.bf16 %v2264_v21, %v2262_v33  ;;  %v6544_v21 = vld [vmem:[#allocation5 + $0x158] sm:$0xff] }
 0x5d0   :  { %v2290_v49 = vpack.c.bf16 %v2260_v14, %v2258_v27  ;;  %7814 = vst [vmem:[#allocation51_spill] sm:$0xff] %v6550_v15 }
 0x5d3   :  { %2422 = vmatpush.bf16.msrb.mxu3 %v2298_v63  ;;  %v6493_v11 = vpop.f32.mrf.mxu2 }
 0x5d4   :  { %7793 = vst [vmem:[#allocation75_spill] sm:$0xff] %v6493_v11 }
 0x5d6   :  { %v2087_v62 = vpop.f32.mrf.mxu3 }
 0x5d7   :  { %2423 = vmatpush.bf16.msrb.mxu3 %v2296_v45  ;;  %v7812_v45 = vld [vmem:[#allocation40_spill] sm:$0xff] }
 0x5db   :  { %2424 = vmatpush.bf16.msrb.mxu3 %v2294_v30  ;;  %v2038_v44 = vpop.f32.mrf.mxu2 }
 0x5dc   :  { %v6507_v12 = vadd.f32 %v2087_v62, %v2038_v44  ;;  %v6547_v44 = vld [vmem:[#allocation5 + $0x160] sm:$0xff] }
 0x5de   :  { %v6511_v34 = vpop.f32.mrf.mxu3 }
 0x5df   :  { %2425 = vmatpush.bf16.msrb.mxu3 %v2292_v56 }
 0x5e3   :  { %2426 = vmatpush.bf16.msrb.mxu3 %v2290_v49  ;;  %v6517_v8 = vpop.f32.mrf.mxu2 }
 0x5e6   :  { %v2092_v9 = vpop.f32.mrf.mxu3  ;;  %2427 = vmatmul.bf16.vlgmr.msrb.gmra.mxu3 %v6515_v29 }
 0x5e7   :  { %2841 = vmatpush.bf16.msra.mxu3 %v7806_v61  ;;  %v7816_v61 = vld [vmem:[#allocation62_spill] sm:$0xff] }
 0x5e8   :  { %v7817_v37 = vmax.f32 %v7816_v61, 0.0 }
 0x5eb   :  { %2842 = vmatpush.bf16.msra.mxu3 %v7807_v52  ;;  %v2043_v63 = vpop.f32.mrf.mxu2 }
 0x5ec   :  { %v6522_v51 = vadd.f32 %v2092_v9, %v2043_v63  ;;  %v6553_v63 = vld [vmem:[#allocation5 + $0x170] sm:$0xff] }
 0x5ed   :  { %7815 = vst [vmem:[#allocation74_spill] sm:$0xff] %v6553_v63 }
 0x5ee   :  { %v6525_v5 = vpop.f32.mrf.mxu3 }
 0x5ef   :  { %2843 = vmatpush.bf16.msra.mxu3 %v7808_v17 }
 0x5f3   :  { %2844 = vmatpush.bf16.msra.mxu3 %v7809_v16  ;;  %v6530_v1 = vpop.f32.mrf.mxu2 }
 0x5f6   :  { %v2097_v54 = vpop.f32.mrf.mxu3  ;;  %2432 = vmatmul.bf16.gmra.mxu3 %v6528_v3 }
 0x5f7   :  { %2845 = vmatpush.bf16.msra.mxu3 %v7810_v23 }
 0x5fb   :  { %2846 = vmatpush.bf16.msra.mxu3 %v7811_v22  ;;  %v2048_v10 = vpop.f32.mrf.mxu2 }
 0x5fc   :  { %v6535_v62 = vadd.f32 %v2097_v54, %v2048_v10 }
 0x5fe   :  { %v6538_v28 = vpop.f32.mrf.mxu3 }
 0x5ff   :  { %2847 = vmatpush.bf16.msra.mxu3 %v7812_v45 }
 0x603   :  { %2848 = vmatpush.bf16.msra.mxu3 %v7813_v48  ;;  %v2050_v31 = vpop.f32.mrf.mxu2 }
 0x606   :  { %v2102_v39 = vpop.f32.mrf.mxu3  ;;  %2437 = vmatmul.bf16.gmra.mxu3 %v6541_v55 }
 0x60b   :  { %v2053_v25 = vpop.f32.mrf.mxu2 }
 0x60c   :  { %v2103_v18 = vadd.f32 %v2102_v39, %v2053_v25 }
 0x60e   :  { %v2104_v58 = vpop.f32.mrf.mxu3 }
 0x613   :  { %v2055_v30 = vpop.f32.mrf.mxu2 }
 0x616   :  { %v2107_v46 = vpop.f32.mrf.mxu3  ;;  %2442 = vmatmul.bf16.gmra.mxu3 %v6544_v21 }
 0x61b   :  { %v2058_v50 = vpop.f32.mrf.mxu2 }
 0x61c   :  { %v2108_v4 = vadd.f32 %v2107_v46, %v2058_v50  ;;  %v6556_v50 = vld [vmem:[#allocation5 + $0x178] sm:$0xff] }
 0x61e   :  { %v2109_v33 = vpop.f32.mrf.mxu3 }
 0x623   :  { %v2060_v2 = vpop.f32.mrf.mxu2 }
 0x626   :  { %v2112_v36 = vpop.f32.mrf.mxu3  ;;  %2447 = vmatmul.bf16.gmra.mxu3 %v6547_v44 }
 0x62b   :  { %v2063_v14 = vpop.f32.mrf.mxu2 }
 0x62c   :  { %v2113_v17 = vadd.f32 %v2112_v36, %v2063_v14 }
 0x62e   :  { %v2114_v56 = vpop.f32.mrf.mxu3 }
 0x633   :  { %v2065_v0 = vpop.f32.mrf.mxu2 }
 0x634   :  { %v2115_v22 = vadd.f32 %v2114_v56, %v2065_v0  ;;  %v2105_v0 = vadd.f32 %v2104_v58, %v2055_v30 }
 0x636   :  { %v2117_v27 = vpop.f32.mrf.mxu3  ;;  %2452 = vmatmul.bf16.gmra.mxu3 %v6550_v15  ;;  %v7820_v15 = vld [vmem:[#allocation60_spill] sm:$0xff] }
 0x637   :  { %v7821_v38 = vmax.f32 %v7820_v15, 0.0  ;;  %v7830_v15 = vld [vmem:[#allocation48_spill] sm:$0xff] }
 0x638   :  { %v7831_v58 = vmax.f32 %v7830_v15, 0.0 }
 0x63b   :  { %v2068_v49 = vpop.f32.mrf.mxu2 }
 0x63c   :  { %v2118_v24 = vadd.f32 %v2117_v27, %v2068_v49 }
 0x63e   :  { %v2119_v9 = vpop.f32.mrf.mxu3  ;;  %v2249_v52 = vmul.f32 2.0, %v2118_v24  ;;  %v7824_v24 = vld [vmem:[#allocation55_spill] sm:$0xff] }
 0x63f   :  { %v7825_v14 = vmax.f32 %v7824_v24, 0.0  ;;  %v7839_v24 = vld [vmem:[#allocation69_spill] sm:$0xff] }
 0x643   :  { %v2070_v54 = vpop.f32.mrf.mxu2 }
 0x644   :  { %v2120_v46 = vadd.f32 %v2119_v9, %v2070_v54  ;;  %v2110_v54 = vadd.f32 %v2109_v33, %v2060_v2 }
 0x646   :  { %2457 = vmatmul.bf16.gmra.mxu3 %v6553_v63  ;;  %v2122_v10 = vpop.f32.mrf.mxu3  ;;  %v2251_v23 = vmul.f32 2.0, %v2120_v46  ;;  %v7818_v63 = vld [vmem:[#allocation53_spill] sm:$0xff]  ;;  %v2243_v36 = vmul.f32 2.0, %v2110_v54  ;;  %v7832_v46 = vld [vmem:[#allocation46_spill] sm:$0xff] }
 0x648   :  { %v2283_v27 = vsub.f32 %v2251_v23, %v7821_v38  ;;  %v2239_v38 = vmul.f32 2.0, %v2105_v0 }
 0x64b   :  { %v2073_v39 = vpop.f32.mrf.mxu2 }
 0x64c   :  { %v2123_v25 = vadd.f32 %v2122_v10, %v2073_v39  ;;  %v7819_v10 = vmax.f32 %v7818_v63, 0.0  ;;  %v2247_v39 = vmul.f32 2.0, %v2115_v22  ;;  %v7826_v63 = vld [vmem:[#allocation52_spill] sm:$0xff]  ;;  %v2100_v22 = vadd.f32 %v6538_v28, %v2050_v31  ;;  %v7834_v31 = vld [vmem:[#allocation45_spill] sm:$0xff] }
 0x64d   :  { %v2233_v28 = vmul.f32 2.0, %v6535_v62  ;;  %v7840_v62 = vmax.f32 %v7839_v24, 0.0 }
 0x64e   :  { %v2124_v11 = vpop.f32.mrf.mxu3  ;;  %v2253_v48 = vmul.f32 2.0, %v2123_v25  ;;  %v2279_v61 = vsub.f32 %v2247_v39, %v7825_v14  ;;  %v2095_v25 = vadd.f32 %v6525_v5, %v6530_v1  ;;  %v7835_v39 = vmax.f32 %v7834_v31, 0.0  ;;  %v7838_v1 = vld [vmem:[#allocation65_spill] sm:$0xff] }
 0x64f   :  { %v1990_v0 = vadd.f32 %v7838_v1, %v6363_v53  ;;  %v2265_v14 = vsub.f32 %v2233_v28, %v7840_v62  ;;  %v7854_v1 = vld [vmem:[#allocation31_spill] sm:$0xff] }
 0x650   :  { %v2285_v20 = vsub.f32 %v2253_v48, %v7817_v37  ;;  %v2241_v48 = vmul.f32 2.0, %v2108_v4  ;;  %v2235_v4 = vmul.f32 2.0, %v2100_v22  ;;  %v2225_v22 = vmul.f32 2.0, %v6507_v12 }
 0x652   :  { %v2273_v30 = vsub.f32 %v2241_v48, %v7831_v58 }
 0x653   :  { %v2075_v19 = vpop.f32.mrf.mxu2 }
 0x654   :  { %v2125_v45 = vadd.f32 %v2124_v11, %v2075_v19  ;;  %v2245_v19 = vmul.f32 2.0, %v2113_v17  ;;  %v7822_v11 = vld [vmem:[#allocation57_spill] sm:$0xff] }
 0x655   :  { %v7823_v56 = vmax.f32 %v7822_v11, 0.0  ;;  %v7836_v11 = vld [vmem:[#allocation44_spill] sm:$0xff] }
 0x656   :  { %v2255_v16 = vmul.f32 2.0, %v2125_v45  ;;  %2462 = vmatmul.bf16.gmra.mxu3 %v6556_v50 }
 0x657   :  { %v2281_v45 = vsub.f32 %v2249_v52, %v7823_v56  ;;  %v2237_v52 = vmul.f32 2.0, %v2103_v18  ;;  %v2090_v18 = vadd.f32 %v6511_v34, %v6517_v8  ;;  %v7837_v56 = vmax.f32 %v7836_v11, 0.0  ;;  %v7843_v8 = vld [vmem:[#allocation67_spill] sm:$0xff]  ;;  %v7853_v11 = vld [vmem:[#allocation70_spill] sm:$0xff] }
 0x658   :  { %v2287_v9 = vsub.f32 %v2255_v16, %v7819_v10  ;;  %v7827_v16 = vmax.f32 %v7826_v63, 0.0  ;;  %v7833_v10 = vmax.f32 %v7832_v46, 0.0 }
 0x659   :  { %v2301_v37 = vpack.c.bf16 %v2283_v27, %v2281_v45  ;;  %v2269_v27 = vsub.f32 %v2237_v52, %v7835_v39  ;;  %v2267_v45 = vsub.f32 %v2235_v4, %v7837_v56  ;;  %v7850_v39 = vld [vmem:[#allocation27_spill] sm:$0xff]  ;;  %v1997_v56 = vadd.f32 %v7853_v11, %v6388_v40 }
 0x65a   :  { %v2303_v49 = vpack.c.bf16 %v2287_v9, %v2285_v20  ;;  %v2277_v33 = vsub.f32 %v2245_v19, %v7827_v16  ;;  %v7828_v20 = vld [vmem:[#allocation50_spill] sm:$0xff]  ;;  %v2271_v9 = vsub.f32 %v2239_v38, %v7833_v10  ;;  %v2231_v19 = vmul.f32 2.0, %v2095_v25  ;;  %v7844_v38 = vld [vmem:[#allocation64_spill] sm:$0xff]  ;;  %v6606_v25 = vpop.permute.xlu2 %2507 }
 0x65b   :  { %v7829_v17 = vmax.f32 %v7828_v20, 0.0  ;;  %v2293_v34 = vpack.c.bf16 %v2267_v45, %v2265_v14  ;;  %v7845_v20 = vmax.f32 %v7844_v38, 0.0  ;;  %v6630_v45 = vpop.permute.xlu0 %2512 }
 0x65c   :  { %2370 = vmatpush.bf16.msrb.mxu2 %v2303_v49  ;;  %v2299_v2 = vpack.c.bf16 %v2279_v61, %v2277_v33  ;;  %v2295_v5 = vpack.c.bf16 %v2271_v9, %v2269_v27  ;;  %v2227_v61 = vmul.f32 2.0, %v2090_v18  ;;  %v1992_v33 = vadd.f32 %v7843_v8, %v6372_v41  ;;  %v7848_v41 = vld [vmem:[#allocation59_spill] sm:$0xff]  ;;  %v7851_v27 = vld [vmem:[#allocation58_spill] sm:$0xff]  ;;  %v7852_v18 = vld [vmem:[#allocation29_spill] sm:$0xff] }
 0x65d   :  { %v2275_v23 = vsub.f32 %v2243_v36, %v7829_v17  ;;  %v2229_v36 = vmul.f32 2.0, %v6522_v51  ;;  %v6599_v51 = vpop.permute.xlu1 %2502  ;;  %v7849_v4 = vmax.f32 %v7848_v41, 0.0  ;;  %v7859_v8 = vld [vmem:[#allocation63_spill] sm:$0xff] }
 0x65f   :  { %v2297_v54 = vpack.c.bf16 %v2275_v23, %v2273_v30  ;;  %v2261_v53 = vsub.f32 %v2229_v36, %v7845_v20  ;;  %v7846_v23 = vld [vmem:[#allocation61_spill] sm:$0xff]  ;;  %v2257_v12 = vsub.f32 %v2225_v22, %v7849_v4  ;;  %v7860_v20 = vld [vmem:[#allocation39_spill] sm:$0xff] }
 0x660   :  { %2371 = vmatpush.bf16.msrb.mxu2 %v2301_v37  ;;  %v7841_v37 = vld [vmem:[#allocation66_spill] sm:$0xff] }
 0x661   :  { %v7842_v48 = vmax.f32 %v7841_v37, 0.0  ;;  %v7856_v37 = vld [vmem:[#allocation35_spill] sm:$0xff] }
 0x662   :  { %v6659_v22 = vpop.permute.xlu2 %2522 }
 0x663   :  { %v2263_v63 = vsub.f32 %v2231_v19, %v7842_v48  ;;  %v7857_v48 = vld [vmem:[#allocation71_spill] sm:$0xff] }
 0x664   :  { %2372 = vmatpush.bf16.msrb.mxu2 %v2299_v2  ;;  %v7847_v2 = vmax.f32 %v7846_v23, 0.0  ;;  %v6665_v23 = vpop.permute.xlu0 %2527 }
 0x665   :  { %v2291_v30 = vpack.c.bf16 %v2263_v63, %v2261_v53  ;;  %v6636_v24 = vpop.permute.xlu1 %2517  ;;  %v2000_v63 = vadd.f32 %v7857_v48, %v6397_v7  ;;  %v7861_v7 = vld [vmem:[#allocation42_spill] sm:$0xff] }
 0x666   :  { %v2259_v52 = vsub.f32 %v2227_v61, %v7847_v2 }
 0x668   :  { %2373 = vmatpush.bf16.msrb.mxu2 %v2297_v54  ;;  %v2289_v54 = vpack.c.bf16 %v2259_v52, %v2257_v12  ;;  %v2007_v12 = vadd.f32 %v6222_v13, %v6418_v43 }
 0x669   :  { %v2428_v49 = vpop.f32.mrf.mxu3 }
 0x66a   :  { %v2469_v16 = vadd.f32 %v2428_v49, %v1990_v0  ;;  %v1995_v49 = vadd.f32 %v7851_v27, %v6381_v59  ;;  %v7855_v59 = vld [vmem:[#allocation33_spill] sm:$0xff] }
 0x66c   :  { %2374 = vmatpush.bf16.msrb.mxu2 %v2295_v5  ;;  %v6604_v15 = vadd.f32 %v6599_v51, %v2469_v16  ;;  %v7858_v16 = vld [vmem:[#allocation37_spill] sm:$0xff] }
 0x66e   :  { %v7518_v10 = vmax.f32 %v6604_v15, 0.0 }
 0x670   :  { %2375 = vmatpush.bf16.msrb.mxu2 %v2293_v34 }
 0x671   :  { %v2430_v17 = vpop.f32.mrf.mxu3 }
 0x672   :  { %v2471_v58 = vadd.f32 %v2430_v17, %v1992_v33  ;;  %v2002_v33 = vadd.f32 %v7859_v8, %v6404_v42 }
 0x674   :  { %v6611_v46 = vadd.f32 %v6606_v25, %v2471_v58  ;;  %2376 = vmatpush.bf16.msrb.mxu2 %v2291_v30  ;;  %v7862_v30 = vld [vmem:[#allocation72_spill] sm:$0xff] }
 0x675   :  { %v2005_v41 = vadd.f32 %v7862_v30, %v6411_v6 }
 0x676   :  { %v7517_v9 = vmax.f32 %v6611_v46, 0.0 }
 0x678   :  { %v6619_v28 = vpack.c.bf16 %v7517_v9, %v7518_v10  ;;  %2377 = vmatpush.bf16.msrb.mxu2 %v2289_v54  ;;  %v6686_v54 = vpop.permute.xlu1 %2532 }
 0x679   :  { %v2433_v31 = vpop.f32.mrf.mxu3 }
 0x67a   :  { %2751 = vmatmul.bf16.vlgmr.msrb.gmra.mxu1 %v6619_v28  ;;  %2849 = vmatmul.bf16.vlgmr.msra.gmra.mxu3 %v6619_v28  ;;  %v2473_v19 = vadd.f32 %v2433_v31, %v1995_v49 }
 0x67b   :  { %2378 = vmatmul.bf16.vlgmr.msrb.gmra.mxu2 %v6515_v29 }
 0x67c   :  { %2792 = vmatpush.bf16.msra.mxu2 %v7850_v39  ;;  %v6634_v0 = vadd.f32 %v6630_v45, %v2473_v19  ;;  %v6691_v19 = vpop.permute.xlu2 %2537 }
 0x67e   :  { %v7514_v62 = vmax.f32 %v6634_v0, 0.0 }
 0x680   :  { %2793 = vmatpush.bf16.msra.mxu2 %v7852_v18  ;;  %v6716_v8 = vpop.permute.xlu1 %2547 }
 0x681   :  { %v2435_v5 = vpop.f32.mrf.mxu3 }
 0x682   :  { %v2475_v36 = vadd.f32 %v2435_v5, %v1997_v56  ;;  %v2010_v56 = vadd.f32 %v6286_v60, %v6423_v26 }
 0x684   :  { %2794 = vmatpush.bf16.msra.mxu2 %v7854_v1  ;;  %v6639_v29 = vadd.f32 %v6636_v24, %v2475_v36  ;;  %v2012_v36 = vadd.f32 %v6296_v57, %v6428_v47  ;;  %v2015_v47 = vadd.f32 %v6306_v35, %v6433_v32 }
 0x686   :  { %v7513_v40 = vmax.f32 %v6639_v29, 0.0 }
 0x688   :  { %2795 = vmatpush.bf16.msra.mxu2 %v7855_v59  ;;  %v6648_v14 = vpack.c.bf16 %v7513_v40, %v7514_v62  ;;  %v7897_v40 = vld [vmem:[#allocation36_spill] sm:$0xff] }
 0x689   :  { %v2438_v61 = vpop.f32.mrf.mxu3 }
 0x68a   :  { %2756 = vmatmul.bf16.gmra.mxu1 %v6648_v14  ;;  %2854 = vmatmul.bf16.gmra.mxu3 %v6648_v14  ;;  %v2477_v34 = vadd.f32 %v2438_v61, %v2000_v63  ;;  %v6711_v61 = vpop.permute.xlu0 %2542 }
 0x68b   :  { %2383 = vmatmul.bf16.gmra.mxu2 %v6528_v3 }
 0x68c   :  { %2796 = vmatpush.bf16.msra.mxu2 %v7856_v37  ;;  %v6663_v53 = vadd.f32 %v6659_v22, %v2477_v34 }
 0x68e   :  { %v7512_v2 = vmax.f32 %v6663_v53, 0.0 }
 0x690   :  { %2797 = vmatpush.bf16.msra.mxu2 %v7858_v16 }
 0x691   :  { %v2440_v38 = vpop.f32.mrf.mxu3 }
 0x692   :  { %v2479_v17 = vadd.f32 %v2440_v38, %v2002_v33 }
 0x694   :  { %2798 = vmatpush.bf16.msra.mxu2 %v7860_v20  ;;  %v6668_v3 = vadd.f32 %v6665_v23, %v2479_v17  ;;  %v7865_v17 = vld [vmem:[#allocation114_spill] sm:$0xff] }
 0x696   :  { %v7505_v42 = vmax.f32 %v6668_v3, 0.0 }
 0x698   :  { %2799 = vmatpush.bf16.msra.mxu2 %v7861_v7  ;;  %v6677_v52 = vpack.c.bf16 %v7505_v42, %v7512_v2 }
 0x699   :  { %v2443_v58 = vpop.f32.mrf.mxu3 }
 0x69a   :  { %2761 = vmatmul.bf16.gmra.mxu1 %v6677_v52  ;;  %2859 = vmatmul.bf16.gmra.mxu3 %v6677_v52  ;;  %v2481_v4 = vadd.f32 %v2443_v58, %v2005_v41  ;;  %v7866_v58 = vld [vmem:[#allocation88_spill] sm:$0xff]  ;;  %v6732_v41 = vpop.permute.xlu2 %2552 }
 0x69b   :  { %2388 = vmatmul.bf16.gmra.mxu2 %v6541_v55  ;;  %v2017_v30 = vadd.f32 %v7866_v58, %v7865_v17  ;;  %v6753_v58 = vpop.permute.xlu1 %2562 }
 0x69c   :  { %v6689_v27 = vadd.f32 %v6686_v54, %v2481_v4 }
 0x69e   :  { %v7504_v55 = vmax.f32 %v6689_v27, 0.0 }
 0x6a1   :  { %v2445_v31 = vpop.f32.mrf.mxu3 }
 0x6a2   :  { %v2483_v49 = vadd.f32 %v2445_v31, %v2007_v12 }
 0x6a4   :  { %v6694_v11 = vadd.f32 %v6691_v19, %v2483_v49  ;;  %v6737_v49 = vpop.permute.xlu0 %2557 }
 0x6a6   :  { %v7503_v6 = vmax.f32 %v6694_v11, 0.0 }
 0x6a8   :  { %v6702_v13 = vpack.c.bf16 %v7503_v6, %v7504_v55 }
 0x6a9   :  { %v2448_v43 = vpop.f32.mrf.mxu3 }
 0x6aa   :  { %2766 = vmatmul.bf16.gmra.mxu1 %v6702_v13  ;;  %2864 = vmatmul.bf16.gmra.mxu3 %v6702_v13  ;;  %v2485_v5 = vadd.f32 %v2448_v43, %v2010_v56 }
 0x6ab   :  { %2393 = vmatmul.bf16.gmra.mxu2 %v6544_v21 }
 0x6ac   :  { %v6714_v63 = vadd.f32 %v6711_v61, %v2485_v5  ;;  %v7869_v5 = vld [vmem:[#allocation51_spill] sm:$0xff] }
 0x6ae   :  { %7863 = vst [vmem:[#allocation49_spill] sm:$0xff] %v6714_v63  ;;  %v7499_v21 = vmax.f32 %v6714_v63, 0.0  ;;  %v6940_v63 = vld [vmem:[#allocation5 + $0x1a8] sm:$0xff] }
 0x6b1   :  { %v2450_v48 = vpop.f32.mrf.mxu3 }
 0x6b2   :  { %v2487_v34 = vadd.f32 %v2450_v48, %v2012_v36  ;;  %v7870_v36 = vld [vmem:[#allocation116_spill] sm:$0xff]  ;;  %v7871_v48 = vld [vmem:[#allocation91_spill] sm:$0xff] }
 0x6b4   :  { %v6719_v33 = vadd.f32 %v6716_v8, %v2487_v34  ;;  %v2020_v34 = vadd.f32 %v7871_v48, %v7870_v36 }
 0x6b6   :  { %7864 = vst [vmem:[#allocation73_spill] sm:$0xff] %v6719_v33  ;;  %v7500_v60 = vmax.f32 %v6719_v33, 0.0  ;;  %v6961_v33 = vld [vmem:[#allocation5 + $0x1b0] sm:$0xff] }
 0x6b8   :  { %v2670_v57 = vpack.c.bf16 %v7500_v60, %v7499_v21  ;;  %v6758_v21 = vpop.permute.xlu2 %2567 }
 0x6b9   :  { %v2453_v26 = vpop.f32.mrf.mxu3 }
 0x6ba   :  { %2771 = vmatmul.bf16.gmra.mxu1 %v2670_v57  ;;  %2869 = vmatmul.bf16.gmra.mxu3 %v2670_v57  ;;  %v2489_v38 = vadd.f32 %v2453_v26, %v2015_v47  ;;  %v7872_v47 = vld [vmem:[#allocation118_spill] sm:$0xff] }
 0x6bb   :  { %2398 = vmatmul.bf16.gmra.mxu2 %v6547_v44 }
 0x6bc   :  { %v6735_v12 = vadd.f32 %v6732_v41, %v2489_v38  ;;  %v7873_v38 = vld [vmem:[#allocation93_spill] sm:$0xff] }
 0x6bd   :  { %v2022_v17 = vadd.f32 %v7873_v38, %v7872_v47  ;;  %v7878_v47 = vld [vmem:[#allocation95_spill] sm:$0xff] }
 0x6be   :  { %7867 = vst [vmem:[#allocation47_spill] sm:$0xff] %v6735_v12  ;;  %v7501_v44 = vmax.f32 %v6735_v12, 0.0 }
 0x6c1   :  { %v2455_v4 = vpop.f32.mrf.mxu3 }
 0x6c2   :  { %v2491_v31 = vadd.f32 %v2455_v4, %v2017_v30 }
 0x6c4   :  { %v6740_v43 = vadd.f32 %v6737_v49, %v2491_v31 }
 0x6c6   :  { %7868 = vst [vmem:[#allocation83_spill] sm:$0xff] %v6740_v43  ;;  %v7502_v32 = vmax.f32 %v6740_v43, 0.0 }
 0x6c8   :  { %v2672_v35 = vpack.c.bf16 %v7502_v32, %v7501_v44  ;;  %v6774_v32 = vpop.permute.xlu0 %2572 }
 0x6c9   :  { %v2458_v56 = vpop.f32.mrf.mxu3 }
 0x6ca   :  { %2776 = vmatmul.bf16.gmra.mxu1 %v2672_v35  ;;  %2874 = vmatmul.bf16.gmra.mxu3 %v2672_v35  ;;  %v2493_v26 = vadd.f32 %v2458_v56, %v2020_v34  ;;  %v7876_v34 = vld [vmem:[#allocation74_spill] sm:$0xff] }
 0x6cb   :  { %2403 = vmatmul.bf16.gmra.mxu2 %v7869_v5 }
 0x6cc   :  { %v6756_v4 = vadd.f32 %v6753_v58, %v2493_v26  ;;  %v7877_v26 = vld [vmem:[#allocation78_spill] sm:$0xff] }
 0x6cd   :  { %v2025_v38 = vadd.f32 %v7878_v47, %v7877_v26  ;;  %v7883_v47 = vld [vmem:[#allocation77_spill] sm:$0xff] }
 0x6ce   :  { %7874 = vst [vmem:[#allocation82_spill] sm:$0xff] %v6756_v4  ;;  %v7506_v5 = vmax.f32 %v6756_v4, 0.0  ;;  %v6986_v4 = vld [vmem:[#allocation5 + $0x1b8] sm:$0xff] }
 0x6d1   :  { %v2460_v30 = vpop.f32.mrf.mxu3 }
 0x6d2   :  { %v2495_v31 = vadd.f32 %v2460_v30, %v2022_v17  ;;  %v7879_v30 = vld [vmem:[#allocation54_spill] sm:$0xff] }
 0x6d4   :  { %v6761_v60 = vadd.f32 %v6758_v21, %v2495_v31  ;;  %v7880_v31 = vld [vmem:[#allocation97_spill] sm:$0xff] }
 0x6d5   :  { %v2027_v44 = vadd.f32 %v7880_v31, %v7879_v30  ;;  %v7884_v30 = vld [vmem:[#allocation104_spill] sm:$0xff] }
 0x6d6   :  { %7875 = vst [vmem:[#allocation81_spill] sm:$0xff] %v6761_v60  ;;  %v7507_v36 = vmax.f32 %v6761_v60, 0.0  ;;  %v7885_v31 = vld [vmem:[#allocation68_spill] sm:$0xff] }
 0x6d8   :  { %v2674_v56 = vpack.c.bf16 %v7507_v36, %v7506_v5  ;;  %v6779_v5 = vpop.permute.xlu1 %2577 }
 0x6d9   :  { %v2463_v48 = vpop.f32.mrf.mxu3 }
 0x6da   :  { %2781 = vmatmul.bf16.gmra.mxu1 %v2674_v56  ;;  %2879 = vmatmul.bf16.gmra.mxu3 %v2674_v56  ;;  %v2497_v17 = vadd.f32 %v2463_v48, %v2025_v38 }
 0x6db   :  { %2408 = vmatmul.bf16.gmra.mxu2 %v7876_v34 }
 0x6dc   :  { %v6777_v55 = vadd.f32 %v6774_v32, %v2497_v17 }
 0x6de   :  { %v7511_v34 = vmax.f32 %v6777_v55, 0.0 }
 0x6e1   :  { %v2465_v6 = vpop.f32.mrf.mxu3 }
 0x6e2   :  { %v2499_v42 = vadd.f32 %v2465_v6, %v2027_v44  ;;  %v7882_v44 = vld [vmem:[#allocation103_spill] sm:$0xff] }
 0x6e3   :  { %v1941_v38 = vadd.f32 %v7883_v47, %v7882_v44  ;;  %v7889_v47 = vld [vmem:[#allocation30_spill] sm:$0xff] }
 0x6e4   :  { %v6782_v36 = vadd.f32 %v6779_v5, %v2499_v42 }
 0x6e6   :  { %7881 = vst [vmem:[#allocation80_spill] sm:$0xff] %v6782_v36  ;;  %v7510_v26 = vmax.f32 %v6782_v36, 0.0 }
 0x6e8   :  { %v2676_v48 = vpack.c.bf16 %v7510_v26, %v7511_v34  ;;  %v6834_v26 = vld [vmem:[#allocation5 + $0x188] sm:$0xff] }
 0x6ea   :  { %2786 = vmatmul.bf16.gmra.mxu1 %v2676_v48  ;;  %2884 = vmatmul.bf16.gmra.mxu3 %v2676_v48 }
 0x6eb   :  { %3166 = vmatpush.bf16.msrb.mxu3 %v2676_v48  ;;  %2413 = vmatmul.bf16.gmra.mxu2 %v6556_v50  ;;  %v1943_v48 = vadd.f32 %v7885_v31, %v7884_v30  ;;  %v7892_v30 = vld [vmem:[#allocation84_spill] sm:$0xff] }
 0x6ef   :  { %3167 = vmatpush.bf16.msrb.mxu3 %v2674_v56  ;;  %v7887_v56 = vld [vmem:[#allocation28_spill] sm:$0xff] }
 0x6f3   :  { %3168 = vmatpush.bf16.msrb.mxu3 %v2672_v35 }
 0x6f7   :  { %3169 = vmatpush.bf16.msrb.mxu3 %v2670_v57  ;;  %v6802_v57 = vld [vmem:[#allocation5 + $0x180] sm:$0xff] }
 0x6fb   :  { %3170 = vmatpush.bf16.msrb.mxu3 %v6702_v13 }
 0x6fd   :  { %v6792_v42 = vpop.f32.mrf.mxu3 }
 0x6fe   :  { %v2379_v6 = vpop.f32.mrf.mxu2 }
 0x6ff   :  { %3171 = vmatpush.bf16.msrb.mxu3 %v6677_v52  ;;  %v2468_v17 = vadd.f32 %v2379_v6, %v1941_v38 }
 0x701   :  { %v6805_v13 = vadd.f32 %v6599_v51, %v2468_v17  ;;  %v7891_v17 = vld [vmem:[#allocation105_spill] sm:$0xff] }
 0x702   :  { %v1946_v31 = vadd.f32 %v7892_v30, %v7891_v17  ;;  %v7899_v30 = vld [vmem:[#allocation38_spill] sm:$0xff] }
 0x703   :  { %3172 = vmatpush.bf16.msrb.mxu3 %v6648_v14  ;;  %7886 = vst [vmem:[#allocation79_spill] sm:$0xff] %v6805_v13  ;;  %v7508_v14 = vmax.f32 %v6805_v13, 0.0 }
 0x705   :  { %v6800_v50 = vpop.f32.mrf.mxu3 }
 0x706   :  { %v2381_v35 = vpop.f32.mrf.mxu2 }
 0x707   :  { %3173 = vmatpush.bf16.msrb.mxu3 %v6619_v28  ;;  %v2470_v52 = vadd.f32 %v2381_v35, %v1943_v48  ;;  %v7893_v35 = vld [vmem:[#allocation34_spill] sm:$0xff] }
 0x709   :  { %v6810_v6 = vadd.f32 %v6606_v25, %v2470_v52  ;;  %v7890_v25 = vld [vmem:[#allocation32_spill] sm:$0xff]  ;;  %v7894_v52 = vld [vmem:[#allocation106_spill] sm:$0xff] }
 0x70a   :  { %3174 = vmatmul.bf16.vlgmr.msrb.gmra.mxu3 %v6802_v57 }
 0x70b   :  { %3362 = vmatpush.bf16.msra.mxu3 %v7887_v56  ;;  %7888 = vst [vmem:[#allocation41_spill] sm:$0xff] %v6810_v6  ;;  %v7509_v44 = vmax.f32 %v6810_v6, 0.0  ;;  %v7895_v56 = vld [vmem:[#allocation85_spill] sm:$0xff]  ;;  %v6892_v6 = vld [vmem:[#allocation5 + $0x198] sm:$0xff] }
 0x70d   :  { %v6820_v51 = vpack.c.bf16 %v7509_v44, %v7508_v14  ;;  %v6822_v28 = vpop.f32.mrf.mxu3 }
 0x70e   :  { %v2384_v38 = vpop.f32.mrf.mxu2 }
 0x70f   :  { %3363 = vmatpush.bf16.msra.mxu3 %v7889_v47  ;;  %2702 = vmatmul.bf16.vlgmr.msrb.gmra.mxu0 %v6820_v51  ;;  %v2472_v48 = vadd.f32 %v2384_v38, %v1946_v31  ;;  %v1948_v47 = vadd.f32 %v7895_v56, %v7894_v52  ;;  %v7903_v52 = vld [vmem:[#allocation43_spill] sm:$0xff]  ;;  %v7904_v56 = vld [vmem:[#allocation108_spill] sm:$0xff] }
 0x710   :  { %2800 = vmatmul.bf16.vlgmr.msra.gmra.mxu2 %v6820_v51 }
 0x711   :  { %v6837_v34 = vadd.f32 %v6630_v45, %v2472_v48 }
 0x713   :  { %3364 = vmatpush.bf16.msra.mxu3 %v7890_v25  ;;  %7896 = vst [vmem:[#allocation62_spill] sm:$0xff] %v6837_v34  ;;  %v7515_v38 = vmax.f32 %v6837_v34, 0.0 }
 0x715   :  { %v6832_v14 = vpop.f32.mrf.mxu3 }
 0x716   :  { %v2386_v44 = vpop.f32.mrf.mxu2 }
 0x717   :  { %3365 = vmatpush.bf16.msra.mxu3 %v7893_v35  ;;  %v2474_v2 = vadd.f32 %v2386_v44, %v1948_v47  ;;  %v7902_v44 = vld [vmem:[#allocation86_spill] sm:$0xff]  ;;  %v7905_v47 = vld [vmem:[#allocation87_spill] sm:$0xff] }
 0x719   :  { %v6841_v25 = vadd.f32 %v6636_v24, %v2474_v2  ;;  %v7900_v24 = vld [vmem:[#allocation40_spill] sm:$0xff]  ;;  %v7901_v2 = vld [vmem:[#allocation107_spill] sm:$0xff] }
 0x71a   :  { %3179 = vmatmul.bf16.gmra.mxu3 %v6834_v26  ;;  %v1951_v48 = vadd.f32 %v7902_v44, %v7901_v2 }
 0x71b   :  { %3366 = vmatpush.bf16.msra.mxu3 %v7897_v40  ;;  %7898 = vst [vmem:[#allocation53_spill] sm:$0xff] %v6841_v25  ;;  %v7516_v17 = vmax.f32 %v6841_v25, 0.0 }
 0x71d   :  { %v6847_v31 = vpop.f32.mrf.mxu3  ;;  %v6853_v45 = vpack.c.bf16 %v7516_v17, %v7515_v38  ;;  %v6865_v17 = vld [vmem:[#allocation5 + $0x190] sm:$0xff] }
 0x71e   :  { %v2389_v40 = vpop.f32.mrf.mxu2 }
 0x71f   :  { %3367 = vmatpush.bf16.msra.mxu3 %v7899_v30  ;;  %2707 = vmatmul.bf16.gmra.mxu0 %v6853_v45  ;;  %v2476_v35 = vadd.f32 %v2389_v40, %v1951_v48  ;;  %v1953_v30 = vadd.f32 %v7905_v47, %v7904_v56  ;;  %v7911_v56 = vld [vmem:[#allocation90_spill] sm:$0xff] }
 0x720   :  { %2805 = vmatmul.bf16.gmra.mxu2 %v6853_v45 }
 0x721   :  { %v6868_v9 = vadd.f32 %v6659_v22, %v2476_v35 }
 0x723   :  { %3368 = vmatpush.bf16.msra.mxu3 %v7900_v24  ;;  %7906 = vst [vmem:[#allocation60_spill] sm:$0xff] %v6868_v9  ;;  %v7521_v40 = vmax.f32 %v6868_v9, 0.0  ;;  %v6917_v9 = vld [vmem:[#allocation5 + $0x1a0] sm:$0xff] }
 0x725   :  { %v6863_v62 = vpop.f32.mrf.mxu3 }
 0x726   :  { %v2391_v38 = vpop.f32.mrf.mxu2 }
 0x727   :  { %3369 = vmatpush.bf16.msra.mxu3 %v7903_v52  ;;  %v2478_v10 = vadd.f32 %v2391_v38, %v1953_v30  ;;  %v7910_v52 = vld [vmem:[#allocation110_spill] sm:$0xff] }
 0x728   :  { %v1958_v47 = vadd.f32 %v7911_v56, %v7910_v52  ;;  %v7917_v56 = vld [vmem:[#allocation94_spill] sm:$0xff] }
 0x729   :  { %v6871_v24 = vadd.f32 %v6665_v23, %v2478_v10  ;;  %v7908_v10 = vld [vmem:[#allocation109_spill] sm:$0xff] }
 0x72a   :  { %3184 = vmatmul.bf16.gmra.mxu3 %v6865_v17  ;;  %v7909_v23 = vld [vmem:[#allocation89_spill] sm:$0xff] }
 0x72b   :  { %7907 = vst [vmem:[#allocation57_spill] sm:$0xff] %v6871_v24  ;;  %v7522_v2 = vmax.f32 %v6871_v24, 0.0  ;;  %v1956_v38 = vadd.f32 %v7909_v23, %v7908_v10 }
 0x72d   :  { %v6876_v44 = vpop.f32.mrf.mxu3  ;;  %v6882_v48 = vpack.c.bf16 %v7522_v2, %v7521_v40 }
 0x72e   :  { %v2394_v22 = vpop.f32.mrf.mxu2 }
 0x72f   :  { %2712 = vmatmul.bf16.gmra.mxu0 %v6882_v48  ;;  %v2480_v35 = vadd.f32 %v2394_v22, %v1956_v38 }
 0x730   :  { %2810 = vmatmul.bf16.gmra.mxu2 %v6882_v48 }
 0x731   :  { %v6895_v40 = vadd.f32 %v6686_v54, %v2480_v35  ;;  %v7914_v54 = vld [vmem:[#allocation111_spill] sm:$0xff]  ;;  %v7916_v35 = vld [vmem:[#allocation112_spill] sm:$0xff] }
 0x733   :  { %7912 = vst [vmem:[#allocation55_spill] sm:$0xff] %v6895_v40  ;;  %v7526_v10 = vmax.f32 %v6895_v40, 0.0 }
 0x735   :  { %v6890_v30 = vpop.f32.mrf.mxu3 }
 0x736   :  { %v2396_v13 = vpop.f32.mrf.mxu2 }
 0x737   :  { %v2482_v2 = vadd.f32 %v2396_v13, %v1958_v47  ;;  %v1963_v47 = vadd.f32 %v7917_v56, %v7916_v35  ;;  %v7923_v56 = vld [vmem:[#allocation98_spill] sm:$0xff] }
 0x739   :  { %v6898_v34 = vadd.f32 %v6691_v19, %v2482_v2  ;;  %v7915_v19 = vld [vmem:[#allocation92_spill] sm:$0xff] }
 0x73a   :  { %3189 = vmatmul.bf16.gmra.mxu3 %v6892_v6  ;;  %v1961_v13 = vadd.f32 %v7915_v19, %v7914_v54 }
 0x73b   :  { %7913 = vst [vmem:[#allocation52_spill] sm:$0xff] %v6898_v34  ;;  %v7527_v22 = vmax.f32 %v6898_v34, 0.0 }
 0x73d   :  { %v6907_v23 = vpack.c.bf16 %v7527_v22, %v7526_v10  ;;  %v6909_v52 = vpop.f32.mrf.mxu3 }
 0x73e   :  { %v2399_v38 = vpop.f32.mrf.mxu2 }
 0x73f   :  { %2717 = vmatmul.bf16.gmra.mxu0 %v6907_v23  ;;  %v2484_v2 = vadd.f32 %v2399_v38, %v1961_v13 }
 0x740   :  { %2815 = vmatmul.bf16.gmra.mxu2 %v6907_v23 }
 0x741   :  { %v6920_v10 = vadd.f32 %v6711_v61, %v2484_v2  ;;  %v7920_v61 = vld [vmem:[#allocation113_spill] sm:$0xff] }
 0x743   :  { %7918 = vst [vmem:[#allocation50_spill] sm:$0xff] %v6920_v10  ;;  %v7534_v54 = vmax.f32 %v6920_v10, 0.0 }
 0x745   :  { %v6922_v24 = vpop.f32.mrf.mxu3 }
 0x746   :  { %v2401_v25 = vpop.f32.mrf.mxu2 }
 0x747   :  { %v2486_v22 = vadd.f32 %v2401_v25, %v1963_v47  ;;  %v7921_v25 = vld [vmem:[#allocation96_spill] sm:$0xff] }
 0x748   :  { %v1966_v2 = vadd.f32 %v7921_v25, %v7920_v61 }
 0x749   :  { %v6925_v40 = vadd.f32 %v6716_v8, %v2486_v22  ;;  %v7922_v22 = vld [vmem:[#allocation115_spill] sm:$0xff] }
 0x74a   :  { %3194 = vmatmul.bf16.gmra.mxu3 %v6917_v9  ;;  %v1968_v47 = vadd.f32 %v7923_v56, %v7922_v22  ;;  %v7929_v56 = vld [vmem:[#allocation100_spill] sm:$0xff] }
 0x74b   :  { %7919 = vst [vmem:[#allocation48_spill] sm:$0xff] %v6925_v40  ;;  %v7535_v38 = vmax.f32 %v6925_v40, 0.0 }
 0x74d   :  { %v2669_v19 = vpack.c.bf16 %v7535_v38, %v7534_v54  ;;  %v6936_v35 = vpop.f32.mrf.mxu3 }
 0x74e   :  { %v2404_v13 = vpop.f32.mrf.mxu2 }
 0x74f   :  { %2722 = vmatmul.bf16.gmra.mxu0 %v2669_v19  ;;  %v2488_v8 = vadd.f32 %v2404_v13, %v1966_v2 }
 0x750   :  { %2820 = vmatmul.bf16.gmra.mxu2 %v2669_v19 }
 0x751   :  { %v6943_v10 = vadd.f32 %v6732_v41, %v2488_v8  ;;  %v7926_v41 = vld [vmem:[#allocation117_spill] sm:$0xff]  ;;  %v7928_v8 = vld [vmem:[#allocation56_spill] sm:$0xff] }
 0x753   :  { %7924 = vst [vmem:[#allocation46_spill] sm:$0xff] %v6943_v10  ;;  %v7540_v61 = vmax.f32 %v6943_v10, 0.0 }
 0x755   :  { %v6951_v13 = vpop.f32.mrf.mxu3 }
 0x756   :  { %v2406_v34 = vpop.f32.mrf.mxu2 }
 0x757   :  { %v2490_v40 = vadd.f32 %v2406_v34, %v1968_v47  ;;  %v7927_v34 = vld [vmem:[#allocation99_spill] sm:$0xff]  ;;  %v1973_v47 = vadd.f32 %v7929_v56, %v7928_v8 }
 0x758   :  { %v7934_v56 = vld [vmem:[#allocation75_spill] sm:$0xff] }
 0x759   :  { %v6946_v54 = vadd.f32 %v6737_v49, %v2490_v40  ;;  %v1971_v49 = vadd.f32 %v7927_v34, %v7926_v41 }
 0x75a   :  { %3199 = vmatmul.bf16.gmra.mxu3 %v6940_v63 }
 0x75b   :  { %7925 = vst [vmem:[#allocation45_spill] sm:$0xff] %v6946_v54  ;;  %v7541_v25 = vmax.f32 %v6946_v54, 0.0 }
 0x75d   :  { %v2671_v2 = vpack.c.bf16 %v7541_v25, %v7540_v61  ;;  %v6963_v12 = vpop.f32.mrf.mxu3 }
 0x75e   :  { %v2409_v22 = vpop.f32.mrf.mxu2 }
 0x75f   :  { %2727 = vmatmul.bf16.gmra.mxu0 %v2671_v2  ;;  %v2492_v40 = vadd.f32 %v2409_v22, %v1971_v49  ;;  %v6978_v49 = vpop.f32.mrf.mxu1 }
 0x760   :  { %2825 = vmatmul.bf16.gmra.mxu2 %v2671_v2 }
 0x761   :  { %v6966_v10 = vadd.f32 %v6753_v58, %v2492_v40  ;;  %v7932_v58 = vld [vmem:[#allocation76_spill] sm:$0xff] }
 0x763   :  { %7930 = vst [vmem:[#allocation44_spill] sm:$0xff] %v6966_v10  ;;  %v7545_v41 = vmax.f32 %v6966_v10, 0.0 }
 0x766   :  { %v2411_v38 = vpop.f32.mrf.mxu2 }
 0x767   :  { %v2494_v54 = vadd.f32 %v2411_v38, %v1973_v47  ;;  %v7933_v38 = vld [vmem:[#allocation101_spill] sm:$0xff]  ;;  %v7935_v47 = vld [vmem:[#allocation102_spill] sm:$0xff] }
 0x768   :  { %v1978_v25 = vadd.f32 %v7935_v47, %v7934_v56 }
 0x769   :  { %v6969_v61 = vadd.f32 %v6758_v21, %v2494_v54  ;;  %v1976_v21 = vadd.f32 %v7933_v38, %v7932_v58  ;;  %v6982_v54 = vpop.f32.mrf.mxu3 }
 0x76a   :  { %3204 = vmatmul.bf16.gmra.mxu3 %v6961_v33 }
 0x76b   :  { %7931 = vst [vmem:[#allocation65_spill] sm:$0xff] %v6969_v61  ;;  %v7546_v22 = vmax.f32 %v6969_v61, 0.0 }
 0x76d   :  { %v2673_v34 = vpack.c.bf16 %v7546_v22, %v7545_v41  ;;  %v6991_v22 = vpop.f32.mrf.mxu1 }
 0x76e   :  { %v2414_v8 = vpop.f32.mrf.mxu2 }
 0x76f   :  { %2732 = vmatmul.bf16.gmra.mxu0 %v2673_v34  ;;  %v2496_v40 = vadd.f32 %v2414_v8, %v1976_v21 }
 0x770   :  { %2830 = vmatmul.bf16.gmra.mxu2 %v2673_v34 }
 0x771   :  { %v6989_v10 = vadd.f32 %v6774_v32, %v2496_v40  ;;  %v6997_v58 = vpop.f32.mrf.mxu3 }
 0x773   :  { %7936 = vst [vmem:[#allocation69_spill] sm:$0xff] %v6989_v10  ;;  %v7549_v8 = vmax.f32 %v6989_v10, 0.0 }
 0x776   :  { %v2416_v43 = vpop.f32.mrf.mxu2 }
 0x777   :  { %v2498_v41 = vadd.f32 %v2416_v43, %v1978_v25  ;;  %v7005_v43 = vpop.f32.mrf.mxu1 }
 0x779   :  { %v6994_v61 = vadd.f32 %v6779_v5, %v2498_v41  ;;  %v7007_v5 = vpop.f32.mrf.mxu3 }
 0x77a   :  { %3209 = vmatmul.bf16.gmra.mxu3 %v6986_v4 }
 0x77b   :  { %7937 = vst [vmem:[#allocation66_spill] sm:$0xff] %v6994_v61  ;;  %v7548_v38 = vmax.f32 %v6994_v61, 0.0 }
 0x77d   :  { %v2675_v32 = vpack.c.bf16 %v7548_v38, %v7549_v8 }
 0x77f   :  { %2737 = vmatmul.bf16.gmra.mxu0 %v2675_v32  ;;  %3117 = vmatpush.bf16.msrb.mxu2 %v2675_v32  ;;  %v7009_v25 = vpop.f32.mrf.mxu1 }
 0x780   :  { %2835 = vmatmul.bf16.gmra.mxu2 %v2675_v32 }
 0x783   :  { %3118 = vmatpush.bf16.msrb.mxu2 %v2673_v34 }
 0x787   :  { %3119 = vmatpush.bf16.msrb.mxu2 %v2671_v2  ;;  %v7019_v32 = vpop.f32.mrf.mxu1 }
 0x78b   :  { %3120 = vmatpush.bf16.msrb.mxu2 %v2669_v19 }
 0x78c   :  { %v7011_v41 = vpop.f32.mrf.mxu0 }
 0x78d   :  { %v7013_v21 = vpop.f32.mrf.mxu3 }
 0x78e   :  { %7938 = vst [vmem:[#allocation67_spill] sm:$0xff] %v7013_v21 }
 0x78f   :  { %3121 = vmatpush.bf16.msrb.mxu2 %v6907_v23 }
 0x793   :  { %v2801_v40 = vpop.f32.mrf.mxu2  ;;  %3122 = vmatpush.bf16.msrb.mxu2 %v6882_v48  ;;  %v7032_v48 = vpop.f32.mrf.mxu1 }
 0x794   :  { %v7017_v56 = vpop.f32.mrf.mxu0  ;;  %v2851_v34 = vadd.f32 %v6792_v42, %v2801_v40 }
 0x795   :  { %v3177_v47 = vpop.f32.mrf.mxu3 }
 0x797   :  { %3123 = vmatpush.bf16.msrb.mxu2 %v6853_v45 }
 0x79b   :  { %v2803_v2 = vpop.f32.mrf.mxu2  ;;  %3124 = vmatpush.bf16.msrb.mxu2 %v6820_v51  ;;  %v7039_v51 = vpop.f32.mrf.mxu1 }
 0x79c   :  { %v2853_v19 = vadd.f32 %v6800_v50, %v2803_v2  ;;  %v7025_v38 = vpop.f32.mrf.mxu0 }
 0x79d   :  { %v3180_v8 = vpop.f32.mrf.mxu3 }
 0x79e   :  { %v7027_v23 = vpack.c.bf16 %v2853_v19, %v2851_v34  ;;  %3125 = vmatmul.bf16.vlgmr.msrb.gmra.mxu2 %v6802_v57 }
 0x79f   :  { %3313 = vmatpush.bf16.msra.mxu2 %v7850_v39 }
 0x7a0   :  { %3370 = vmatmul.bf16.vlgmr.msra.gmra.mxu3 %v7027_v23 }
 0x7a3   :  { %3314 = vmatpush.bf16.msra.mxu2 %v7852_v18  ;;  %v2806_v42 = vpop.f32.mrf.mxu2 }
 0x7a4   :  { %v7035_v45 = vpop.f32.mrf.mxu0  ;;  %v2856_v39 = vadd.f32 %v6822_v28, %v2806_v42 }
 0x7a5   :  { %v3182_v50 = vpop.f32.mrf.mxu3 }
 0x7a7   :  { %3315 = vmatpush.bf16.msra.mxu2 %v7854_v1 }
 0x7ab   :  { %3316 = vmatpush.bf16.msra.mxu2 %v7855_v59  ;;  %v2808_v8 = vpop.f32.mrf.mxu2  ;;  %v7051_v59 = vpop.f32.mrf.mxu1 }
 0x7ac   :  { %v2858_v57 = vadd.f32 %v6832_v14, %v2808_v8  ;;  %v7043_v40 = vpop.f32.mrf.mxu0 }
 0x7ad   :  { %v3185_v18 = vpop.f32.mrf.mxu3 }
 0x7ae   :  { %v7045_v47 = vpack.c.bf16 %v2858_v57, %v2856_v39  ;;  %3130 = vmatmul.bf16.gmra.mxu2 %v6834_v26 }
 0x7af   :  { %3317 = vmatpush.bf16.msra.mxu2 %v7856_v37 }
 0x7b0   :  { %3375 = vmatmul.bf16.gmra.mxu3 %v7045_v47 }
 0x7b3   :  { %3318 = vmatpush.bf16.msra.mxu2 %v7858_v16  ;;  %v2811_v1 = vpop.f32.mrf.mxu2  ;;  %v2772_v42 = vpop.f32.mrf.mxu1 }
 0x7b4   :  { %v7053_v2 = vpop.f32.mrf.mxu0  ;;  %v2861_v34 = vadd.f32 %v6847_v31, %v2811_v1 }
 0x7b5   :  { %v3187_v28 = vpop.f32.mrf.mxu3 }
 0x7b7   :  { %3319 = vmatpush.bf16.msra.mxu2 %v7860_v20 }
 0x7bb   :  { %3320 = vmatpush.bf16.msra.mxu2 %v7861_v7  ;;  %v2813_v14 = vpop.f32.mrf.mxu2  ;;  %v7067_v7 = vpop.f32.mrf.mxu1 }
 0x7bc   :  { %v2863_v37 = vadd.f32 %v6863_v62, %v2813_v14  ;;  %v7059_v26 = vpop.f32.mrf.mxu0 }
 0x7bd   :  { %v3190_v16 = vpop.f32.mrf.mxu3 }
 0x7be   :  { %v7061_v19 = vpack.c.bf16 %v2863_v37, %v2861_v34  ;;  %3135 = vmatmul.bf16.gmra.mxu2 %v6865_v17 }
 0x7c0   :  { %3380 = vmatmul.bf16.gmra.mxu3 %v7061_v19 }
 0x7c3   :  { %v2816_v50 = vpop.f32.mrf.mxu2  ;;  %v2777_v17 = vpop.f32.mrf.mxu1 }
 0x7c4   :  { %v7065_v8 = vpop.f32.mrf.mxu0  ;;  %v2866_v31 = vadd.f32 %v6876_v44, %v2816_v50 }
 0x7c5   :  { %v3192_v20 = vpop.f32.mrf.mxu3 }
 0x7cb   :  { %v2818_v39 = vpop.f32.mrf.mxu2 }
 0x7cc   :  { %v2868_v62 = vadd.f32 %v6890_v30, %v2818_v39  ;;  %v2723_v57 = vpop.f32.mrf.mxu0  ;;  %v2779_v30 = vpop.f32.mrf.mxu1 }
 0x7cd   :  { %v7073_v1 = vadd.f32 %v2772_v42, %v2723_v57  ;;  %v3195_v28 = vpop.f32.mrf.mxu3 }
 0x7ce   :  { %v7071_v18 = vpack.c.bf16 %v2868_v62, %v2866_v31  ;;  %3140 = vmatmul.bf16.gmra.mxu2 %v6892_v6 }
 0x7d0   :  { %3385 = vmatmul.bf16.gmra.mxu3 %v7071_v18 }
 0x7d3   :  { %v2821_v14 = vpop.f32.mrf.mxu2 }
 0x7d4   :  { %v2725_v34 = vpop.f32.mrf.mxu0  ;;  %v2871_v20 = vadd.f32 %v6909_v52, %v2821_v14  ;;  %v2782_v57 = vpop.f32.mrf.mxu1 }
 0x7d5   :  { %v3197_v37 = vpop.f32.mrf.mxu3 }
 0x7db   :  { %v2823_v16 = vpop.f32.mrf.mxu2 }
 0x7dc   :  { %v2873_v44 = vadd.f32 %v6922_v24, %v2823_v16  ;;  %v2728_v50 = vpop.f32.mrf.mxu0 }
 0x7dd   :  { %v3200_v42 = vpop.f32.mrf.mxu3 }
 0x7de   :  { %v7079_v39 = vpack.c.bf16 %v2873_v44, %v2871_v20  ;;  %3145 = vmatmul.bf16.gmra.mxu2 %v6917_v9  ;;  %v2784_v9 = vpop.f32.mrf.mxu1 }
 0x7e0   :  { %3390 = vmatmul.bf16.gmra.mxu3 %v7079_v39 }
 0x7e3   :  { %v2826_v6 = vpop.f32.mrf.mxu2 }
 0x7e4   :  { %v2730_v31 = vpop.f32.mrf.mxu0  ;;  %v2876_v37 = vadd.f32 %v6936_v35, %v2826_v6 }
 0x7e5   :  { %v3202_v62 = vpop.f32.mrf.mxu3 }
 0x7e6   :  { %v2787_v21 = vpop.f32.mrf.mxu1 }
 0x7eb   :  { %v2828_v28 = vpop.f32.mrf.mxu2 }
 0x7ec   :  { %v2878_v52 = vadd.f32 %v6951_v13, %v2828_v28  ;;  %v2733_v14 = vpop.f32.mrf.mxu0 }
 0x7ed   :  { %v3205_v16 = vpop.f32.mrf.mxu3 }
 0x7ee   :  { %v7085_v24 = vpack.c.bf16 %v2878_v52, %v2876_v37  ;;  %3150 = vmatmul.bf16.gmra.mxu2 %v6940_v63  ;;  %v2789_v37 = vpop.f32.mrf.mxu1 }
 0x7f0   :  { %3395 = vmatmul.bf16.gmra.mxu3 %v7085_v24 }
 0x7f3   :  { %v2831_v20 = vpop.f32.mrf.mxu2 }
 0x7f4   :  { %v2735_v44 = vpop.f32.mrf.mxu0  ;;  %v2881_v61 = vadd.f32 %v6963_v12, %v2831_v20  ;;  %v2783_v12 = vadd.f32 %v2782_v57, %v2733_v14  ;;  %v7948_v14 = vld [vmem:[#allocation21_spill] sm:$0xff] }
 0x7f5   :  { %v3207_v42 = vpop.f32.mrf.mxu3  ;;  %v2785_v60 = vadd.f32 %v2784_v9, %v2735_v44  ;;  %v7949_v9 = vld [vmem:[#allocation20_spill] sm:$0xff]  ;;  %v7950_v44 = vld [vmem:[#allocation23_spill] sm:$0xff] }
 0x7f7   :  { %v7098_v20 = vpack.c.bf16 %v2785_v60, %v2783_v12  ;;  %v2770_v60 = vadd.f32 %v7051_v59, %v7065_v8  ;;  %v2755_v59 = vadd.f32 %v6991_v22, %v7017_v56  ;;  %v2763_v8 = vadd.f32 %v7019_v32, %v7043_v40  ;;  %v7941_v32 = vld [vmem:[#allocation12_spill] sm:$0xff]  ;;  %v7943_v40 = vld [vmem:[#allocation14_spill] sm:$0xff] }
 0x7f8   :  { %v2758_v22 = vadd.f32 %v7005_v43, %v7025_v38  ;;  %v7940_v43 = vld [vmem:[#allocation13_spill] sm:$0xff] }
 0x7fb   :  { %v2833_v62 = vpop.f32.mrf.mxu2 }
 0x7fc   :  { %v2883_v35 = vadd.f32 %v6982_v54, %v2833_v62  ;;  %v2738_v6 = vpop.f32.mrf.mxu0 }
 0x7fd   :  { %v3210_v28 = vpop.f32.mrf.mxu3  ;;  %v2788_v16 = vadd.f32 %v2787_v21, %v2738_v6  ;;  %v2775_v21 = vadd.f32 %v7067_v7, %v2725_v34  ;;  %v4668_v34 = vld [vmem:[#allocation5 + $0x1c8] sm:$0xff]  ;;  %v7951_v6 = vld [vmem:[#allocation22_spill] sm:$0xff] }
 0x7fe   :  { %v7091_v13 = vpack.c.bf16 %v2883_v35, %v2881_v61  ;;  %3155 = vmatmul.bf16.gmra.mxu2 %v6961_v33  ;;  %v2780_v61 = vadd.f32 %v2779_v30, %v2730_v31  ;;  %v2778_v35 = vadd.f32 %v2777_v17, %v2728_v50  ;;  %v7944_v17 = vld [vmem:[#allocation17_spill] sm:$0xff]  ;;  %v7945_v30 = vld [vmem:[#allocation16_spill] sm:$0xff]  ;;  %v7946_v50 = vld [vmem:[#allocation19_spill] sm:$0xff] }
 0x7ff   :  { %v7947_v31 = vld [vmem:[#allocation18_spill] sm:$0xff] }
 0x800   :  { %3400 = vmatmul.bf16.gmra.mxu3 %v7091_v13 }
 0x803   :  { %v2836_v63 = vpop.f32.mrf.mxu2 }
 0x804   :  { %v2740_v52 = vpop.f32.mrf.mxu0  ;;  %v2886_v33 = vadd.f32 %v6997_v58, %v2836_v63  ;;  %v7115_v58 = vpack.c.bf16 %v2775_v21, %v7073_v1 }
 0x805   :  { %v2790_v10 = vadd.f32 %v2789_v37, %v2740_v52  ;;  %v3212_v42 = vpop.f32.mrf.mxu3  ;;  %v7952_v37 = vld [vmem:[#allocation25_spill] sm:$0xff] }
 0x806   :  { %v4669_v52 = vld [vmem:[#allocation5 + $0x1d0] sm:$0xff]  ;;  %v7954_v42 = vld [vmem:[#allocation26_spill] sm:$0xff] }
 0x807   :  { %v7095_v36 = vpack.c.bf16 %v2790_v10, %v2788_v16  ;;  %v7106_v10 = vpack.c.bf16 %v2780_v61, %v2778_v35  ;;  %v7953_v16 = vld [vmem:[#allocation24_spill] sm:$0xff]  ;;  %v4670_v61 = vld [vmem:[#allocation5 + $0x1d8] sm:$0xff]  ;;  %v4671_v35 = vld [vmem:[#allocation5 + $0x1e0] sm:$0xff] }
 0x809   :  { %2971 = vmatpush.bf16.msra.mxu0 %v7095_v36 }
 0x80b   :  { %v2838_v54 = vpop.f32.mrf.mxu2 }
 0x80c   :  { %v2888_v62 = vadd.f32 %v7007_v5, %v2838_v54  ;;  %v2768_v5 = vadd.f32 %v7039_v51, %v7059_v26  ;;  %v2753_v51 = vadd.f32 %v6978_v49, %v7011_v41  ;;  %v2760_v26 = vadd.f32 %v7009_v25, %v7035_v45  ;;  %v4667_v25 = vld [vmem:[#allocation5 + $0x1c0] sm:$0xff] }
 0x80d   :  { %2972 = vmatpush.bf16.msra.mxu0 %v7098_v20  ;;  %v7939_v41 = vld [vmem:[#allocation11_spill] sm:$0xff] }
 0x80e   :  { %v7102_v28 = vpack.c.bf16 %v2888_v62, %v2886_v33  ;;  %3160 = vmatmul.bf16.gmra.mxu2 %v6986_v4  ;;  %v2765_v4 = vadd.f32 %v7032_v48, %v7053_v2  ;;  %v7123_v7 = vpack.c.bf16 %v2770_v60, %v2768_v5  ;;  %v7138_v48 = vpack.c.bf16 %v2755_v59, %v2753_v51  ;;  %v7942_v45 = vld [vmem:[#allocation15_spill] sm:$0xff]  ;;  %v4672_v5 = vld [vmem:[#allocation5 + $0x1e8] sm:$0xff]  ;;  %v4673_v51 = vld [vmem:[#allocation5 + $0x1f0] sm:$0xff] }
 0x80f   :  { %v7143_v56 = vpack.c.bf16 %v2760_v26, %v2758_v22 }
 0x810   :  { %3020 = vmatpush.bf16.msra.mxu1 %v7102_v28  ;;  %3405 = vmatmul.bf16.gmra.mxu3 %v7102_v28  ;;  %v7135_v1 = vpack.c.bf16 %v2765_v4, %v2763_v8 }
 0x811   :  { %2973 = vmatpush.bf16.msra.mxu0 %v7106_v10 }
 0x814   :  { %3021 = vmatpush.bf16.msra.mxu1 %v7091_v13 }
 0x815   :  { %2974 = vmatpush.bf16.msra.mxu0 %v7115_v58 }
 0x818   :  { %3022 = vmatpush.bf16.msra.mxu1 %v7085_v24 }
 0x819   :  { %2975 = vmatpush.bf16.msra.mxu0 %v7123_v7 }
 0x81c   :  { %3023 = vmatpush.bf16.msra.mxu1 %v7079_v39 }
 0x81d   :  { %2976 = vmatpush.bf16.msra.mxu0 %v7135_v1 }
 0x81e   :  { %3321 = vmatmul.bf16.vlgmr.msra.gmra.mxu2 %v7138_v48 }
 0x820   :  { %3024 = vmatpush.bf16.msra.mxu1 %v7071_v18 }
 0x821   :  { %2977 = vmatpush.bf16.msra.mxu0 %v7143_v56  ;;  %v7148_v49 = vpop.f32.mrf.mxu2 }
 0x823   :  { %v3371_v8 = vpop.f32.mrf.mxu3 }
 0x824   :  { %3025 = vmatpush.bf16.msra.mxu1 %v7061_v19 }
 0x825   :  { %2978 = vmatpush.bf16.msra.mxu0 %v7138_v48 }
 0x828   :  { %3026 = vmatpush.bf16.msra.mxu1 %v7045_v47  ;;  %2979 = vmatmul.bf16.vlgmr.msra.gmra.mxu0 %v4667_v25 }
 0x829   :  { %3215 = vmatpush.bf16.msrb.mxu0 %v7939_v41  ;;  %v3128_v38 = vpop.f32.mrf.mxu2  ;;  %v4674_v41 = vld [vmem:[#allocation5 + $0x1f8] sm:$0xff] }
 0x82b   :  { %v3373_v22 = vpop.f32.mrf.mxu3 }
 0x82c   :  { %3027 = vmatpush.bf16.msra.mxu1 %v7027_v23 }
 0x82d   :  { %3216 = vmatpush.bf16.msrb.mxu0 %v7940_v43 }
 0x82e   :  { %3326 = vmatmul.bf16.gmra.mxu2 %v7143_v56 }
 0x82f   :  { %3028 = vmatmul.bf16.vlgmr.msra.gmra.mxu1 %v4667_v25 }
 0x830   :  { %3264 = vmatpush.bf16.msrb.mxu1 %v7941_v32 }
 0x831   :  { %3217 = vmatpush.bf16.msrb.mxu0 %v7942_v45  ;;  %v3131_v2 = vpop.f32.mrf.mxu2 }
 0x833   :  { %v3376_v38 = vpop.f32.mrf.mxu3 }
 0x834   :  { %3265 = vmatpush.bf16.msrb.mxu1 %v7943_v40 }
 0x835   :  { %3218 = vmatpush.bf16.msrb.mxu0 %v7944_v17 }
 0x838   :  { %3266 = vmatpush.bf16.msrb.mxu1 %v7945_v30  ;;  %2984 = vmatmul.bf16.gmra.mxu0 %v4668_v34 }
 0x839   :  { %3219 = vmatpush.bf16.msrb.mxu0 %v7946_v50  ;;  %v3133_v57 = vpop.f32.mrf.mxu2 }
 0x83b   :  { %v3378_v32 = vpop.f32.mrf.mxu3 }
 0x83c   :  { %3267 = vmatpush.bf16.msrb.mxu1 %v7947_v31 }
 0x83d   :  { %3220 = vmatpush.bf16.msrb.mxu0 %v7948_v14 }
 0x83e   :  { %3331 = vmatmul.bf16.gmra.mxu2 %v7135_v1 }
 0x83f   :  { %3033 = vmatmul.bf16.gmra.mxu1 %v4668_v34 }
 0x840   :  { %3268 = vmatpush.bf16.msrb.mxu1 %v7949_v9  ;;  %v7955_v9 = vmax.f32 %v6604_v15, 0.0 }
 0x841   :  { %3221 = vmatpush.bf16.msrb.mxu0 %v7950_v44  ;;  %v3136_v63 = vpop.f32.mrf.mxu2 }
 0x843   :  { %v3381_v31 = vpop.f32.mrf.mxu3 }
 0x844   :  { %3269 = vmatpush.bf16.msrb.mxu1 %v7951_v6  ;;  %v7956_v6 = vmax.f32 %v6611_v46, 0.0  ;;  %v7957_v46 = vmax.f32 %v6634_v0, 0.0 }
 0x845   :  { %3222 = vmatpush.bf16.msrb.mxu0 %v7952_v37 }
 0x848   :  { %3270 = vmatpush.bf16.msrb.mxu1 %v7953_v16  ;;  %2989 = vmatmul.bf16.gmra.mxu0 %v4669_v52 }
 0x849   :  { %v3138_v12 = vpop.f32.mrf.mxu2 }
 0x84c   :  { %3271 = vmatpush.bf16.msrb.mxu1 %v7954_v42  ;;  %v3383_v42 = vpop.f32.mrf.mxu3 }
 0x84e   :  { %3336 = vmatmul.bf16.gmra.mxu2 %v7123_v7 }
 0x84f   :  { %3038 = vmatmul.bf16.gmra.mxu1 %v4669_v52 }
 0x851   :  { %v3141_v54 = vpop.f32.mrf.mxu2 }
 0x858   :  { %2994 = vmatmul.bf16.gmra.mxu0 %v4670_v61 }
 0x859   :  { %v3143_v33 = vpop.f32.mrf.mxu2 }
 0x85e   :  { %3341 = vmatmul.bf16.gmra.mxu2 %v7115_v58 }
 0x85f   :  { %3043 = vmatmul.bf16.gmra.mxu1 %v4670_v61 }
 0x861   :  { %v3146_v62 = vpop.f32.mrf.mxu2 }
 0x868   :  { %2999 = vmatmul.bf16.gmra.mxu0 %v4671_v35 }
 0x869   :  { %v3148_v21 = vpop.f32.mrf.mxu2 }
 0x86a   :  { %v7958_v21 = vmax.f32 %v6639_v29, 0.0  ;;  %v7959_v29 = vmax.f32 %v6663_v53, 0.0 }
 0x86e   :  { %3346 = vmatmul.bf16.gmra.mxu2 %v7106_v10 }
 0x86f   :  { %3048 = vmatmul.bf16.gmra.mxu1 %v4671_v35 }
 0x871   :  { %v3151_v60 = vpop.f32.mrf.mxu2 }
 0x878   :  { %3004 = vmatmul.bf16.gmra.mxu0 %v4672_v5 }
 0x879   :  { %v3153_v4 = vpop.f32.mrf.mxu2 }
 0x87e   :  { %3351 = vmatmul.bf16.gmra.mxu2 %v7098_v20 }
 0x87f   :  { %3053 = vmatmul.bf16.gmra.mxu1 %v4672_v5  ;;  %v3386_v5 = vpop.f32.mrf.mxu3 }
 0x881   :  { %v3156_v59 = vpop.f32.mrf.mxu2 }
 0x888   :  { %3009 = vmatmul.bf16.gmra.mxu0 %v4673_v51 }
 0x889   :  { %v3158_v26 = vpop.f32.mrf.mxu2 }
 0x88a   :  { %v3388_v26 = vpop.f32.mrf.mxu3 }
 0x88e   :  { %3356 = vmatmul.bf16.gmra.mxu2 %v7095_v36 }
 0x88f   :  { %3058 = vmatmul.bf16.gmra.mxu1 %v4673_v51 }
 0x891   :  { %v3161_v25 = vpop.f32.mrf.mxu2 }
 0x898   :  { %3014 = vmatmul.bf16.gmra.mxu0 %v4674_v41 }
 0x899   :  { %v3163_v43 = vpop.f32.mrf.mxu2 }
 0x89f   :  { %3063 = vmatmul.bf16.gmra.mxu1 %v4674_v41 }
 0x8a1   :  { %v3322_v45 = vpop.f32.mrf.mxu2 }
 0x8a2   :  { %v3372_v2 = vadd.f32 %v3371_v8, %v3322_v45 }
 0x8a4   :  { %v3412_v34 = vmul.f32 2.0, %v3372_v2 }
 0x8a5   :  { %v7177_v40 = vpop.f32.mrf.mxu0 }
 0x8a6   :  { %v7185_v44 = vsub.f32 %v3412_v34, %v7955_v9  ;;  %v3391_v34 = vpop.f32.mrf.mxu3 }
 0x8a8   :  { %3223 = vmatmul.bf16.vlgmr.msrb.gmra.mxu0 %v7138_v48 }
 0x8a9   :  { %v3324_v17 = vpop.f32.mrf.mxu2 }
 0x8aa   :  { %v3374_v30 = vadd.f32 %v3373_v22, %v3324_v17 }
 0x8ac   :  { %v7180_v50 = vpop.f32.mrf.mxu1  ;;  %v3414_v57 = vmul.f32 2.0, %v3374_v30 }
 0x8ad   :  { %v2982_v14 = vpop.f32.mrf.mxu0 }
 0x8ae   :  { %v7189_v63 = vsub.f32 %v3414_v57, %v7956_v6 }
 0x8af   :  { %3272 = vmatmul.bf16.vlgmr.msrb.gmra.mxu1 %v7027_v23 }
 0x8b0   :  { %v3476_v48 = vpack.c.bf16 %v7189_v63, %v7185_v44 }
 0x8b1   :  { %v3327_v37 = vpop.f32.mrf.mxu2 }
 0x8b2   :  { %v3377_v12 = vadd.f32 %v3376_v38, %v3327_v37  ;;  %v3393_v37 = vpop.f32.mrf.mxu3 }
 0x8b4   :  { %v3031_v52 = vpop.f32.mrf.mxu1  ;;  %v3416_v23 = vmul.f32 2.0, %v3377_v12 }
 0x8b5   :  { %v2985_v16 = vpop.f32.mrf.mxu0 }
 0x8b6   :  { %v7197_v35 = vsub.f32 %v3416_v23, %v7957_v46  ;;  %v7962_v16 = vmax.f32 %v6694_v11, 0.0 }
 0x8b8   :  { %3228 = vmatmul.bf16.gmra.mxu0 %v7143_v56 }
 0x8b9   :  { %v3329_v54 = vpop.f32.mrf.mxu2 }
 0x8ba   :  { %v3379_v61 = vadd.f32 %v3378_v32, %v3329_v54  ;;  %v7960_v32 = vmax.f32 %v6668_v3, 0.0  ;;  %v7961_v3 = vmax.f32 %v6689_v27, 0.0 }
 0x8bc   :  { %v3034_v15 = vpop.f32.mrf.mxu1  ;;  %v3418_v33 = vmul.f32 2.0, %v3379_v61 }
 0x8bd   :  { %v2987_v62 = vpop.f32.mrf.mxu0  ;;  %v3396_v15 = vpop.f32.mrf.mxu3 }
 0x8be   :  { %v7201_v60 = vsub.f32 %v3418_v33, %v7958_v21 }
 0x8bf   :  { %3277 = vmatmul.bf16.gmra.mxu1 %v7045_v47 }
 0x8c0   :  { %v3478_v56 = vpack.c.bf16 %v7201_v60, %v7197_v35 }
 0x8c1   :  { %v3332_v4 = vpop.f32.mrf.mxu2 }
 0x8c2   :  { %v3382_v51 = vadd.f32 %v3381_v31, %v3332_v4 }
 0x8c4   :  { %v3036_v59 = vpop.f32.mrf.mxu1  ;;  %v3420_v22 = vmul.f32 2.0, %v3382_v51 }
 0x8c5   :  { %v2990_v8 = vpop.f32.mrf.mxu0  ;;  %v3398_v27 = vpop.f32.mrf.mxu3 }
 0x8c6   :  { %v7209_v43 = vsub.f32 %v3420_v22, %v7959_v29 }
 0x8c8   :  { %3233 = vmatmul.bf16.gmra.mxu0 %v7135_v1 }
 0x8c9   :  { %v3334_v47 = vpop.f32.mrf.mxu2 }
 0x8ca   :  { %v3384_v0 = vadd.f32 %v3383_v42, %v3334_v47 }
 0x8cc   :  { %v3039_v25 = vpop.f32.mrf.mxu1  ;;  %v3422_v41 = vmul.f32 2.0, %v3384_v0 }
 0x8cd   :  { %v2992_v38 = vpop.f32.mrf.mxu0  ;;  %v3401_v59 = vpop.f32.mrf.mxu3 }
 0x8ce   :  { %v7213_v45 = vsub.f32 %v3422_v41, %v7960_v32 }
 0x8cf   :  { %3282 = vmatmul.bf16.gmra.mxu1 %v7061_v19 }
 0x8d0   :  { %v3480_v1 = vpack.c.bf16 %v7213_v45, %v7209_v43 }
 0x8d1   :  { %v3337_v2 = vpop.f32.mrf.mxu2 }
 0x8d2   :  { %v3387_v31 = vadd.f32 %v3386_v5, %v3337_v2 }
 0x8d4   :  { %v3041_v17 = vpop.f32.mrf.mxu1  ;;  %v3424_v19 = vmul.f32 2.0, %v3387_v31 }
 0x8d5   :  { %v2995_v30 = vpop.f32.mrf.mxu0  ;;  %v3403_v47 = vpop.f32.mrf.mxu3 }
 0x8d6   :  { %v7221_v52 = vsub.f32 %v3424_v19, %v7961_v3  ;;  %v7964_v3 = vld [vmem:[#allocation80_spill] sm:$0xff] }
 0x8d8   :  { %3238 = vmatmul.bf16.gmra.mxu0 %v7123_v7 }
 0x8d9   :  { %v3339_v57 = vpop.f32.mrf.mxu2 }
 0x8da   :  { %v3389_v14 = vadd.f32 %v3388_v26, %v3339_v57 }
 0x8dc   :  { %v3044_v53 = vpop.f32.mrf.mxu1  ;;  %v3426_v9 = vmul.f32 2.0, %v3389_v14 }
 0x8dd   :  { %v2997_v6 = vpop.f32.mrf.mxu0  ;;  %v3406_v25 = vpop.f32.mrf.mxu3 }
 0x8de   :  { %v7225_v42 = vsub.f32 %v3426_v9, %v7962_v16  ;;  %v7963_v9 = vmax.f32 %v6777_v55, 0.0 }
 0x8df   :  { %3287 = vmatmul.bf16.gmra.mxu1 %v7071_v18 }
 0x8e0   :  { %v3482_v7 = vpack.c.bf16 %v7225_v42, %v7221_v52 }
 0x8e1   :  { %v3342_v12 = vpop.f32.mrf.mxu2 }
 0x8e2   :  { %v3392_v54 = vadd.f32 %v3391_v34, %v3342_v12 }
 0x8e4   :  { %v3046_v23 = vpop.f32.mrf.mxu1 }
 0x8e5   :  { %v3000_v61 = vpop.f32.mrf.mxu0 }
 0x8e6   :  { %v7966_v61 = vld [vmem:[#allocation81_spill] sm:$0xff] }
 0x8e8   :  { %3243 = vmatmul.bf16.gmra.mxu0 %v7115_v58 }
 0x8e9   :  { %v3344_v33 = vpop.f32.mrf.mxu2 }
 0x8ea   :  { %v3394_v12 = vadd.f32 %v3393_v37, %v3344_v33 }
 0x8ec   :  { %v3049_v18 = vpop.f32.mrf.mxu1 }
 0x8ed   :  { %v3002_v62 = vpop.f32.mrf.mxu0  ;;  %v7967_v18 = vmax.f32 %v7966_v61, 0.0 }
 0x8ef   :  { %3292 = vmatmul.bf16.gmra.mxu1 %v7079_v39 }
 0x8f1   :  { %v3347_v46 = vpop.f32.mrf.mxu2 }
 0x8f4   :  { %v3051_v11 = vpop.f32.mrf.mxu1 }
 0x8f5   :  { %v3005_v21 = vpop.f32.mrf.mxu0 }
 0x8f6   :  { %v7968_v21 = vld [vmem:[#allocation82_spill] sm:$0xff] }
 0x8f8   :  { %3248 = vmatmul.bf16.gmra.mxu0 %v7106_v10 }
 0x8f9   :  { %v3349_v5 = vpop.f32.mrf.mxu2 }
 0x8fc   :  { %v3054_v4 = vpop.f32.mrf.mxu1 }
 0x8fd   :  { %v3007_v8 = vpop.f32.mrf.mxu0 }
 0x8ff   :  { %3297 = vmatmul.bf16.gmra.mxu1 %v7085_v24  ;;  %v3408_v24 = vpop.f32.mrf.mxu3 }
 0x901   :  { %v3352_v51 = vpop.f32.mrf.mxu2 }
 0x902   :  { %v3402_v17 = vadd.f32 %v3401_v59, %v3352_v51 }
 0x904   :  { %v3056_v26 = vpop.f32.mrf.mxu1  ;;  %v3436_v53 = vmul.f32 2.0, %v3402_v17 }
 0x905   :  { %v3010_v58 = vpop.f32.mrf.mxu0  ;;  %v3428_v26 = vmul.f32 2.0, %v3392_v54 }
 0x906   :  { %v7972_v58 = vld [vmem:[#allocation47_spill] sm:$0xff] }
 0x907   :  { %v7973_v37 = vmax.f32 %v7972_v58, 0.0  ;;  %v7980_v58 = vld [vmem:[#allocation66_spill] sm:$0xff] }
 0x908   :  { %3253 = vmatmul.bf16.gmra.mxu0 %v7098_v20  ;;  %v3399_v20 = vadd.f32 %v3398_v27, %v3349_v5  ;;  %v7969_v5 = vmax.f32 %v7968_v21, 0.0 }
 0x909   :  { %v3354_v22 = vpop.f32.mrf.mxu2 }
 0x90a   :  { %v3404_v32 = vadd.f32 %v3403_v47, %v3354_v22  ;;  %v3434_v23 = vmul.f32 2.0, %v3399_v20  ;;  %v3468_v4 = vsub.f32 %v3436_v53, %v7969_v5  ;;  %v7974_v47 = vld [vmem:[#allocation73_spill] sm:$0xff] }
 0x90b   :  { %v7975_v22 = vmax.f32 %v7974_v47, 0.0 }
 0x90c   :  { %v3059_v39 = vpop.f32.mrf.mxu1  ;;  %v3438_v57 = vmul.f32 2.0, %v3404_v32 }
 0x90d   :  { %v3012_v0 = vpop.f32.mrf.mxu0 }
 0x90e   :  { %v3470_v62 = vsub.f32 %v3438_v57, %v7967_v18 }
 0x90f   :  { %3302 = vmatmul.bf16.gmra.mxu1 %v7091_v13  ;;  %v3397_v13 = vadd.f32 %v3396_v15, %v3347_v46  ;;  %v3430_v15 = vmul.f32 2.0, %v3394_v12  ;;  %v7970_v46 = vld [vmem:[#allocation83_spill] sm:$0xff] }
 0x910   :  { %v7971_v59 = vmax.f32 %v7970_v46, 0.0  ;;  %v3488_v51 = vpack.c.bf16 %v3470_v62, %v3468_v4 }
 0x911   :  { %v3357_v41 = vpop.f32.mrf.mxu2  ;;  %v3432_v27 = vmul.f32 2.0, %v3397_v13  ;;  %v3462_v39 = vsub.f32 %v3430_v15, %v7975_v22 }
 0x912   :  { %v3407_v29 = vadd.f32 %v3406_v25, %v3357_v41  ;;  %v3466_v55 = vsub.f32 %v3434_v23, %v7971_v59  ;;  %v7976_v25 = vld [vmem:[#allocation49_spill] sm:$0xff] }
 0x913   :  { %v3464_v33 = vsub.f32 %v3432_v27, %v7973_v37  ;;  %v7977_v41 = vmax.f32 %v7976_v25, 0.0  ;;  %v7981_v37 = vmax.f32 %v7980_v58, 0.0 }
 0x914   :  { %v3061_v10 = vpop.f32.mrf.mxu1  ;;  %v3440_v34 = vmul.f32 2.0, %v3407_v29 }
 0x915   :  { %v3015_v38 = vpop.f32.mrf.mxu0  ;;  %v3486_v0 = vpack.c.bf16 %v3466_v55, %v3464_v33  ;;  %v3460_v10 = vsub.f32 %v3428_v26, %v7977_v41 }
 0x916   :  { %v3472_v6 = vsub.f32 %v3440_v34, %v7963_v9 }
 0x918   :  { %3258 = vmatmul.bf16.gmra.mxu0 %v7095_v36  ;;  %v7965_v36 = vmax.f32 %v7964_v3, 0.0 }
 0x919   :  { %v3359_v2 = vpop.f32.mrf.mxu2 }
 0x91a   :  { %v3409_v30 = vadd.f32 %v3408_v24, %v3359_v2  ;;  %v3484_v24 = vpack.c.bf16 %v3462_v39, %v3460_v10  ;;  %v7982_v39 = vld [vmem:[#allocation65_spill] sm:$0xff] }
 0x91c   :  { %v3064_v31 = vpop.f32.mrf.mxu1  ;;  %v3442_v19 = vmul.f32 2.0, %v3409_v30 }
 0x91d   :  { %v3017_v14 = vpop.f32.mrf.mxu0  ;;  %v7272_v31 = vld [vmem:[#allocation5 + $0x200] sm:$0xff] }
 0x91e   :  { %v3474_v16 = vsub.f32 %v3442_v19, %v7965_v36 }
 0x91f   :  { %3307 = vmatmul.bf16.gmra.mxu1 %v7102_v28 }
 0x920   :  { %v3490_v11 = vpack.c.bf16 %v3474_v16, %v3472_v6 }
 0x922   :  { %3605 = vmatpush.bf16.msra.mxu1 %v3490_v11 }
 0x924   :  { %v3066_v28 = vpop.f32.mrf.mxu1 }
 0x925   :  { %v3224_v8 = vpop.f32.mrf.mxu0 }
 0x926   :  { %3606 = vmatpush.bf16.msra.mxu1 %v3488_v51 }
 0x92a   :  { %3607 = vmatpush.bf16.msra.mxu1 %v3486_v0  ;;  %v7983_v0 = vmax.f32 %v7982_v39, 0.0 }
 0x92c   :  { %v3273_v38 = vpop.f32.mrf.mxu1 }
 0x92d   :  { %v7253_v29 = vadd.f32 %v3273_v38, %v3224_v8  ;;  %v7255_v32 = vpop.f32.mrf.mxu0  ;;  %v7978_v8 = vld [vmem:[#allocation69_spill] sm:$0xff]  ;;  %v7984_v38 = vld [vmem:[#allocation44_spill] sm:$0xff] }
 0x92e   :  { %3608 = vmatpush.bf16.msra.mxu1 %v3484_v24  ;;  %v7979_v51 = vmax.f32 %v7978_v8, 0.0  ;;  %v7985_v24 = vmax.f32 %v7984_v38, 0.0  ;;  %v8007_v38 = vld [vmem:[#allocation41_spill] sm:$0xff] }
 0x92f   :  { %v3411_v39 = vmul.f32 2.0, %v7253_v29 }
 0x932   :  { %3609 = vmatpush.bf16.msra.mxu1 %v3482_v7 }
 0x934   :  { %v7260_v54 = vpop.f32.mrf.mxu1 }
 0x935   :  { %v3229_v2 = vpop.f32.mrf.mxu0 }
 0x936   :  { %3610 = vmatpush.bf16.msra.mxu1 %v3480_v1 }
 0x93a   :  { %3611 = vmatpush.bf16.msra.mxu1 %v3478_v56 }
 0x93c   :  { %v3278_v17 = vpop.f32.mrf.mxu1 }
 0x93d   :  { %v7268_v34 = vadd.f32 %v3278_v17, %v3229_v2  ;;  %v7270_v30 = vpop.f32.mrf.mxu0 }
 0x93e   :  { %3612 = vmatpush.bf16.msra.mxu1 %v3476_v48 }
 0x941   :  { %3613 = vmatmul.bf16.vlgmr.msra.gmra.mxu1 %v7272_v31 }
 0x944   :  { %v3280_v52 = vpop.f32.mrf.mxu1 }
 0x945   :  { %v3234_v43 = vpop.f32.mrf.mxu0 }
 0x94c   :  { %v3283_v45 = vpop.f32.mrf.mxu1 }
 0x94d   :  { %v3284_v1 = vadd.f32 %v3283_v45, %v3234_v43  ;;  %v3236_v42 = vpop.f32.mrf.mxu0  ;;  %v7986_v45 = vld [vmem:[#allocation45_spill] sm:$0xff] }
 0x954   :  { %v3285_v35 = vpop.f32.mrf.mxu1 }
 0x955   :  { %v3239_v60 = vpop.f32.mrf.mxu0 }
 0x95c   :  { %v3288_v56 = vpop.f32.mrf.mxu1 }
 0x95d   :  { %v3289_v7 = vadd.f32 %v3288_v56, %v3239_v60  ;;  %v3241_v20 = vpop.f32.mrf.mxu0  ;;  %v7987_v60 = vmax.f32 %v7986_v45, 0.0  ;;  %v8009_v45 = vld [vmem:[#allocation79_spill] sm:$0xff] }
 0x964   :  { %v3290_v57 = vpop.f32.mrf.mxu1 }
 0x965   :  { %v3244_v19 = vpop.f32.mrf.mxu0  ;;  %v3291_v17 = vadd.f32 %v3290_v57, %v3241_v20  ;;  %v3281_v57 = vadd.f32 %v3280_v52, %v7270_v30  ;;  %v3415_v30 = vmul.f32 2.0, %v7268_v34  ;;  %v8000_v52 = vld [vmem:[#allocation60_spill] sm:$0xff] }
 0x966   :  { %v8001_v8 = vmax.f32 %v8000_v52, 0.0 }
 0x96c   :  { %v3293_v14 = vpop.f32.mrf.mxu1 }
 0x96d   :  { %v3294_v13 = vadd.f32 %v3293_v14, %v3244_v19  ;;  %v3246_v53 = vpop.f32.mrf.mxu0 }
 0x96f   :  { %v3427_v14 = vmul.f32 2.0, %v3294_v13 }
 0x974   :  { %v3295_v9 = vpop.f32.mrf.mxu1 }
 0x975   :  { %v3249_v44 = vpop.f32.mrf.mxu0  ;;  %v3296_v47 = vadd.f32 %v3295_v9, %v3246_v53  ;;  %v3286_v9 = vadd.f32 %v3285_v35, %v3236_v42 }
 0x977   :  { %v3429_v43 = vmul.f32 2.0, %v3296_v47 }
 0x97c   :  { %v3298_v63 = vpop.f32.mrf.mxu1 }
 0x97d   :  { %v3251_v48 = vpop.f32.mrf.mxu0  ;;  %v3299_v59 = vadd.f32 %v3298_v63, %v3249_v44  ;;  %v7988_v44 = vld [vmem:[#allocation46_spill] sm:$0xff] }
 0x97e   :  { %v7989_v63 = vmax.f32 %v7988_v44, 0.0 }
 0x97f   :  { %v3431_v10 = vmul.f32 2.0, %v3299_v59 }
 0x981   :  { %v3463_v53 = vsub.f32 %v3431_v10, %v7989_v63  ;;  %v7315_v10 = vpop.permute.xlu2 %3688 }
 0x984   :  { %v3300_v6 = vpop.f32.mrf.mxu1 }
 0x985   :  { %v3254_v3 = vpop.f32.mrf.mxu0  ;;  %v3301_v28 = vadd.f32 %v3300_v6, %v3251_v48  ;;  %v3425_v48 = vmul.f32 2.0, %v3291_v17  ;;  %v7990_v6 = vld [vmem:[#allocation48_spill] sm:$0xff] }
 0x987   :  { %v3433_v22 = vmul.f32 2.0, %v3301_v28  ;;  %v3417_v28 = vmul.f32 2.0, %v3281_v57 }
 0x989   :  { %v3465_v56 = vsub.f32 %v3433_v22, %v7987_v60  ;;  %v8010_v60 = vmax.f32 %v8009_v45, 0.0 }
 0x98c   :  { %v3303_v36 = vpop.f32.mrf.mxu1 }
 0x98d   :  { %v3256_v16 = vpop.f32.mrf.mxu0  ;;  %v3304_v21 = vadd.f32 %v3303_v36, %v3254_v3  ;;  %v7991_v3 = vmax.f32 %v7990_v6, 0.0 }
 0x98f   :  { %v3435_v55 = vmul.f32 2.0, %v3304_v21  ;;  %v3461_v36 = vsub.f32 %v3429_v43, %v7991_v3  ;;  %v3419_v21 = vmul.f32 2.0, %v3284_v1  ;;  %v4676_v43 = vld [vmem:[#allocation5 + $0x208] sm:$0xff] }
 0x990   :  { %3618 = vmatmul.bf16.gmra.mxu1 %v4676_v43 }
 0x991   :  { %v3467_v2 = vsub.f32 %v3435_v55, %v7985_v24  ;;  %v8008_v24 = vmax.f32 %v8007_v38, 0.0 }
 0x994   :  { %v3305_v12 = vpop.f32.mrf.mxu1 }
 0x995   :  { %v3259_v23 = vpop.f32.mrf.mxu0  ;;  %v3306_v62 = vadd.f32 %v3305_v12, %v3256_v16  ;;  %v3485_v16 = vpack.c.bf16 %v3465_v56, %v3463_v53  ;;  %v3423_v12 = vmul.f32 2.0, %v3289_v7  ;;  %v3276_v7 = vadd.f32 %v7260_v54, %v7255_v32 }
 0x996   :  { %v3443_v56 = vsub.f32 %v3411_v39, %v8010_v60  ;;  %v4681_v39 = vld [vmem:[#allocation5 + $0x230] sm:$0xff] }
 0x997   :  { %v3437_v15 = vmul.f32 2.0, %v3306_v62  ;;  %v7994_v62 = vld [vmem:[#allocation52_spill] sm:$0xff] }
 0x998   :  { %v7995_v13 = vmax.f32 %v7994_v62, 0.0 }
 0x999   :  { %v3469_v25 = vsub.f32 %v3437_v15, %v7983_v0  ;;  %v7998_v15 = vld [vmem:[#allocation57_spill] sm:$0xff]  ;;  %v8005_v0 = vld [vmem:[#allocation62_spill] sm:$0xff] }
 0x99b   :  { %v3487_v19 = vpack.c.bf16 %v3469_v25, %v3467_v2  ;;  %v8006_v25 = vmax.f32 %v8005_v0, 0.0 }
 0x99c   :  { %v3308_v61 = vpop.f32.mrf.mxu1 }
 0x99d   :  { %v3309_v18 = vadd.f32 %v3308_v61, %v3259_v23  ;;  %v3261_v11 = vpop.f32.mrf.mxu0  ;;  %v7992_v23 = vld [vmem:[#allocation50_spill] sm:$0xff]  ;;  %v3447_v34 = vsub.f32 %v3415_v30, %v8006_v25 }
 0x99e   :  { %v7993_v61 = vmax.f32 %v7992_v23, 0.0 }
 0x99f   :  { %v3439_v5 = vmul.f32 2.0, %v3309_v18  ;;  %v3421_v18 = vmul.f32 2.0, %v3286_v9 }
 0x9a0   :  { %v3459_v20 = vsub.f32 %v3427_v14, %v7993_v61 }
 0x9a1   :  { %v3471_v26 = vsub.f32 %v3439_v5, %v7979_v51  ;;  %v7996_v5 = vld [vmem:[#allocation55_spill] sm:$0xff]  ;;  %v3451_v51 = vsub.f32 %v3419_v21, %v8001_v8 }
 0x9a2   :  { %v7997_v42 = vmax.f32 %v7996_v5, 0.0 }
 0x9a4   :  { %v3310_v27 = vpop.f32.mrf.mxu1  ;;  %v3455_v35 = vsub.f32 %v3423_v12, %v7997_v42 }
 0x9a5   :  { %v3311_v4 = vadd.f32 %v3310_v27, %v3261_v11  ;;  %v3457_v11 = vsub.f32 %v3425_v48, %v7995_v13  ;;  %v3483_v27 = vpack.c.bf16 %v3461_v36, %v3459_v20  ;;  %v4677_v36 = vld [vmem:[#allocation5 + $0x210] sm:$0xff] }
 0x9a6   :  { %3623 = vmatmul.bf16.gmra.mxu1 %v4677_v36 }
 0x9a7   :  { %v3441_v46 = vmul.f32 2.0, %v3311_v4  ;;  %v3798_v4 = vlaneseq  ;;  %v3481_v55 = vpack.c.bf16 %v3457_v11, %v3455_v35  ;;  %v4678_v11 = vld [vmem:[#allocation5 + $0x218] sm:$0xff] }
 0x9a9   :  { %v3473_v33 = vsub.f32 %v3441_v46, %v7981_v37  ;;  %v7999_v46 = vmax.f32 %v7998_v15, 0.0  ;;  %v7306_v1 = vshrl.u32 %v3798_v4, 7  ;;  %v3413_v37 = vmul.f32 2.0, %v3276_v7  ;;  %v4679_v7 = vld [vmem:[#allocation5 + $0x220] sm:$0xff] }
 0x9ab   :  { %v3489_v41 = vpack.c.bf16 %v3473_v33, %v3471_v26  ;;  %v3453_v59 = vsub.f32 %v3421_v18, %v7999_v46  ;;  %v8002_v26 = vld [vmem:[#allocation67_spill] sm:$0xff]  ;;  %v8003_v33 = vld [vmem:[#allocation53_spill] sm:$0xff]  ;;  %vm3815_vm0 = vcmp.lt.s32.totalorder %v7306_v1, 4 }
 0x9ac   :  { %v3176_v58 = vadd.f32 %v8002_v26, %v7180_v50  ;;  %v8004_v47 = vmax.f32 %v8003_v33, 0.0  ;;  %v3445_v50 = vsub.f32 %v3413_v37, %v8008_v24 }
 0x9ad   :  { %3556 = vmatpush.bf16.msra.mxu0 %v3489_v41  ;;  %v3479_v54 = vpack.c.bf16 %v3453_v59, %v3451_v51  ;;  %v4680_v51 = vld [vmem:[#allocation5 + $0x228] sm:$0xff] }
 0x9ae   :  { %v3449_v32 = vsub.f32 %v3417_v28, %v8004_v47  ;;  %v3475_v14 = vpack.c.bf16 %v3445_v50, %v3443_v56  ;;  %v4682_v50 = vld [vmem:[#allocation5 + $0x238] sm:$0xff] }
 0x9b0   :  { %v3477_v17 = vpack.c.bf16 %v3449_v32, %v3447_v34 }
 0x9b1   :  { %3557 = vmatpush.bf16.msra.mxu0 %v3487_v19 }
 0x9b5   :  { %3558 = vmatpush.bf16.msra.mxu0 %v3485_v16 }
 0x9b6   :  { %3628 = vmatmul.bf16.gmra.mxu1 %v4678_v11 }
 0x9b9   :  { %3559 = vmatpush.bf16.msra.mxu0 %v3483_v27 }
 0x9bd   :  { %3560 = vmatpush.bf16.msra.mxu0 %v3481_v55 }
 0x9be   :  { %v3614_v22 = vpop.f32.mrf.mxu1 }
 0x9bf   :  { %v3655_v41 = vadd.f32 %v3614_v22, %v3176_v58 }
 0x9c1   :  { %3561 = vmatpush.bf16.msra.mxu0 %v3479_v54  ;;  %v3767_v2 = vadd.f32 %v7315_v10, %v3655_v41 }
 0x9c3   :  { %v3832_v29 = vsel %vm3815_vm0, %v3767_v2, -1e+30 }
 0x9c4   :  { %v3884_v19 = vmax.f32 %v3832_v29, -1e+30 }
 0x9c5   :  { %3562 = vmatpush.bf16.msra.mxu0 %v3477_v17  ;;  %v3127_v17 = vadd.f32 %v7148_v49, %v7177_v40 }
 0x9c6   :  { %v3886_v44 = vmax.f32 %v3884_v19, -1e+30  ;;  %v3616_v63 = vpop.f32.mrf.mxu1  ;;  %3633 = vmatmul.bf16.gmra.mxu1 %v4679_v7 }
 0x9c8   :  { %v3888_v53 = vmax.f32 %v3886_v44, -1e+30 }
 0x9c9   :  { %3563 = vmatpush.bf16.msra.mxu0 %v3475_v14 }
 0x9ca   :  { %v3890_v9 = vmax.f32 %v3888_v53, -1e+30 }
 0x9cc   :  { %3564 = vmatmul.bf16.vlgmr.msra.gmra.mxu0 %v7272_v31  ;;  %v3892_v48 = vmax.f32 %v3890_v9, -1e+30 }
 0x9ce   :  { %v3894_v6 = vmax.f32 %v3892_v48, -1e+30 }
 0x9d0   :  { %v3896_v3 = vmax.f32 %v3894_v6, -1e+30 }
 0x9d2   :  { %v3898_v16 = vmax.f32 %v3896_v3, -1e+30 }
 0x9d4   :  { %v3899_v12 = vrot.slane %v3898_v16, 4 }
 0x9d6   :  { %v3900_v23 = vmax.f32 %v3898_v16, %v3899_v12  ;;  %3638 = vmatmul.bf16.gmra.mxu1 %v4680_v51 }
 0x9d8   :  { %v3901_v61 = vrot.slane %v3900_v23, 2 }
 0x9da   :  { %v3902_v20 = vmax.f32 %v3900_v23, %v3901_v61 }
 0x9dc   :  { %3569 = vmatmul.bf16.gmra.mxu0 %v4676_v43  ;;  %v3903_v57 = vrot.slane %v3902_v20, 1 }
 0x9de   :  { %v3904_v18 = vmax.f32 %v3902_v20, %v3903_v57 }
 0x9e0   :  { %v3906_v62 = vsub.f32 %v3832_v29, %v3904_v18  ;;  %v3908_v13 = vsub.f32 -1e+30, %v3904_v18 }
 0x9e2   :  { %v3939_v27 = vmul.f32 1.442695, %v3906_v62  ;;  %v3943_v21 = vmul.f32 1.442695, %v3908_v13 }
 0x9e4   :  { %4712 = vpow2.f32 %v3939_v27 }
 0x9e5   :  { %4714 = vpow2.f32 %v3943_v21 }
 0x9e6   :  { %3643 = vmatmul.bf16.gmra.mxu1 %v4681_v39 }
 0x9ea   :  { %v4713_v31 = vpop.eup %4712 }
 0x9eb   :  { %v4715_v5 = vpop.eup %4714 }
 0x9ec   :  { %3574 = vmatmul.bf16.gmra.mxu0 %v4677_v36  ;;  %v4022_v42 = vadd.f32 %v4715_v5, %v4713_v31 }
 0x9ee   :  { %v4023_v35 = vadd.f32 %v4715_v5, %v4022_v42 }
 0x9f0   :  { %v4024_v4 = vadd.f32 %v4715_v5, %v4023_v35 }
 0x9f2   :  { %v4025_v28 = vadd.f32 %v4715_v5, %v4024_v4 }
 0x9f4   :  { %v4026_v15 = vadd.f32 %v4715_v5, %v4025_v28 }
 0x9f6   :  { %v4027_v46 = vadd.f32 %v4715_v5, %v4026_v15  ;;  %3648 = vmatmul.bf16.gmra.mxu1 %v4682_v50 }
 0x9f8   :  { %v4028_v59 = vadd.f32 %v4715_v5, %v4027_v46 }
 0x9fa   :  { %v4029_v55 = vadd.f32 %v4715_v5, %v4028_v59 }
 0x9fc   :  { %3579 = vmatmul.bf16.gmra.mxu0 %v4678_v11  ;;  %v4030_v30 = vadd.f32 %v4715_v5, %v4029_v55 }
 0x9fe   :  { %v4031_v52 = vadd.f32 %v4715_v5, %v4030_v30 }
 0xa00   :  { %v4032_v8 = vadd.f32 %v4715_v5, %v4031_v52 }
 0xa02   :  { %v4033_v26 = vadd.f32 %v4715_v5, %v4032_v8 }
 0xa04   :  { %v4034_v58 = vadd.f32 %v4715_v5, %v4033_v26 }
 0xa06   :  { %v4035_v37 = vadd.f32 %v4715_v5, %v4034_v58 }
 0xa08   :  { %v4036_v33 = vadd.f32 %v4715_v5, %v4035_v37 }
 0xa0a   :  { %v4037_v47 = vrot.slane %v4036_v33, 4 }
 0xa0c   :  { %3584 = vmatmul.bf16.gmra.mxu0 %v4679_v7  ;;  %v4038_v32 = vadd.f32 %v4037_v47, %v4036_v33 }
 0xa0d   :  { %v3619_v2 = vpop.f32.mrf.mxu1 }
 0xa0e   :  { %v4039_v54 = vrot.slane %v4038_v32, 2 }
 0xa10   :  { %v4040_v22 = vadd.f32 %v4039_v54, %v4038_v32 }
 0xa12   :  { %v4041_v0 = vrot.slane %v4040_v22, 1 }
 0xa14   :  { %v4042_v25 = vadd.f32 %v4041_v0, %v4040_v22 }
 0xa15   :  { %v3621_v60 = vpop.f32.mrf.mxu1 }
 0xa16   :  { %4716 = vlog2.f32 %v4042_v25 }
 0xa1c   :  { %3589 = vmatmul.bf16.gmra.mxu0 %v4680_v51  ;;  %v4717_v34 = vpop.eup %4716 }
 0xa1d   :  { %v4046_v41 = vmul.f32 0.6931472, %v4717_v34 }
 0xa1f   :  { %v4048_v38 = vsub.f32 %v3906_v62, %v4046_v41  ;;  %v4050_v24 = vsub.f32 %v3908_v13, %v4046_v41 }
 0xa21   :  { %4080 = vst [vmem:[#allocation7 + $0x8] sm:$0xff] %v4048_v38 }
 0xa22   :  { %4082 = vst [vmem:[#allocation7 + $0x18] sm:$0xff] %v4050_v24 }
 0xa23   :  { %4084 = vst [vmem:[#allocation7 + $0x28] sm:$0xff] %v4050_v24  ;;  %v3624_v63 = vpop.f32.mrf.mxu1 }
 0xa24   :  { %4086 = vst [vmem:[#allocation7 + $0x38] sm:$0xff] %v4050_v24 }
 0xa25   :  { %4088 = vst [vmem:[#allocation7 + $0x48] sm:$0xff] %v4050_v24 }
 0xa26   :  { %4090 = vst [vmem:[#allocation7 + $0x58] sm:$0xff] %v4050_v24 }
 0xa27   :  { %4092 = vst [vmem:[#allocation7 + $0x68] sm:$0xff] %v4050_v24 }
 0xa28   :  { %4094 = vst [vmem:[#allocation7 + $0x78] sm:$0xff] %v4050_v24 }
 0xa29   :  { %4096 = vst [vmem:[#allocation7 + $0x88] sm:$0xff] %v4050_v24 }
 0xa2a   :  { %4098 = vst [vmem:[#allocation7 + $0x98] sm:$0xff] %v4050_v24 }
 0xa2b   :  { %4100 = vst [vmem:[#allocation7 + $0xa8] sm:$0xff] %v4050_v24  ;;  %v3626_v36 = vpop.f32.mrf.mxu1 }
 0xa2c   :  { %3594 = vmatmul.bf16.gmra.mxu0 %v4681_v39  ;;  %4102 = vst [vmem:[#allocation7 + $0xb8] sm:$0xff] %v4050_v24 }
 0xa2d   :  { %4104 = vst [vmem:[#allocation7 + $0xc8] sm:$0xff] %v4050_v24 }
 0xa2e   :  { %4106 = vst [vmem:[#allocation7 + $0xd8] sm:$0xff] %v4050_v24 }
 0xa2f   :  { %4108 = vst [vmem:[#allocation7 + $0xe8] sm:$0xff] %v4050_v24 }
 0xa30   :  { %4110 = vst [vmem:[#allocation7 + $0xf8] sm:$0xff] %v4050_v24 }
 0xa33   :  { %v3629_v61 = vpop.f32.mrf.mxu1 }
 0xa3b   :  { %v3631_v62 = vpop.f32.mrf.mxu1 }
 0xa3c   :  { %3599 = vmatmul.bf16.gmra.mxu0 %v4682_v50 }
 0xa43   :  { %v3634_v5 = vpop.f32.mrf.mxu1 }
 0xa49   :  { %v3565_v43 = vpop.f32.mrf.mxu0 }
 0xa4a   :  { %v3654_v45 = vadd.f32 %v3565_v43, %v3127_v17 }
 0xa4b   :  { %v3636_v15 = vpop.f32.mrf.mxu1 }
 0xa4c   :  { %v3766_v56 = vadd.f32 %v7315_v10, %v3654_v45 }
 0xa4e   :  { %v3831_v29 = vsel %vm3815_vm0, %v3766_v56, -1e+30 }
 0xa4f   :  { %v3863_v19 = vmax.f32 %v3831_v29, -1e+30 }
 0xa51   :  { %v3865_v14 = vmax.f32 %v3863_v19, -1e+30  ;;  %v3567_v44 = vpop.f32.mrf.mxu0 }
 0xa53   :  { %v3867_v53 = vmax.f32 %v3865_v14, -1e+30  ;;  %v3639_v8 = vpop.f32.mrf.mxu1 }
 0xa55   :  { %v3869_v9 = vmax.f32 %v3867_v53, -1e+30 }
 0xa57   :  { %v3871_v48 = vmax.f32 %v3869_v9, -1e+30 }
 0xa59   :  { %v3873_v6 = vmax.f32 %v3871_v48, -1e+30  ;;  %v3570_v3 = vpop.f32.mrf.mxu0 }
 0xa5b   :  { %v3875_v16 = vmax.f32 %v3873_v6, -1e+30  ;;  %v3641_v47 = vpop.f32.mrf.mxu1 }
 0xa5d   :  { %v3877_v49 = vmax.f32 %v3875_v16, -1e+30 }
 0xa5f   :  { %v3878_v40 = vrot.slane %v3877_v49, 4 }
 0xa61   :  { %v3879_v12 = vmax.f32 %v3877_v49, %v3878_v40  ;;  %v3572_v23 = vpop.f32.mrf.mxu0 }
 0xa63   :  { %v3880_v10 = vrot.slane %v3879_v12, 2  ;;  %v3644_v25 = vpop.f32.mrf.mxu1 }
 0xa65   :  { %v3881_v20 = vmax.f32 %v3879_v12, %v3880_v10 }
 0xa67   :  { %v3882_v1 = vrot.slane %v3881_v20, 1 }
 0xa69   :  { %v3883_v57 = vmax.f32 %v3881_v20, %v3882_v1  ;;  %v3575_v18 = vpop.f32.mrf.mxu0 }
 0xa6b   :  { %v3905_v13 = vsub.f32 %v3831_v29, %v3883_v57  ;;  %v3907_v11 = vsub.f32 -1e+30, %v3883_v57  ;;  %v3646_v2 = vpop.f32.mrf.mxu1 }
 0xa6d   :  { %v3937_v27 = vmul.f32 1.442695, %v3905_v13  ;;  %v3941_v21 = vmul.f32 1.442695, %v3907_v11 }
 0xa6f   :  { %4718 = vpow2.f32 %v3937_v27 }
 0xa70   :  { %4720 = vpow2.f32 %v3941_v21 }
 0xa71   :  { %v3577_v31 = vpop.f32.mrf.mxu0 }
 0xa73   :  { %v3649_v56 = vpop.f32.mrf.mxu1 }
 0xa75   :  { %v4719_v42 = vpop.eup %4718 }
 0xa76   :  { %v4721_v35 = vpop.eup %4720 }
 0xa77   :  { %v4001_v4 = vadd.f32 %v4721_v35, %v4719_v42 }
 0xa79   :  { %v4002_v7 = vadd.f32 %v4721_v35, %v4001_v4  ;;  %v3580_v28 = vpop.f32.mrf.mxu0 }
 0xa7b   :  { %v4003_v46 = vadd.f32 %v4721_v35, %v4002_v7  ;;  %v3651_v53 = vpop.f32.mrf.mxu1 }
 0xa7d   :  { %v4004_v59 = vadd.f32 %v4721_v35, %v4003_v46 }
 0xa7f   :  { %v4005_v55 = vadd.f32 %v4721_v35, %v4004_v59 }
 0xa81   :  { %v4006_v30 = vadd.f32 %v4721_v35, %v4005_v55  ;;  %v3582_v52 = vpop.f32.mrf.mxu0 }
 0xa83   :  { %v4007_v51 = vadd.f32 %v4721_v35, %v4006_v30 }
 0xa85   :  { %v4008_v26 = vadd.f32 %v4721_v35, %v4007_v51 }
 0xa87   :  { %v4009_v58 = vadd.f32 %v4721_v35, %v4008_v26 }
 0xa89   :  { %v4010_v37 = vadd.f32 %v4721_v35, %v4009_v58  ;;  %v3585_v33 = vpop.f32.mrf.mxu0 }
 0xa8b   :  { %v4011_v32 = vadd.f32 %v4721_v35, %v4010_v37 }
 0xa8d   :  { %v4012_v54 = vadd.f32 %v4721_v35, %v4011_v32 }
 0xa8f   :  { %v4013_v22 = vadd.f32 %v4721_v35, %v4012_v54 }
 0xa91   :  { %v4014_v39 = vadd.f32 %v4721_v35, %v4013_v22  ;;  %v3587_v0 = vpop.f32.mrf.mxu0 }
 0xa93   :  { %v4015_v34 = vadd.f32 %v4721_v35, %v4014_v39 }
 0xa95   :  { %v4016_v41 = vrot.slane %v4015_v34, 4 }
 0xa97   :  { %v4017_v38 = vadd.f32 %v4016_v41, %v4015_v34 }
 0xa99   :  { %v4018_v24 = vrot.slane %v4017_v38, 2  ;;  %v3590_v50 = vpop.f32.mrf.mxu0 }
 0xa9b   :  { %v4019_v17 = vadd.f32 %v4018_v24, %v4017_v38 }
 0xa9d   :  { %v4020_v43 = vrot.slane %v4019_v17, 1 }
 0xa9f   :  { %v4021_v45 = vadd.f32 %v4020_v43, %v4019_v17 }
 0xaa1   :  { %4722 = vlog2.f32 %v4021_v45  ;;  %v3592_v60 = vpop.f32.mrf.mxu0 }
 0xaa7   :  { %v4723_v29 = vpop.eup %4722 }
 0xaa8   :  { %v4044_v19 = vmul.f32 0.6931472, %v4723_v29 }
 0xaa9   :  { %v3595_v14 = vpop.f32.mrf.mxu0 }
 0xaaa   :  { %v4047_v44 = vsub.f32 %v3905_v13, %v4044_v19  ;;  %v4049_v63 = vsub.f32 %v3907_v11, %v4044_v19 }
 0xaac   :  { %4079 = vst [vmem:[#allocation7] sm:$0xff] %v4047_v44 }
 0xaad   :  { %4081 = vst [vmem:[#allocation7 + $0x10] sm:$0xff] %v4049_v63 }
 0xaae   :  { %4083 = vst [vmem:[#allocation7 + $0x20] sm:$0xff] %v4049_v63 }
 0xaaf   :  { %4085 = vst [vmem:[#allocation7 + $0x30] sm:$0xff] %v4049_v63 }
 0xab0   :  { %4087 = vst [vmem:[#allocation7 + $0x40] sm:$0xff] %v4049_v63 }
 0xab1   :  { %4089 = vst [vmem:[#allocation7 + $0x50] sm:$0xff] %v4049_v63  ;;  %v3597_v9 = vpop.f32.mrf.mxu0 }
 0xab2   :  { %4091 = vst [vmem:[#allocation7 + $0x60] sm:$0xff] %v4049_v63 }
 0xab3   :  { %4093 = vst [vmem:[#allocation7 + $0x70] sm:$0xff] %v4049_v63 }
 0xab4   :  { %4095 = vst [vmem:[#allocation7 + $0x80] sm:$0xff] %v4049_v63 }
 0xab5   :  { %4097 = vst [vmem:[#allocation7 + $0x90] sm:$0xff] %v4049_v63 }
 0xab6   :  { %4099 = vst [vmem:[#allocation7 + $0xa0] sm:$0xff] %v4049_v63 }
 0xab7   :  { %4101 = vst [vmem:[#allocation7 + $0xb0] sm:$0xff] %v4049_v63 }
 0xab8   :  { %4103 = vst [vmem:[#allocation7 + $0xc0] sm:$0xff] %v4049_v63 }
 0xab9   :  { %4105 = vst [vmem:[#allocation7 + $0xd0] sm:$0xff] %v4049_v63  ;;  %v3600_v48 = vpop.f32.mrf.mxu0 }
 0xaba   :  { %4107 = vst [vmem:[#allocation7 + $0xe0] sm:$0xff] %v4049_v63 }
 0xabb   :  { %4109 = vst [vmem:[#allocation7 + $0xf0] sm:$0xff] %v4049_v63 }
 0xabc   :  { %4123 = dma.vmem_to_hbm [thread:$0]  %s4116_s6, 4096, %s4118_s9, [#allocation4], %s4832_s10, %s4832_s10, %s4833_s11  }
 0xac1   :  { %v3602_v6 = vpop.f32.mrf.mxu0 }
 0xac2   :  { %4822 = dma.done.wait [#allocation4], 4096  }
 0xac3   :  { %4823 = vsyncadd [#allocation4], 4294963200 }
 0xac4   :  { %4128 = vsyncpa [#allocation3], 1 }
 0xac5   :  { %4129 = vsyncpa [#allocation6], 1 }
 0xac6   :  { %4130 = vsyncpa [#allocation4], 1 }

</bundles_post_ra>
